<compile_context>
chip_gen: v7x
topology: tpu7x:2x2x1
jax: 0.10.0
libtpu: 0.0.40
codegen_flags: <defaults>
</compile_context>

<pallas_src>
import functools
import jax
import jax.numpy as jnp
from jax.experimental import pallas as pl
from jax.experimental.pallas import tpu as pltpu

# ----------------------------- scaled-down Electra config -------------------
VOCAB = 100
MAX_POS = 32
TYPE_VOCAB = 2
EMB_DIM = 32        # electra embedding_size (128 in the real model)
HIDDEN = 64         # electra hidden_size (256 in the real model)
NUM_LAYERS = 2      # 12 in the real model
NUM_HEADS = 4
HEAD_DIM = HIDDEN // NUM_HEADS
INTERMEDIATE = 128  # 1024 in the real model
HEAD_HIDDEN = 128   # hidden_layers=[512] in the real module, scaled down
NUM_OUTPUTS = 1
LN_EPS = 1e-12
NUM_ENCODERS = 2    # evidence encoder (l1) and topic encoder (l2)


# ----------------------------- fused dual-encoder kernel --------------------
def _layernorm(x, g, b, eps=LN_EPS):
    mean = jnp.mean(x, axis=-1, keepdims=True)
    var = jnp.mean((x - mean) ** 2, axis=-1, keepdims=True)
    return (x - mean) * jax.lax.rsqrt(var + eps) * g + b


def _encoder_kernel(x_emb_ref, mask_ref,
                    emb_ln_g_ref, emb_ln_b_ref, proj_w_ref, proj_b_ref,
                    wqkv_ref, bqkv_ref, wo_ref, bo_ref,
                    ln1_g_ref, ln1_b_ref,
                    w1_ref, b1_ref, w2_ref, b2_ref,
                    ln2_g_ref, ln2_b_ref,
                    cls_ref, *, batch, seq):
    """Runs one full Electra encoder (the grid axis picks which one)."""
    scale = 1.0 / (HEAD_DIM ** 0.5)

    # Embedding LayerNorm (no residual input) + projection EMB_DIM -> HIDDEN.
    x = _layernorm(x_emb_ref[...], emb_ln_g_ref[...], emb_ln_b_ref[...])
    x = jnp.dot(x, proj_w_ref[...],
                preferred_element_type=jnp.float32) + proj_b_ref[...]   # [M, H]

    for li in range(NUM_LAYERS):
        # Fused QKV projection: [M, H] @ [H, 3H].
        qkv = jnp.dot(x, wqkv_ref[li],
                      preferred_element_type=jnp.float32) + bqkv_ref[li]
        q = qkv[:, 0 * HIDDEN:1 * HIDDEN]
        k = qkv[:, 1 * HIDDEN:2 * HIDDEN]
        v = qkv[:, 2 * HIDDEN:3 * HIDDEN]

        # Attention entirely in-kernel on the [B*S, H] layout (static unroll
        # over batch and heads; no wrapper-side head transposes / HBM trips).
        batch_ctx = []
        for b in range(batch):
            rows = slice(b * seq, (b + 1) * seq)
            m = mask_ref[b]                                   # [1, S] additive mask
            head_ctx = []
            for h in range(NUM_HEADS):
                cols = slice(h * HEAD_DIM, (h + 1) * HEAD_DIM)
                qs = q[rows, cols]                            # [S, Dh]
                ks = k[rows, cols]
                vs = v[rows, cols]
                s = jax.lax.dot_general(
                    qs, ks, (((1,), (1,)), ((), ())),
                    preferred_element_type=jnp.float32) * scale        # [S, S]
                s = s + m
                s = s - jnp.max(s, axis=-1, keepdims=True)
                p = jnp.exp(s)
                p = p * pl.reciprocal(jnp.sum(p, axis=-1, keepdims=True),
                                      approx=True)
                head_ctx.append(jnp.dot(p, vs,
                                        preferred_element_type=jnp.float32))
            batch_ctx.append(jnp.concatenate(head_ctx, axis=-1))        # [S, H]
        ctx = jnp.concatenate(batch_ctx, axis=0)                        # [M, H]

        attn_out = jnp.dot(ctx, wo_ref[li],
                           preferred_element_type=jnp.float32) + bo_ref[li]
        x = _layernorm(attn_out + x, ln1_g_ref[li], ln1_b_ref[li])

        hmid = jnp.dot(x, w1_ref[li],
                       preferred_element_type=jnp.float32) + b1_ref[li]
        # TODO(synk): HF Electra uses erf-GELU; tanh-approx GELU keeps the
        # transcendental on the EUP and matches the previous (validated) kernel.
        hmid = jax.nn.gelu(hmid, approximate=True)
        ffn = jnp.dot(hmid, w2_ref[li],
                      preferred_element_type=jnp.float32) + b2_ref[li]
        x = _layernorm(ffn + x, ln2_g_ref[li], ln2_b_ref[li])

    # Only the CLS rows (token 0 of every sequence) leave the kernel.
    cls = jnp.concatenate([x[b * seq:b * seq + 1, :] for b in range(batch)],
                          axis=0)                                       # [B, H]
    cls_ref[...] = cls


def _enc_spec(shape):
    """Full-array block per encoder: leading encoder axis squeezed out."""
    n = len(shape)
    return pl.BlockSpec((None,) + tuple(shape),
                        lambda e, _n=n: (e,) + (0,) * _n)


def dual_encoder(stacked, x_emb, addmask, batch, seq):
    """One pallas_call; grid=(2,) runs the evidence and topic encoders."""
    in_arrays = [
        x_emb,                     # [2, B*S, EMB_DIM]
        addmask,                   # [2, B, 1, S]
        stacked["emb_ln_g"],       # [2, 1, EMB_DIM]
        stacked["emb_ln_b"],       # [2, 1, EMB_DIM]
        stacked["proj_w"],         # [2, EMB_DIM, HIDDEN]
        stacked["proj_b"],         # [2, 1, HIDDEN]
        stacked["wqkv"],           # [2, NL, HIDDEN, 3*HIDDEN]
        stacked["bqkv"],           # [2, NL, 1, 3*HIDDEN]
        stacked["wo"],             # [2, NL, HIDDEN, HIDDEN]
        stacked["bo"],             # [2, NL, 1, HIDDEN]
        stacked["ln1_g"],          # [2, NL, 1, HIDDEN]
        stacked["ln1_b"],          # [2, NL, 1, HIDDEN]
        stacked["w1"],             # [2, NL, HIDDEN, INTERMEDIATE]
        stacked["b1"],             # [2, NL, 1, INTERMEDIATE]
        stacked["w2"],             # [2, NL, INTERMEDIATE, HIDDEN]
        stacked["b2"],             # [2, NL, 1, HIDDEN]
        stacked["ln2_g"],          # [2, NL, 1, HIDDEN]
        stacked["ln2_b"],          # [2, NL, 1, HIDDEN]
    ]
    in_specs = [_enc_spec(a.shape[1:]) for a in in_arrays]
    kernel = functools.partial(_encoder_kernel, batch=batch, seq=seq)
    return pl.pallas_call(
        kernel,
        out_shape=jax.ShapeDtypeStruct((NUM_ENCODERS, batch, HIDDEN),
                                       jnp.float32),
        grid=(NUM_ENCODERS,),
        in_specs=in_specs,
        out_specs=_enc_spec((batch, HIDDEN)),
        compiler_params=pltpu.CompilerParams(
            dimension_semantics=("parallel",)),   # shards encoders across v7x TCs
    )(*in_arrays)


# ----------------------------- fused MLP head kernel ------------------------
def _head_kernel(cls_ev_ref, cls_tp_ref, pc_ref,
                 h1_w_ref, h1_b_ref, fin_w_ref, fin_b_ref, out_ref):
    a = cls_ev_ref[...]                             # [B, H]
    c = cls_tp_ref[...] * pc_ref[...]               # [B, H] * [B, 1]
    # concat([a, c], -1) @ h1_w  ==  a @ h1_w[:H] + c @ h1_w[H:]
    h = (jnp.dot(a, h1_w_ref[0:HIDDEN, :], preferred_element_type=jnp.float32)
         + jnp.dot(c, h1_w_ref[HIDDEN:2 * HIDDEN, :],
                   preferred_element_type=jnp.float32)
         + h1_b_ref[...])
    h = jnp.maximum(h, 0.0)                         # ReLU
    # TODO(synk): dropout3 / hidden Dropout layers are identity in eval mode.
    out = jnp.dot(h, fin_w_ref[...],
                  preferred_element_type=jnp.float32) + fin_b_ref[...]
    out_ref[...] = out


def head_forward(head_params, cls_ev, cls_tp, procon):
    B = cls_ev.shape[0]
    pc = (2.0 * procon.astype(jnp.float32) - 1.0).reshape(B, 1)
    return pl.pallas_call(
        _head_kernel,
        out_shape=jax.ShapeDtypeStruct((B, NUM_OUTPUTS), jnp.float32),
    )(cls_ev, cls_tp, pc,
      head_params["h1_w"], head_params["h1_b"],
      head_params["fin_w"], head_params["fin_b"])


# ----------------------------- parameter init -------------------------------
def _dense(key, fan_in, fan_out):
    return (jax.random.normal(key, (fan_in, fan_out), jnp.float32) * 0.02,
            jnp.zeros((fan_out,), jnp.float32))


def init_electra(key):
    keys = jax.random.split(key, 4 + NUM_LAYERS)
    p = {
        "word_emb": jax.random.normal(keys[0], (VOCAB, EMB_DIM), jnp.float32) * 0.02,
        "pos_emb": jax.random.normal(keys[1], (MAX_POS, EMB_DIM), jnp.float32) * 0.02,
        "type_emb": jax.random.normal(keys[2], (TYPE_VOCAB, EMB_DIM), jnp.float32) * 0.02,
        "emb_ln_g": jnp.ones((1, EMB_DIM), jnp.float32),
        "emb_ln_b": jnp.zeros((1, EMB_DIM), jnp.float32),
    }
    pw, pb = _dense(keys[3], EMB_DIM, HIDDEN)
    p["proj_w"] = pw
    p["proj_b"] = pb.reshape(1, HIDDEN)

    cols = {n: [] for n in ["wqkv", "bqkv", "wo", "bo", "ln1_g", "ln1_b",
                            "w1", "b1", "w2", "b2", "ln2_g", "ln2_b"]}
    for li in range(NUM_LAYERS):
        lk = jax.random.split(keys[4 + li], 6)
        wq, bq = _dense(lk[0], HIDDEN, HIDDEN)
        wk, bk = _dense(lk[1], HIDDEN, HIDDEN)
        wv, bv = _dense(lk[2], HIDDEN, HIDDEN)
        cols["wqkv"].append(jnp.concatenate([wq, wk, wv], axis=1))        # [H, 3H]
        cols["bqkv"].append(jnp.concatenate([bq, bk, bv]).reshape(1, 3 * HIDDEN))
        w, b = _dense(lk[3], HIDDEN, HIDDEN)
        cols["wo"].append(w); cols["bo"].append(b.reshape(1, HIDDEN))
        cols["ln1_g"].append(jnp.ones((1, HIDDEN), jnp.float32))
        cols["ln1_b"].append(jnp.zeros((1, HIDDEN), jnp.float32))
        w, b = _dense(lk[4], HIDDEN, INTERMEDIATE)
        cols["w1"].append(w); cols["b1"].append(b.reshape(1, INTERMEDIATE))
        w, b = _dense(lk[5], INTERMEDIATE, HIDDEN)
        cols["w2"].append(w); cols["b2"].append(b.reshape(1, HIDDEN))
        cols["ln2_g"].append(jnp.ones((1, HIDDEN), jnp.float32))
        cols["ln2_b"].append(jnp.zeros((1, HIDDEN), jnp.float32))
    for name, lst in cols.items():
        p[name] = jnp.stack(lst, axis=0)
    return p


def init_head(key):
    k1, k2 = jax.random.split(key)
    h1_w, h1_b = _dense(k1, 2 * HIDDEN, HEAD_HIDDEN)
    fin_w, fin_b = _dense(k2, HEAD_HIDDEN, NUM_OUTPUTS)
    return {"h1_w": h1_w, "h1_b": h1_b.reshape(1, HEAD_HIDDEN),
            "fin_w": fin_w, "fin_b": fin_b.reshape(1, NUM_OUTPUTS)}


# ----------------------------- model forward --------------------------------
_ENC_WEIGHT_KEYS = ["emb_ln_g", "emb_ln_b", "proj_w", "proj_b",
                    "wqkv", "bqkv", "wo", "bo", "ln1_g", "ln1_b",
                    "w1", "b1", "w2", "b2", "ln2_g", "ln2_b"]


def _embed(params, input_ids):
    # TODO(synk): embedding-table gathers are data-dependent; kept as XLA glue.
    B, S = input_ids.shape
    emb = (params["word_emb"][input_ids]
           + params["pos_emb"][jnp.arange(S)][None, :, :]
           + params["type_emb"][0][None, None, :])          # [B, S, E]
    return emb.reshape(B * S, EMB_DIM)


def distilbert_simple_forward(params_l1, params_l2, params_head,
                              input_ids_evidence, attention_mask_evidence,
                              input_ids_topic, attention_mask_topic, procon):
    B, S = input_ids_evidence.shape

    x_emb = jnp.stack([_embed(params_l1, input_ids_evidence),
                       _embed(params_l2, input_ids_topic)], axis=0)   # [2, B*S, E]

    def addmask(m):
        return ((1.0 - m.astype(jnp.float32)) * -10000.0).reshape(B, 1, S)

    mask = jnp.stack([addmask(attention_mask_evidence),
                      addmask(attention_mask_topic)], axis=0)         # [2, B, 1, S]

    stacked = {k: jnp.stack([params_l1[k], params_l2[k]], axis=0)
               for k in _ENC_WEIGHT_KEYS}

    cls = dual_encoder(stacked, x_emb, mask, B, S)                    # [2, B, H]
    return head_forward(params_head, cls[0], cls[1], procon)          # [B, 1]


forward = jax.jit(distilbert_simple_forward)


# ----------------------------- main ------------------------------------------
if __name__ == "__main__":
    B, S = 2, 8
    root = jax.random.PRNGKey(0)
    k_l1, k_l2, k_head, k_ids1, k_ids2, k_pc = jax.random.split(root, 6)

    params_l1 = init_electra(k_l1)
    params_l2 = init_electra(k_l2)
    params_head = init_head(k_head)

    input_ids_evidence = jax.random.randint(k_ids1, (B, S), 0, VOCAB, jnp.int32)
    input_ids_topic = jax.random.randint(k_ids2, (B, S), 0, VOCAB, jnp.int32)
    attention_mask_evidence = jnp.ones((B, S), jnp.int32).at[:, -2:].set(0)
    attention_mask_topic = jnp.ones((B, S), jnp.int32).at[:, -3:].set(0)
    procon = jax.random.randint(k_pc, (B,), 0, 2, jnp.int32).astype(jnp.float32)

    out = forward(params_l1, params_l2, params_head,
                  input_ids_evidence, attention_mask_evidence,
                  input_ids_topic, attention_mask_topic, procon)
    out = jax.block_until_ready(out)
    assert out.shape == (B, NUM_OUTPUTS) and out.dtype == jnp.float32
    print("KERNEL_OK")
</pallas_src>

<mosaic_0001>
module attributes {stable_mosaic.version = 11 : i64} {
  func.func @_head_kernel(%arg0: memref<2x64xf32, #tpu.memory_space<vmem>>, %arg1: memref<2x64xf32, #tpu.memory_space<vmem>>, %arg2: memref<2x1xf32, #tpu.memory_space<vmem>>, %arg3: memref<128x128xf32, #tpu.memory_space<vmem>>, %arg4: memref<1x128xf32, #tpu.memory_space<vmem>>, %arg5: memref<128x1xf32, #tpu.memory_space<vmem>>, %arg6: memref<1x1xf32, #tpu.memory_space<vmem>>, %arg7: memref<2x1xf32, #tpu.memory_space<vmem>>) attributes {dimension_semantics = [], scalar_prefetch = 0 : i64, scratch_operands = 0 : i64, tpu.core_type = #tpu.core_type<tc>} {
    %c0 = arith.constant 0 : index
    %c0_0 = arith.constant 0 : index
    %0 = vector.load %arg0[%c0, %c0_0] : memref<2x64xf32, #tpu.memory_space<vmem>>, vector<2x64xf32>
    %c0_1 = arith.constant 0 : index
    %c0_2 = arith.constant 0 : index
    %1 = vector.load %arg1[%c0_1, %c0_2] : memref<2x64xf32, #tpu.memory_space<vmem>>, vector<2x64xf32>
    %c0_3 = arith.constant 0 : index
    %c0_4 = arith.constant 0 : index
    %2 = vector.load %arg2[%c0_3, %c0_4] : memref<2x1xf32, #tpu.memory_space<vmem>>, vector<2x1xf32>
    %3 = vector.broadcast %2 : vector<2x1xf32> to vector<2x64xf32>
    %4 = arith.mulf %1, %3 : vector<2x64xf32>
    %c0_5 = arith.constant 0 : index
    %c0_6 = arith.constant 0 : index
    %5 = vector.load %arg3[%c0_5, %c0_6] : memref<128x128xf32, #tpu.memory_space<vmem>>, vector<64x128xf32>
    %cst = arith.constant dense<0.000000e+00> : vector<2x128xf32>
    %6 = tpu.matmul %0, %5, %cst {dimension_numbers = #tpu.dot_dimension_numbers<[1], [0], [0], [1], [0, 0, 1, 1], [], []>} : vector<2x64xf32>, vector<64x128xf32>, vector<2x128xf32> -> vector<2x128xf32>
    %c64 = arith.constant 64 : index
    %c0_7 = arith.constant 0 : index
    %7 = vector.load %arg3[%c64, %c0_7] : memref<128x128xf32, #tpu.memory_space<vmem>>, vector<64x128xf32>
    %cst_8 = arith.constant dense<0.000000e+00> : vector<2x128xf32>
    %8 = tpu.matmul %4, %7, %cst_8 {dimension_numbers = #tpu.dot_dimension_numbers<[1], [0], [0], [1], [0, 0, 1, 1], [], []>} : vector<2x64xf32>, vector<64x128xf32>, vector<2x128xf32> -> vector<2x128xf32>
    %9 = arith.addf %6, %8 : vector<2x128xf32>
    %c0_9 = arith.constant 0 : index
    %c0_10 = arith.constant 0 : index
    %10 = vector.load %arg4[%c0_9, %c0_10] : memref<1x128xf32, #tpu.memory_space<vmem>>, vector<1x128xf32>
    %11 = vector.broadcast %10 : vector<1x128xf32> to vector<2x128xf32>
    %12 = arith.addf %9, %11 : vector<2x128xf32>
    %cst_11 = arith.constant 0.000000e+00 : f32
    %13 = vector.broadcast %cst_11 : f32 to vector<2x128xf32>
    %14 = arith.maximumf %12, %13 : vector<2x128xf32>
    %c0_12 = arith.constant 0 : index
    %c0_13 = arith.constant 0 : index
    %15 = vector.load %arg5[%c0_12, %c0_13] : memref<128x1xf32, #tpu.memory_space<vmem>>, vector<128x1xf32>
    %cst_14 = arith.constant dense<0.000000e+00> : vector<2x1xf32>
    %16 = tpu.matmul %14, %15, %cst_14 {dimension_numbers = #tpu.dot_dimension_numbers<[1], [0], [0], [1], [0, 0, 1, 1], [], []>} : vector<2x128xf32>, vector<128x1xf32>, vector<2x1xf32> -> vector<2x1xf32>
    %c0_15 = arith.constant 0 : index
    %c0_16 = arith.constant 0 : index
    %17 = vector.load %arg6[%c0_15, %c0_16] : memref<1x1xf32, #tpu.memory_space<vmem>>, vector<1x1xf32>
    %18 = vector.broadcast %17 : vector<1x1xf32> to vector<2x1xf32>
    %19 = arith.addf %16, %18 : vector<2x1xf32>
    %c0_17 = arith.constant 0 : index
    %c0_18 = arith.constant 0 : index
    %20 = vector.load %arg7[%c0_17, %c0_18] : memref<2x1xf32, #tpu.memory_space<vmem>>, vector<2x1xf32>
    tpu.vector_store %arg7[%c0_17, %c0_18], %19 {strides = array<i32>} : memref<2x1xf32, #tpu.memory_space<vmem>>, vector<2x1xf32>,
    return
  }
}

module attributes {stable_mosaic.version = 11 : i64} {
  func.func @_encoder_kernel(%arg0: i32, %arg1: memref<1x16x32xf32, #tpu.memory_space<vmem>>, %arg2: memref<1x2x1x8xf32, #tpu.memory_space<vmem>>, %arg3: memref<1x1x32xf32, #tpu.memory_space<vmem>>, %arg4: memref<1x1x32xf32, #tpu.memory_space<vmem>>, %arg5: memref<1x32x64xf32, #tpu.memory_space<vmem>>, %arg6: memref<1x1x64xf32, #tpu.memory_space<vmem>>, %arg7: memref<1x2x64x192xf32, #tpu.memory_space<vmem>>, %arg8: memref<1x2x1x192xf32, #tpu.memory_space<vmem>>, %arg9: memref<1x2x64x64xf32, #tpu.memory_space<vmem>>, %arg10: memref<1x2x1x64xf32, #tpu.memory_space<vmem>>, %arg11: memref<1x2x1x64xf32, #tpu.memory_space<vmem>>, %arg12: memref<1x2x1x64xf32, #tpu.memory_space<vmem>>, %arg13: memref<1x2x64x128xf32, #tpu.memory_space<vmem>>, %arg14: memref<1x2x1x128xf32, #tpu.memory_space<vmem>>, %arg15: memref<1x2x128x64xf32, #tpu.memory_space<vmem>>, %arg16: memref<1x2x1x64xf32, #tpu.memory_space<vmem>>, %arg17: memref<1x2x1x64xf32, #tpu.memory_space<vmem>>, %arg18: memref<1x2x1x64xf32, #tpu.memory_space<vmem>>, %arg19: memref<1x2x64xf32, #tpu.memory_space<vmem>>) attributes {dimension_semantics = [#tpu.dimension_semantics<parallel>], iteration_bounds = array<i64: 2>, scalar_prefetch = 0 : i64, scratch_operands = 0 : i64, tpu.core_type = #tpu.core_type<tc>, window_params = [{transform_indices = @transform_0, window_bounds = array<i64: 1, 16, 32>}, {transform_indices = @transform_1, window_bounds = array<i64: 1, 2, 1, 8>}, {transform_indices = @transform_2, window_bounds = array<i64: 1, 1, 32>}, {transform_indices = @transform_3, window_bounds = array<i64: 1, 1, 32>}, {transform_indices = @transform_4, window_bounds = array<i64: 1, 32, 64>}, {transform_indices = @transform_5, window_bounds = array<i64: 1, 1, 64>}, {transform_indices = @transform_6, window_bounds = array<i64: 1, 2, 64, 192>}, {transform_indices = @transform_7, window_bounds = array<i64: 1, 2, 1, 192>}, {transform_indices = @transform_8, window_bounds = array<i64: 1, 2, 64, 64>}, {transform_indices = @transform_9, window_bounds = array<i64: 1, 2, 1, 64>}, {transform_indices = @transform_10, window_bounds = array<i64: 1, 2, 1, 64>}, {transform_indices = @transform_11, window_bounds = array<i64: 1, 2, 1, 64>}, {transform_indices = @transform_12, window_bounds = array<i64: 1, 2, 64, 128>}, {transform_indices = @transform_13, window_bounds = array<i64: 1, 2, 1, 128>}, {transform_indices = @transform_14, window_bounds = array<i64: 1, 2, 128, 64>}, {transform_indices = @transform_15, window_bounds = array<i64: 1, 2, 1, 64>}, {transform_indices = @transform_16, window_bounds = array<i64: 1, 2, 1, 64>}, {transform_indices = @transform_17, window_bounds = array<i64: 1, 2, 1, 64>}, {transform_indices = @transform_18, window_bounds = array<i64: 1, 2, 64>}]} {
    %c0 = arith.constant 0 : index
    %c0_0 = arith.constant 0 : index
    %c0_1 = arith.constant 0 : index
    %0 = vector.load %arg1[%c0, %c0_0, %c0_1] : memref<1x16x32xf32, #tpu.memory_space<vmem>>, vector<1x16x32xf32>
    %1 = vector.shape_cast %0 : vector<1x16x32xf32> to vector<16x32xf32>
    %c0_2 = arith.constant 0 : index
    %c0_3 = arith.constant 0 : index
    %c0_4 = arith.constant 0 : index
    %2 = vector.load %arg3[%c0_2, %c0_3, %c0_4] : memref<1x1x32xf32, #tpu.memory_space<vmem>>, vector<1x1x32xf32>
    %3 = vector.shape_cast %2 : vector<1x1x32xf32> to vector<1x32xf32>
    %c0_5 = arith.constant 0 : index
    %c0_6 = arith.constant 0 : index
    %c0_7 = arith.constant 0 : index
    %4 = vector.load %arg4[%c0_5, %c0_6, %c0_7] : memref<1x1x32xf32, #tpu.memory_space<vmem>>, vector<1x1x32xf32>
    %5 = vector.shape_cast %4 : vector<1x1x32xf32> to vector<1x32xf32>
    %cst = arith.constant dense<0.000000e+00> : vector<16xf32>
    %6 = vector.multi_reduction <add>, %1, %cst [1] : vector<16x32xf32> to vector<16xf32>
    %7 = vector.shape_cast %6 : vector<16xf32> to vector<16x1xf32>
    %cst_8 = arith.constant 3.200000e+01 : f32
    %8 = vector.broadcast %cst_8 : f32 to vector<16x1xf32>
    %9 = arith.divf %7, %8 : vector<16x1xf32>
    %10 = vector.broadcast %9 : vector<16x1xf32> to vector<16x32xf32>
    %11 = arith.subf %1, %10 : vector<16x32xf32>
    %12 = arith.mulf %11, %11 : vector<16x32xf32>
    %cst_9 = arith.constant dense<0.000000e+00> : vector<16xf32>
    %13 = vector.multi_reduction <add>, %12, %cst_9 [1] : vector<16x32xf32> to vector<16xf32>
    %14 = vector.shape_cast %13 : vector<16xf32> to vector<16x1xf32>
    %cst_10 = arith.constant 3.200000e+01 : f32
    %15 = vector.broadcast %cst_10 : f32 to vector<16x1xf32>
    %16 = arith.divf %14, %15 : vector<16x1xf32>
    %17 = vector.broadcast %9 : vector<16x1xf32> to vector<16x32xf32>
    %18 = arith.subf %1, %17 : vector<16x32xf32>
    %cst_11 = arith.constant 9.99999996E-13 : f32
    %19 = vector.broadcast %cst_11 : f32 to vector<16x1xf32>
    %20 = arith.addf %16, %19 : vector<16x1xf32>
    %21 = math.rsqrt %20 : vector<16x1xf32>
    %22 = vector.broadcast %21 : vector<16x1xf32> to vector<16x32xf32>
    %23 = arith.mulf %18, %22 : vector<16x32xf32>
    %24 = vector.broadcast %3 : vector<1x32xf32> to vector<16x32xf32>
    %25 = arith.mulf %23, %24 : vector<16x32xf32>
    %26 = vector.broadcast %5 : vector<1x32xf32> to vector<16x32xf32>
    %27 = arith.addf %25, %26 : vector<16x32xf32>
    %c0_12 = arith.constant 0 : index
    %c0_13 = arith.constant 0 : index
    %c0_14 = arith.constant 0 : index
    %28 = vector.load %arg5[%c0_12, %c0_13, %c0_14] : memref<1x32x64xf32, #tpu.memory_space<vmem>>, vector<1x32x64xf32>
    %29 = vector.shape_cast %28 : vector<1x32x64xf32> to vector<32x64xf32>
    %cst_15 = arith.constant dense<0.000000e+00> : vector<16x64xf32>
    %30 = tpu.matmul %27, %29, %cst_15 {dimension_numbers = #tpu.dot_dimension_numbers<[1], [0], [0], [1], [0, 0, 1, 1], [], []>} : vector<16x32xf32>, vector<32x64xf32>, vector<16x64xf32> -> vector<16x64xf32>
    %c0_16 = arith.constant 0 : index
    %c0_17 = arith.constant 0 : index
    %c0_18 = arith.constant 0 : index
    %31 = vector.load %arg6[%c0_16, %c0_17, %c0_18] : memref<1x1x64xf32, #tpu.memory_space<vmem>>, vector<1x1x64xf32>
    %32 = vector.shape_cast %31 : vector<1x1x64xf32> to vector<1x64xf32>
    %33 = vector.broadcast %32 : vector<1x64xf32> to vector<16x64xf32>
    %34 = arith.addf %30, %33 : vector<16x64xf32>
    %c0_19 = arith.constant 0 : index
    %c0_20 = arith.constant 0 : index
    %c0_21 = arith.constant 0 : index
    %c0_22 = arith.constant 0 : index
    %35 = vector.load %arg7[%c0_19, %c0_20, %c0_21, %c0_22] : memref<1x2x64x192xf32, #tpu.memory_space<vmem>>, vector<1x1x64x192xf32>
    %36 = vector.shape_cast %35 : vector<1x1x64x192xf32> to vector<64x192xf32>
    %cst_23 = arith.constant dense<0.000000e+00> : vector<16x192xf32>
    %37 = tpu.matmul %34, %36, %cst_23 {dimension_numbers = #tpu.dot_dimension_numbers<[1], [0], [0], [1], [0, 0, 1, 1], [], []>} : vector<16x64xf32>, vector<64x192xf32>, vector<16x192xf32> -> vector<16x192xf32>
    %c0_24 = arith.constant 0 : index
    %c0_25 = arith.constant 0 : index
    %c0_26 = arith.constant 0 : index
    %c0_27 = arith.constant 0 : index
    %38 = vector.load %arg8[%c0_24, %c0_25, %c0_26, %c0_27] : memref<1x2x1x192xf32, #tpu.memory_space<vmem>>, vector<1x1x1x192xf32>
    %39 = vector.shape_cast %38 : vector<1x1x1x192xf32> to vector<1x192xf32>
    %40 = vector.broadcast %39 : vector<1x192xf32> to vector<16x192xf32>
    %41 = arith.addf %37, %40 : vector<16x192xf32>
    %42 = vector.extract_strided_slice %41 {offsets = [0, 0], sizes = [16, 64], strides = [1, 1]} : vector<16x192xf32> to vector<16x64xf32>
    %43 = vector.extract_strided_slice %41 {offsets = [0, 64], sizes = [16, 64], strides = [1, 1]} : vector<16x192xf32> to vector<16x64xf32>
    %44 = vector.extract_strided_slice %41 {offsets = [0, 128], sizes = [16, 64], strides = [1, 1]} : vector<16x192xf32> to vector<16x64xf32>
    %c0_28 = arith.constant 0 : index
    %c0_29 = arith.constant 0 : index
    %c0_30 = arith.constant 0 : index
    %c0_31 = arith.constant 0 : index
    %45 = vector.load %arg2[%c0_28, %c0_29, %c0_30, %c0_31] : memref<1x2x1x8xf32, #tpu.memory_space<vmem>>, vector<1x1x1x8xf32>
    %46 = vector.shape_cast %45 : vector<1x1x1x8xf32> to vector<1x8xf32>
    %47 = vector.extract_strided_slice %42 {offsets = [0, 0], sizes = [8, 16], strides = [1, 1]} : vector<16x64xf32> to vector<8x16xf32>
    %48 = vector.extract_strided_slice %43 {offsets = [0, 0], sizes = [8, 16], strides = [1, 1]} : vector<16x64xf32> to vector<8x16xf32>
    %49 = vector.extract_strided_slice %44 {offsets = [0, 0], sizes = [8, 16], strides = [1, 1]} : vector<16x64xf32> to vector<8x16xf32>
    %cst_32 = arith.constant dense<0.000000e+00> : vector<8x8xf32>
    %50 = tpu.matmul %47, %48, %cst_32 {dimension_numbers = #tpu.dot_dimension_numbers<[1], [1], [0], [0], [0, 0, 1, 0], [], []>} : vector<8x16xf32>, vector<8x16xf32>, vector<8x8xf32> -> vector<8x8xf32>
    %cst_33 = arith.constant 2.500000e-01 : f32
    %51 = vector.broadcast %cst_33 : f32 to vector<8x8xf32>
    %52 = arith.mulf %50, %51 : vector<8x8xf32>
    %53 = vector.broadcast %46 : vector<1x8xf32> to vector<8x8xf32>
    %54 = arith.addf %52, %53 : vector<8x8xf32>
    %cst_34 = arith.constant dense<0xFF800000> : vector<8xf32>
    %55 = vector.multi_reduction <maximumf>, %54, %cst_34 [1] : vector<8x8xf32> to vector<8xf32>
    %56 = vector.shape_cast %55 : vector<8xf32> to vector<8x1xf32>
    %57 = vector.broadcast %56 : vector<8x1xf32> to vector<8x8xf32>
    %58 = arith.subf %54, %57 : vector<8x8xf32>
    %59 = math.exp %58 : vector<8x8xf32>
    %cst_35 = arith.constant dense<0.000000e+00> : vector<8xf32>
    %60 = vector.multi_reduction <add>, %59, %cst_35 [1] : vector<8x8xf32> to vector<8xf32>
    %61 = vector.shape_cast %60 : vector<8xf32> to vector<8x1xf32>
    %62 = tpu.reciprocal %61 {approx = true} : vector<8x1xf32> -> vector<8x1xf32>
    %63 = vector.broadcast %62 : vector<8x1xf32> to vector<8x8xf32>
    %64 = arith.mulf %59, %63 : vector<8x8xf32>
    %cst_36 = arith.constant dense<0.000000e+00> : vector<8x16xf32>
    %65 = tpu.matmul %64, %49, %cst_36 {dimension_numbers = #tpu.dot_dimension_numbers<[1], [0], [0], [1], [0, 0, 1, 1], [], []>} : vector<8x8xf32>, vector<8x16xf32>, vector<8x16xf32> -> vector<8x16xf32>
    %66 = vector.extract_strided_slice %42 {offsets = [0, 16], sizes = [8, 16], strides = [1, 1]} : vector<16x64xf32> to vector<8x16xf32>
    %67 = vector.extract_strided_slice %43 {offsets = [0, 16], sizes = [8, 16], strides = [1, 1]} : vector<16x64xf32> to vector<8x16xf32>
    %68 = vector.extract_strided_slice %44 {offsets = [0, 16], sizes = [8, 16], strides = [1, 1]} : vector<16x64xf32> to vector<8x16xf32>
    %cst_37 = arith.constant dense<0.000000e+00> : vector<8x8xf32>
    %69 = tpu.matmul %66, %67, %cst_37 {dimension_numbers = #tpu.dot_dimension_numbers<[1], [1], [0], [0], [0, 0, 1, 0], [], []>} : vector<8x16xf32>, vector<8x16xf32>, vector<8x8xf32> -> vector<8x8xf32>
    %cst_38 = arith.constant 2.500000e-01 : f32
    %70 = vector.broadcast %cst_38 : f32 to vector<8x8xf32>
    %71 = arith.mulf %69, %70 : vector<8x8xf32>
    %72 = vector.broadcast %46 : vector<1x8xf32> to vector<8x8xf32>
    %73 = arith.addf %71, %72 : vector<8x8xf32>
    %cst_39 = arith.constant dense<0xFF800000> : vector<8xf32>
    %74 = vector.multi_reduction <maximumf>, %73, %cst_39 [1] : vector<8x8xf32> to vector<8xf32>
    %75 = vector.shape_cast %74 : vector<8xf32> to vector<8x1xf32>
    %76 = vector.broadcast %75 : vector<8x1xf32> to vector<8x8xf32>
    %77 = arith.subf %73, %76 : vector<8x8xf32>
    %78 = math.exp %77 : vector<8x8xf32>
    %cst_40 = arith.constant dense<0.000000e+00> : vector<8xf32>
    %79 = vector.multi_reduction <add>, %78, %cst_40 [1] : vector<8x8xf32> to vector<8xf32>
    %80 = vector.shape_cast %79 : vector<8xf32> to vector<8x1xf32>
    %81 = tpu.reciprocal %80 {approx = true} : vector<8x1xf32> -> vector<8x1xf32>
    %82 = vector.broadcast %81 : vector<8x1xf32> to vector<8x8xf32>
    %83 = arith.mulf %78, %82 : vector<8x8xf32>
    %cst_41 = arith.constant dense<0.000000e+00> : vector<8x16xf32>
    %84 = tpu.matmul %83, %68, %cst_41 {dimension_numbers = #tpu.dot_dimension_numbers<[1], [0], [0], [1], [0, 0, 1, 1], [], []>} : vector<8x8xf32>, vector<8x16xf32>, vector<8x16xf32> -> vector<8x16xf32>
    %85 = vector.extract_strided_slice %42 {offsets = [0, 32], sizes = [8, 16], strides = [1, 1]} : vector<16x64xf32> to vector<8x16xf32>
    %86 = vector.extract_strided_slice %43 {offsets = [0, 32], sizes = [8, 16], strides = [1, 1]} : vector<16x64xf32> to vector<8x16xf32>
    %87 = vector.extract_strided_slice %44 {offsets = [0, 32], sizes = [8, 16], strides = [1, 1]} : vector<16x64xf32> to vector<8x16xf32>
    %cst_42 = arith.constant dense<0.000000e+00> : vector<8x8xf32>
    %88 = tpu.matmul %85, %86, %cst_42 {dimension_numbers = #tpu.dot_dimension_numbers<[1], [1], [0], [0], [0, 0, 1, 0], [], []>} : vector<8x16xf32>, vector<8x16xf32>, vector<8x8xf32> -> vector<8x8xf32>
    %cst_43 = arith.constant 2.500000e-01 : f32
    %89 = vector.broadcast %cst_43 : f32 to vector<8x8xf32>
    %90 = arith.mulf %88, %89 : vector<8x8xf32>
    %91 = vector.broadcast %46 : vector<1x8xf32> to vector<8x8xf32>
    %92 = arith.addf %90, %91 : vector<8x8xf32>
    %cst_44 = arith.constant dense<0xFF800000> : vector<8xf32>
    %93 = vector.multi_reduction <maximumf>, %92, %cst_44 [1] : vector<8x8xf32> to vector<8xf32>
    %94 = vector.shape_cast %93 : vector<8xf32> to vector<8x1xf32>
    %95 = vector.broadcast %94 : vector<8x1xf32> to vector<8x8xf32>
    %96 = arith.subf %92, %95 : vector<8x8xf32>
    %97 = math.exp %96 : vector<8x8xf32>
    %cst_45 = arith.constant dense<0.000000e+00> : vector<8xf32>
    %98 = vector.multi_reduction <add>, %97, %cst_45 [1] : vector<8x8xf32> to vector<8xf32>
    %99 = vector.shape_cast %98 : vector<8xf32> to vector<8x1xf32>
    %100 = tpu.reciprocal %99 {approx = true} : vector<8x1xf32> -> vector<8x1xf32>
    %101 = vector.broadcast %100 : vector<8x1xf32> to vector<8x8xf32>
    %102 = arith.mulf %97, %101 : vector<8x8xf32>
    %cst_46 = arith.constant dense<0.000000e+00> : vector<8x16xf32>
    %103 = tpu.matmul %102, %87, %cst_46 {dimension_numbers = #tpu.dot_dimension_numbers<[1], [0], [0], [1], [0, 0, 1, 1], [], []>} : vector<8x8xf32>, vector<8x16xf32>, vector<8x16xf32> -> vector<8x16xf32>
    %104 = vector.extract_strided_slice %42 {offsets = [0, 48], sizes = [8, 16], strides = [1, 1]} : vector<16x64xf32> to vector<8x16xf32>
    %105 = vector.extract_strided_slice %43 {offsets = [0, 48], sizes = [8, 16], strides = [1, 1]} : vector<16x64xf32> to vector<8x16xf32>
    %106 = vector.extract_strided_slice %44 {offsets = [0, 48], sizes = [8, 16], strides = [1, 1]} : vector<16x64xf32> to vector<8x16xf32>
    %cst_47 = arith.constant dense<0.000000e+00> : vector<8x8xf32>
    %107 = tpu.matmul %104, %105, %cst_47 {dimension_numbers = #tpu.dot_dimension_numbers<[1], [1], [0], [0], [0, 0, 1, 0], [], []>} : vector<8x16xf32>, vector<8x16xf32>, vector<8x8xf32> -> vector<8x8xf32>
    %cst_48 = arith.constant 2.500000e-01 : f32
    %108 = vector.broadcast %cst_48 : f32 to vector<8x8xf32>
    %109 = arith.mulf %107, %108 : vector<8x8xf32>
    %110 = vector.broadcast %46 : vector<1x8xf32> to vector<8x8xf32>
    %111 = arith.addf %109, %110 : vector<8x8xf32>
    %cst_49 = arith.constant dense<0xFF800000> : vector<8xf32>
    %112 = vector.multi_reduction <maximumf>, %111, %cst_49 [1] : vector<8x8xf32> to vector<8xf32>
    %113 = vector.shape_cast %112 : vector<8xf32> to vector<8x1xf32>
    %114 = vector.broadcast %113 : vector<8x1xf32> to vector<8x8xf32>
    %115 = arith.subf %111, %114 : vector<8x8xf32>
    %116 = math.exp %115 : vector<8x8xf32>
    %cst_50 = arith.constant dense<0.000000e+00> : vector<8xf32>
    %117 = vector.multi_reduction <add>, %116, %cst_50 [1] : vector<8x8xf32> to vector<8xf32>
    %118 = vector.shape_cast %117 : vector<8xf32> to vector<8x1xf32>
    %119 = tpu.reciprocal %118 {approx = true} : vector<8x1xf32> -> vector<8x1xf32>
    %120 = vector.broadcast %119 : vector<8x1xf32> to vector<8x8xf32>
    %121 = arith.mulf %116, %120 : vector<8x8xf32>
    %cst_51 = arith.constant dense<0.000000e+00> : vector<8x16xf32>
    %122 = tpu.matmul %121, %106, %cst_51 {dimension_numbers = #tpu.dot_dimension_numbers<[1], [0], [0], [1], [0, 0, 1, 1], [], []>} : vector<8x8xf32>, vector<8x16xf32>, vector<8x16xf32> -> vector<8x16xf32>
    %123 = tpu.concatenate %65, %84, %103, %122 in 1 : vector<8x16xf32>, vector<8x16xf32>, vector<8x16xf32>, vector<8x16xf32> -> vector<8x64xf32>
    %c0_52 = arith.constant 0 : index
    %c1 = arith.constant 1 : index
    %c0_53 = arith.constant 0 : index
    %c0_54 = arith.constant 0 : index
    %124 = vector.load %arg2[%c0_52, %c1, %c0_53, %c0_54] : memref<1x2x1x8xf32, #tpu.memory_space<vmem>>, vector<1x1x1x8xf32>
    %125 = vector.shape_cast %124 : vector<1x1x1x8xf32> to vector<1x8xf32>
    %126 = vector.extract_strided_slice %42 {offsets = [8, 0], sizes = [8, 16], strides = [1, 1]} : vector<16x64xf32> to vector<8x16xf32>
    %127 = vector.extract_strided_slice %43 {offsets = [8, 0], sizes = [8, 16], strides = [1, 1]} : vector<16x64xf32> to vector<8x16xf32>
    %128 = vector.extract_strided_slice %44 {offsets = [8, 0], sizes = [8, 16], strides = [1, 1]} : vector<16x64xf32> to vector<8x16xf32>
    %cst_55 = arith.constant dense<0.000000e+00> : vector<8x8xf32>
    %129 = tpu.matmul %126, %127, %cst_55 {dimension_numbers = #tpu.dot_dimension_numbers<[1], [1], [0], [0], [0, 0, 1, 0], [], []>} : vector<8x16xf32>, vector<8x16xf32>, vector<8x8xf32> -> vector<8x8xf32>
    %cst_56 = arith.constant 2.500000e-01 : f32
    %130 = vector.broadcast %cst_56 : f32 to vector<8x8xf32>
    %131 = arith.mulf %129, %130 : vector<8x8xf32>
    %132 = vector.broadcast %125 : vector<1x8xf32> to vector<8x8xf32>
    %133 = arith.addf %131, %132 : vector<8x8xf32>
    %cst_57 = arith.constant dense<0xFF800000> : vector<8xf32>
    %134 = vector.multi_reduction <maximumf>, %133, %cst_57 [1] : vector<8x8xf32> to vector<8xf32>
    %135 = vector.shape_cast %134 : vector<8xf32> to vector<8x1xf32>
    %136 = vector.broadcast %135 : vector<8x1xf32> to vector<8x8xf32>
    %137 = arith.subf %133, %136 : vector<8x8xf32>
    %138 = math.exp %137 : vector<8x8xf32>
    %cst_58 = arith.constant dense<0.000000e+00> : vector<8xf32>
    %139 = vector.multi_reduction <add>, %138, %cst_58 [1] : vector<8x8xf32> to vector<8xf32>
    %140 = vector.shape_cast %139 : vector<8xf32> to vector<8x1xf32>
    %141 = tpu.reciprocal %140 {approx = true} : vector<8x1xf32> -> vector<8x1xf32>
    %142 = vector.broadcast %141 : vector<8x1xf32> to vector<8x8xf32>
    %143 = arith.mulf %138, %142 : vector<8x8xf32>
    %cst_59 = arith.constant dense<0.000000e+00> : vector<8x16xf32>
    %144 = tpu.matmul %143, %128, %cst_59 {dimension_numbers = #tpu.dot_dimension_numbers<[1], [0], [0], [1], [0, 0, 1, 1], [], []>} : vector<8x8xf32>, vector<8x16xf32>, vector<8x16xf32> -> vector<8x16xf32>
    %145 = vector.extract_strided_slice %42 {offsets = [8, 16], sizes = [8, 16], strides = [1, 1]} : vector<16x64xf32> to vector<8x16xf32>
    %146 = vector.extract_strided_slice %43 {offsets = [8, 16], sizes = [8, 16], strides = [1, 1]} : vector<16x64xf32> to vector<8x16xf32>
    %147 = vector.extract_strided_slice %44 {offsets = [8, 16], sizes = [8, 16], strides = [1, 1]} : vector<16x64xf32> to vector<8x16xf32>
    %cst_60 = arith.constant dense<0.000000e+00> : vector<8x8xf32>
    %148 = tpu.matmul %145, %146, %cst_60 {dimension_numbers = #tpu.dot_dimension_numbers<[1], [1], [0], [0], [0, 0, 1, 0], [], []>} : vector<8x16xf32>, vector<8x16xf32>, vector<8x8xf32> -> vector<8x8xf32>
    %cst_61 = arith.constant 2.500000e-01 : f32
    %149 = vector.broadcast %cst_61 : f32 to vector<8x8xf32>
    %150 = arith.mulf %148, %149 : vector<8x8xf32>
    %151 = vector.broadcast %125 : vector<1x8xf32> to vector<8x8xf32>
    %152 = arith.addf %150, %151 : vector<8x8xf32>
    %cst_62 = arith.constant dense<0xFF800000> : vector<8xf32>
    %153 = vector.multi_reduction <maximumf>, %152, %cst_62 [1] : vector<8x8xf32> to vector<8xf32>
    %154 = vector.shape_cast %153 : vector<8xf32> to vector<8x1xf32>
    %155 = vector.broadcast %154 : vector<8x1xf32> to vector<8x8xf32>
    %156 = arith.subf %152, %155 : vector<8x8xf32>
    %157 = math.exp %156 : vector<8x8xf32>
    %cst_63 = arith.constant dense<0.000000e+00> : vector<8xf32>
    %158 = vector.multi_reduction <add>, %157, %cst_63 [1] : vector<8x8xf32> to vector<8xf32>
    %159 = vector.shape_cast %158 : vector<8xf32> to vector<8x1xf32>
    %160 = tpu.reciprocal %159 {approx = true} : vector<8x1xf32> -> vector<8x1xf32>
    %161 = vector.broadcast %160 : vector<8x1xf32> to vector<8x8xf32>
    %162 = arith.mulf %157, %161 : vector<8x8xf32>
    %cst_64 = arith.constant dense<0.000000e+00> : vector<8x16xf32>
    %163 = tpu.matmul %162, %147, %cst_64 {dimension_numbers = #tpu.dot_dimension_numbers<[1], [0], [0], [1], [0, 0, 1, 1], [], []>} : vector<8x8xf32>, vector<8x16xf32>, vector<8x16xf32> -> vector<8x16xf32>
    %164 = vector.extract_strided_slice %42 {offsets = [8, 32], sizes = [8, 16], strides = [1, 1]} : vector<16x64xf32> to vector<8x16xf32>
    %165 = vector.extract_strided_slice %43 {offsets = [8, 32], sizes = [8, 16], strides = [1, 1]} : vector<16x64xf32> to vector<8x16xf32>
    %166 = vector.extract_strided_slice %44 {offsets = [8, 32], sizes = [8, 16], strides = [1, 1]} : vector<16x64xf32> to vector<8x16xf32>
    %cst_65 = arith.constant dense<0.000000e+00> : vector<8x8xf32>
    %167 = tpu.matmul %164, %165, %cst_65 {dimension_numbers = #tpu.dot_dimension_numbers<[1], [1], [0], [0], [0, 0, 1, 0], [], []>} : vector<8x16xf32>, vector<8x16xf32>, vector<8x8xf32> -> vector<8x8xf32>
    %cst_66 = arith.constant 2.500000e-01 : f32
    %168 = vector.broadcast %cst_66 : f32 to vector<8x8xf32>
    %169 = arith.mulf %167, %168 : vector<8x8xf32>
    %170 = vector.broadcast %125 : vector<1x8xf32> to vector<8x8xf32>
    %171 = arith.addf %169, %170 : vector<8x8xf32>
    %cst_67 = arith.constant dense<0xFF800000> : vector<8xf32>
    %172 = vector.multi_reduction <maximumf>, %171, %cst_67 [1] : vector<8x8xf32> to vector<8xf32>
    %173 = vector.shape_cast %172 : vector<8xf32> to vector<8x1xf32>
    %174 = vector.broadcast %173 : vector<8x1xf32> to vector<8x8xf32>
    %175 = arith.subf %171, %174 : vector<8x8xf32>
    %176 = math.exp %175 : vector<8x8xf32>
    %cst_68 = arith.constant dense<0.000000e+00> : vector<8xf32>
    %177 = vector.multi_reduction <add>, %176, %cst_68 [1] : vector<8x8xf32> to vector<8xf32>
    %178 = vector.shape_cast %177 : vector<8xf32> to vector<8x1xf32>
    %179 = tpu.reciprocal %178 {approx = true} : vector<8x1xf32> -> vector<8x1xf32>
    %180 = vector.broadcast %179 : vector<8x1xf32> to vector<8x8xf32>
    %181 = arith.mulf %176, %180 : vector<8x8xf32>
    %cst_69 = arith.constant dense<0.000000e+00> : vector<8x16xf32>
    %182 = tpu.matmul %181, %166, %cst_69 {dimension_numbers = #tpu.dot_dimension_numbers<[1], [0], [0], [1], [0, 0, 1, 1], [], []>} : vector<8x8xf32>, vector<8x16xf32>, vector<8x16xf32> -> vector<8x16xf32>
    %183 = vector.extract_strided_slice %42 {offsets = [8, 48], sizes = [8, 16], strides = [1, 1]} : vector<16x64xf32> to vector<8x16xf32>
    %184 = vector.extract_strided_slice %43 {offsets = [8, 48], sizes = [8, 16], strides = [1, 1]} : vector<16x64xf32> to vector<8x16xf32>
    %185 = vector.extract_strided_slice %44 {offsets = [8, 48], sizes = [8, 16], strides = [1, 1]} : vector<16x64xf32> to vector<8x16xf32>
    %cst_70 = arith.constant dense<0.000000e+00> : vector<8x8xf32>
    %186 = tpu.matmul %183, %184, %cst_70 {dimension_numbers = #tpu.dot_dimension_numbers<[1], [1], [0], [0], [0, 0, 1, 0], [], []>} : vector<8x16xf32>, vector<8x16xf32>, vector<8x8xf32> -> vector<8x8xf32>
    %cst_71 = arith.constant 2.500000e-01 : f32
    %187 = vector.broadcast %cst_71 : f32 to vector<8x8xf32>
    %188 = arith.mulf %186, %187 : vector<8x8xf32>
    %189 = vector.broadcast %125 : vector<1x8xf32> to vector<8x8xf32>
    %190 = arith.addf %188, %189 : vector<8x8xf32>
    %cst_72 = arith.constant dense<0xFF800000> : vector<8xf32>
    %191 = vector.multi_reduction <maximumf>, %190, %cst_72 [1] : vector<8x8xf32> to vector<8xf32>
    %192 = vector.shape_cast %191 : vector<8xf32> to vector<8x1xf32>
    %193 = vector.broadcast %192 : vector<8x1xf32> to vector<8x8xf32>
    %194 = arith.subf %190, %193 : vector<8x8xf32>
    %195 = math.exp %194 : vector<8x8xf32>
    %cst_73 = arith.constant dense<0.000000e+00> : vector<8xf32>
    %196 = vector.multi_reduction <add>, %195, %cst_73 [1] : vector<8x8xf32> to vector<8xf32>
    %197 = vector.shape_cast %196 : vector<8xf32> to vector<8x1xf32>
    %198 = tpu.reciprocal %197 {approx = true} : vector<8x1xf32> -> vector<8x1xf32>
    %199 = vector.broadcast %198 : vector<8x1xf32> to vector<8x8xf32>
    %200 = arith.mulf %195, %199 : vector<8x8xf32>
    %cst_74 = arith.constant dense<0.000000e+00> : vector<8x16xf32>
    %201 = tpu.matmul %200, %185, %cst_74 {dimension_numbers = #tpu.dot_dimension_numbers<[1], [0], [0], [1], [0, 0, 1, 1], [], []>} : vector<8x8xf32>, vector<8x16xf32>, vector<8x16xf32> -> vector<8x16xf32>
    %202 = tpu.concatenate %144, %163, %182, %201 in 1 : vector<8x16xf32>, vector<8x16xf32>, vector<8x16xf32>, vector<8x16xf32> -> vector<8x64xf32>
    %203 = tpu.concatenate %123, %202 in 0 : vector<8x64xf32>, vector<8x64xf32> -> vector<16x64xf32>
    %c0_75 = arith.constant 0 : index
    %c0_76 = arith.constant 0 : index
    %c0_77 = arith.constant 0 : index
    %c0_78 = arith.constant 0 : index
    %204 = vector.load %arg9[%c0_75, %c0_76, %c0_77, %c0_78] : memref<1x2x64x64xf32, #tpu.memory_space<vmem>>, vector<1x1x64x64xf32>
    %205 = vector.shape_cast %204 : vector<1x1x64x64xf32> to vector<64x64xf32>
    %cst_79 = arith.constant dense<0.000000e+00> : vector<16x64xf32>
    %206 = tpu.matmul %203, %205, %cst_79 {dimension_numbers = #tpu.dot_dimension_numbers<[1], [0], [0], [1], [0, 0, 1, 1], [], []>} : vector<16x64xf32>, vector<64x64xf32>, vector<16x64xf32> -> vector<16x64xf32>
    %c0_80 = arith.constant 0 : index
    %c0_81 = arith.constant 0 : index
    %c0_82 = arith.constant 0 : index
    %c0_83 = arith.constant 0 : index
    %207 = vector.load %arg10[%c0_80, %c0_81, %c0_82, %c0_83] : memref<1x2x1x64xf32, #tpu.memory_space<vmem>>, vector<1x1x1x64xf32>
    %208 = vector.shape_cast %207 : vector<1x1x1x64xf32> to vector<1x64xf32>
    %209 = vector.broadcast %208 : vector<1x64xf32> to vector<16x64xf32>
    %210 = arith.addf %206, %209 : vector<16x64xf32>
    %211 = arith.addf %210, %34 : vector<16x64xf32>
    %c0_84 = arith.constant 0 : index
    %c0_85 = arith.constant 0 : index
    %c0_86 = arith.constant 0 : index
    %c0_87 = arith.constant 0 : index
    %212 = vector.load %arg11[%c0_84, %c0_85, %c0_86, %c0_87] : memref<1x2x1x64xf32, #tpu.memory_space<vmem>>, vector<1x1x1x64xf32>
    %213 = vector.shape_cast %212 : vector<1x1x1x64xf32> to vector<1x64xf32>
    %c0_88 = arith.constant 0 : index
    %c0_89 = arith.constant 0 : index
    %c0_90 = arith.constant 0 : index
    %c0_91 = arith.constant 0 : index
    %214 = vector.load %arg12[%c0_88, %c0_89, %c0_90, %c0_91] : memref<1x2x1x64xf32, #tpu.memory_space<vmem>>, vector<1x1x1x64xf32>
    %215 = vector.shape_cast %214 : vector<1x1x1x64xf32> to vector<1x64xf32>
    %cst_92 = arith.constant dense<0.000000e+00> : vector<16xf32>
    %216 = vector.multi_reduction <add>, %211, %cst_92 [1] : vector<16x64xf32> to vector<16xf32>
    %217 = vector.shape_cast %216 : vector<16xf32> to vector<16x1xf32>
    %cst_93 = arith.constant 6.400000e+01 : f32
    %218 = vector.broadcast %cst_93 : f32 to vector<16x1xf32>
    %219 = arith.divf %217, %218 : vector<16x1xf32>
    %220 = vector.broadcast %219 : vector<16x1xf32> to vector<16x64xf32>
    %221 = arith.subf %211, %220 : vector<16x64xf32>
    %222 = arith.mulf %221, %221 : vector<16x64xf32>
    %cst_94 = arith.constant dense<0.000000e+00> : vector<16xf32>
    %223 = vector.multi_reduction <add>, %222, %cst_94 [1] : vector<16x64xf32> to vector<16xf32>
    %224 = vector.shape_cast %223 : vector<16xf32> to vector<16x1xf32>
    %cst_95 = arith.constant 6.400000e+01 : f32
    %225 = vector.broadcast %cst_95 : f32 to vector<16x1xf32>
    %226 = arith.divf %224, %225 : vector<16x1xf32>
    %227 = vector.broadcast %219 : vector<16x1xf32> to vector<16x64xf32>
    %228 = arith.subf %211, %227 : vector<16x64xf32>
    %cst_96 = arith.constant 9.99999996E-13 : f32
    %229 = vector.broadcast %cst_96 : f32 to vector<16x1xf32>
    %230 = arith.addf %226, %229 : vector<16x1xf32>
    %231 = math.rsqrt %230 : vector<16x1xf32>
    %232 = vector.broadcast %231 : vector<16x1xf32> to vector<16x64xf32>
    %233 = arith.mulf %228, %232 : vector<16x64xf32>
    %234 = vector.broadcast %213 : vector<1x64xf32> to vector<16x64xf32>
    %235 = arith.mulf %233, %234 : vector<16x64xf32>
    %236 = vector.broadcast %215 : vector<1x64xf32> to vector<16x64xf32>
    %237 = arith.addf %235, %236 : vector<16x64xf32>
    %c0_97 = arith.constant 0 : index
    %c0_98 = arith.constant 0 : index
    %c0_99 = arith.constant 0 : index
    %c0_100 = arith.constant 0 : index
    %238 = vector.load %arg13[%c0_97, %c0_98, %c0_99, %c0_100] : memref<1x2x64x128xf32, #tpu.memory_space<vmem>>, vector<1x1x64x128xf32>
    %239 = vector.shape_cast %238 : vector<1x1x64x128xf32> to vector<64x128xf32>
    %cst_101 = arith.constant dense<0.000000e+00> : vector<16x128xf32>
    %240 = tpu.matmul %237, %239, %cst_101 {dimension_numbers = #tpu.dot_dimension_numbers<[1], [0], [0], [1], [0, 0, 1, 1], [], []>} : vector<16x64xf32>, vector<64x128xf32>, vector<16x128xf32> -> vector<16x128xf32>
    %c0_102 = arith.constant 0 : index
    %c0_103 = arith.constant 0 : index
    %c0_104 = arith.constant 0 : index
    %c0_105 = arith.constant 0 : index
    %241 = vector.load %arg14[%c0_102, %c0_103, %c0_104, %c0_105] : memref<1x2x1x128xf32, #tpu.memory_space<vmem>>, vector<1x1x1x128xf32>
    %242 = vector.shape_cast %241 : vector<1x1x1x128xf32> to vector<1x128xf32>
    %243 = vector.broadcast %242 : vector<1x128xf32> to vector<16x128xf32>
    %244 = arith.addf %240, %243 : vector<16x128xf32>
    %245 = arith.mulf %244, %244 : vector<16x128xf32>
    %246 = arith.mulf %244, %245 : vector<16x128xf32>
    %cst_106 = arith.constant 4.471500e-02 : f32
    %247 = vector.broadcast %cst_106 : f32 to vector<16x128xf32>
    %248 = arith.mulf %247, %246 : vector<16x128xf32>
    %249 = arith.addf %244, %248 : vector<16x128xf32>
    %cst_107 = arith.constant 0.797884583 : f32
    %250 = vector.broadcast %cst_107 : f32 to vector<16x128xf32>
    %251 = arith.mulf %250, %249 : vector<16x128xf32>
    %252 = math.tanh %251 : vector<16x128xf32>
    %cst_108 = arith.constant 1.000000e+00 : f32
    %253 = vector.broadcast %cst_108 : f32 to vector<16x128xf32>
    %254 = arith.addf %253, %252 : vector<16x128xf32>
    %cst_109 = arith.constant 5.000000e-01 : f32
    %255 = vector.broadcast %cst_109 : f32 to vector<16x128xf32>
    %256 = arith.mulf %255, %254 : vector<16x128xf32>
    %257 = arith.mulf %244, %256 : vector<16x128xf32>
    %c0_110 = arith.constant 0 : index
    %c0_111 = arith.constant 0 : index
    %c0_112 = arith.constant 0 : index
    %c0_113 = arith.constant 0 : index
    %258 = vector.load %arg15[%c0_110, %c0_111, %c0_112, %c0_113] : memref<1x2x128x64xf32, #tpu.memory_space<vmem>>, vector<1x1x128x64xf32>
    %259 = vector.shape_cast %258 : vector<1x1x128x64xf32> to vector<128x64xf32>
    %cst_114 = arith.constant dense<0.000000e+00> : vector<16x64xf32>
    %260 = tpu.matmul %257, %259, %cst_114 {dimension_numbers = #tpu.dot_dimension_numbers<[1], [0], [0], [1], [0, 0, 1, 1], [], []>} : vector<16x128xf32>, vector<128x64xf32>, vector<16x64xf32> -> vector<16x64xf32>
    %c0_115 = arith.constant 0 : index
    %c0_116 = arith.constant 0 : index
    %c0_117 = arith.constant 0 : index
    %c0_118 = arith.constant 0 : index
    %261 = vector.load %arg16[%c0_115, %c0_116, %c0_117, %c0_118] : memref<1x2x1x64xf32, #tpu.memory_space<vmem>>, vector<1x1x1x64xf32>
    %262 = vector.shape_cast %261 : vector<1x1x1x64xf32> to vector<1x64xf32>
    %263 = vector.broadcast %262 : vector<1x64xf32> to vector<16x64xf32>
    %264 = arith.addf %260, %263 : vector<16x64xf32>
    %265 = arith.addf %264, %237 : vector<16x64xf32>
    %c0_119 = arith.constant 0 : index
    %c0_120 = arith.constant 0 : index
    %c0_121 = arith.constant 0 : index
    %c0_122 = arith.constant 0 : index
    %266 = vector.load %arg17[%c0_119, %c0_120, %c0_121, %c0_122] : memref<1x2x1x64xf32, #tpu.memory_space<vmem>>, vector<1x1x1x64xf32>
    %267 = vector.shape_cast %266 : vector<1x1x1x64xf32> to vector<1x64xf32>
    %c0_123 = arith.constant 0 : index
    %c0_124 = arith.constant 0 : index
    %c0_125 = arith.constant 0 : index
    %c0_126 = arith.constant 0 : index
    %268 = vector.load %arg18[%c0_123, %c0_124, %c0_125, %c0_126] : memref<1x2x1x64xf32, #tpu.memory_space<vmem>>, vector<1x1x1x64xf32>
    %269 = vector.shape_cast %268 : vector<1x1x1x64xf32> to vector<1x64xf32>
    %cst_127 = arith.constant dense<0.000000e+00> : vector<16xf32>
    %270 = vector.multi_reduction <add>, %265, %cst_127 [1] : vector<16x64xf32> to vector<16xf32>
    %271 = vector.shape_cast %270 : vector<16xf32> to vector<16x1xf32>
    %cst_128 = arith.constant 6.400000e+01 : f32
    %272 = vector.broadcast %cst_128 : f32 to vector<16x1xf32>
    %273 = arith.divf %271, %272 : vector<16x1xf32>
    %274 = vector.broadcast %273 : vector<16x1xf32> to vector<16x64xf32>
    %275 = arith.subf %265, %274 : vector<16x64xf32>
    %276 = arith.mulf %275, %275 : vector<16x64xf32>
    %cst_129 = arith.constant dense<0.000000e+00> : vector<16xf32>
    %277 = vector.multi_reduction <add>, %276, %cst_129 [1] : vector<16x64xf32> to vector<16xf32>
    %278 = vector.shape_cast %277 : vector<16xf32> to vector<16x1xf32>
    %cst_130 = arith.constant 6.400000e+01 : f32
    %279 = vector.broadcast %cst_130 : f32 to vector<16x1xf32>
    %280 = arith.divf %278, %279 : vector<16x1xf32>
    %281 = vector.broadcast %273 : vector<16x1xf32> to vector<16x64xf32>
    %282 = arith.subf %265, %281 : vector<16x64xf32>
    %cst_131 = arith.constant 9.99999996E-13 : f32
    %283 = vector.broadcast %cst_131 : f32 to vector<16x1xf32>
    %284 = arith.addf %280, %283 : vector<16x1xf32>
    %285 = math.rsqrt %284 : vector<16x1xf32>
    %286 = vector.broadcast %285 : vector<16x1xf32> to vector<16x64xf32>
    %287 = arith.mulf %282, %286 : vector<16x64xf32>
    %288 = vector.broadcast %267 : vector<1x64xf32> to vector<16x64xf32>
    %289 = arith.mulf %287, %288 : vector<16x64xf32>
    %290 = vector.broadcast %269 : vector<1x64xf32> to vector<16x64xf32>
    %291 = arith.addf %289, %290 : vector<16x64xf32>
    %c0_132 = arith.constant 0 : index
    %c1_133 = arith.constant 1 : index
    %c0_134 = arith.constant 0 : index
    %c0_135 = arith.constant 0 : index
    %292 = vector.load %arg7[%c0_132, %c1_133, %c0_134, %c0_135] : memref<1x2x64x192xf32, #tpu.memory_space<vmem>>, vector<1x1x64x192xf32>
    %293 = vector.shape_cast %292 : vector<1x1x64x192xf32> to vector<64x192xf32>
    %cst_136 = arith.constant dense<0.000000e+00> : vector<16x192xf32>
    %294 = tpu.matmul %291, %293, %cst_136 {dimension_numbers = #tpu.dot_dimension_numbers<[1], [0], [0], [1], [0, 0, 1, 1], [], []>} : vector<16x64xf32>, vector<64x192xf32>, vector<16x192xf32> -> vector<16x192xf32>
    %c0_137 = arith.constant 0 : index
    %c1_138 = arith.constant 1 : index
    %c0_139 = arith.constant 0 : index
    %c0_140 = arith.constant 0 : index
    %295 = vector.load %arg8[%c0_137, %c1_138, %c0_139, %c0_140] : memref<1x2x1x192xf32, #tpu.memory_space<vmem>>, vector<1x1x1x192xf32>
    %296 = vector.shape_cast %295 : vector<1x1x1x192xf32> to vector<1x192xf32>
    %297 = vector.broadcast %296 : vector<1x192xf32> to vector<16x192xf32>
    %298 = arith.addf %294, %297 : vector<16x192xf32>
    %299 = vector.extract_strided_slice %298 {offsets = [0, 0], sizes = [16, 64], strides = [1, 1]} : vector<16x192xf32> to vector<16x64xf32>
    %300 = vector.extract_strided_slice %298 {offsets = [0, 64], sizes = [16, 64], strides = [1, 1]} : vector<16x192xf32> to vector<16x64xf32>
    %301 = vector.extract_strided_slice %298 {offsets = [0, 128], sizes = [16, 64], strides = [1, 1]} : vector<16x192xf32> to vector<16x64xf32>
    %c0_141 = arith.constant 0 : index
    %c0_142 = arith.constant 0 : index
    %c0_143 = arith.constant 0 : index
    %c0_144 = arith.constant 0 : index
    %302 = vector.load %arg2[%c0_141, %c0_142, %c0_143, %c0_144] : memref<1x2x1x8xf32, #tpu.memory_space<vmem>>, vector<1x1x1x8xf32>
    %303 = vector.shape_cast %302 : vector<1x1x1x8xf32> to vector<1x8xf32>
    %304 = vector.extract_strided_slice %299 {offsets = [0, 0], sizes = [8, 16], strides = [1, 1]} : vector<16x64xf32> to vector<8x16xf32>
    %305 = vector.extract_strided_slice %300 {offsets = [0, 0], sizes = [8, 16], strides = [1, 1]} : vector<16x64xf32> to vector<8x16xf32>
    %306 = vector.extract_strided_slice %301 {offsets = [0, 0], sizes = [8, 16], strides = [1, 1]} : vector<16x64xf32> to vector<8x16xf32>
    %cst_145 = arith.constant dense<0.000000e+00> : vector<8x8xf32>
    %307 = tpu.matmul %304, %305, %cst_145 {dimension_numbers = #tpu.dot_dimension_numbers<[1], [1], [0], [0], [0, 0, 1, 0], [], []>} : vector<8x16xf32>, vector<8x16xf32>, vector<8x8xf32> -> vector<8x8xf32>
    %cst_146 = arith.constant 2.500000e-01 : f32
    %308 = vector.broadcast %cst_146 : f32 to vector<8x8xf32>
    %309 = arith.mulf %307, %308 : vector<8x8xf32>
    %310 = vector.broadcast %303 : vector<1x8xf32> to vector<8x8xf32>
    %311 = arith.addf %309, %310 : vector<8x8xf32>
    %cst_147 = arith.constant dense<0xFF800000> : vector<8xf32>
    %312 = vector.multi_reduction <maximumf>, %311, %cst_147 [1] : vector<8x8xf32> to vector<8xf32>
    %313 = vector.shape_cast %312 : vector<8xf32> to vector<8x1xf32>
    %314 = vector.broadcast %313 : vector<8x1xf32> to vector<8x8xf32>
    %315 = arith.subf %311, %314 : vector<8x8xf32>
    %316 = math.exp %315 : vector<8x8xf32>
    %cst_148 = arith.constant dense<0.000000e+00> : vector<8xf32>
    %317 = vector.multi_reduction <add>, %316, %cst_148 [1] : vector<8x8xf32> to vector<8xf32>
    %318 = vector.shape_cast %317 : vector<8xf32> to vector<8x1xf32>
    %319 = tpu.reciprocal %318 {approx = true} : vector<8x1xf32> -> vector<8x1xf32>
    %320 = vector.broadcast %319 : vector<8x1xf32> to vector<8x8xf32>
    %321 = arith.mulf %316, %320 : vector<8x8xf32>
    %cst_149 = arith.constant dense<0.000000e+00> : vector<8x16xf32>
    %322 = tpu.matmul %321, %306, %cst_149 {dimension_numbers = #tpu.dot_dimension_numbers<[1], [0], [0], [1], [0, 0, 1, 1], [], []>} : vector<8x8xf32>, vector<8x16xf32>, vector<8x16xf32> -> vector<8x16xf32>
    %323 = vector.extract_strided_slice %299 {offsets = [0, 16], sizes = [8, 16], strides = [1, 1]} : vector<16x64xf32> to vector<8x16xf32>
    %324 = vector.extract_strided_slice %300 {offsets = [0, 16], sizes = [8, 16], strides = [1, 1]} : vector<16x64xf32> to vector<8x16xf32>
    %325 = vector.extract_strided_slice %301 {offsets = [0, 16], sizes = [8, 16], strides = [1, 1]} : vector<16x64xf32> to vector<8x16xf32>
    %cst_150 = arith.constant dense<0.000000e+00> : vector<8x8xf32>
    %326 = tpu.matmul %323, %324, %cst_150 {dimension_numbers = #tpu.dot_dimension_numbers<[1], [1], [0], [0], [0, 0, 1, 0], [], []>} : vector<8x16xf32>, vector<8x16xf32>, vector<8x8xf32> -> vector<8x8xf32>
    %cst_151 = arith.constant 2.500000e-01 : f32
    %327 = vector.broadcast %cst_151 : f32 to vector<8x8xf32>
    %328 = arith.mulf %326, %327 : vector<8x8xf32>
    %329 = vector.broadcast %303 : vector<1x8xf32> to vector<8x8xf32>
    %330 = arith.addf %328, %329 : vector<8x8xf32>
    %cst_152 = arith.constant dense<0xFF800000> : vector<8xf32>
    %331 = vector.multi_reduction <maximumf>, %330, %cst_152 [1] : vector<8x8xf32> to vector<8xf32>
    %332 = vector.shape_cast %331 : vector<8xf32> to vector<8x1xf32>
    %333 = vector.broadcast %332 : vector<8x1xf32> to vector<8x8xf32>
    %334 = arith.subf %330, %333 : vector<8x8xf32>
    %335 = math.exp %334 : vector<8x8xf32>
    %cst_153 = arith.constant dense<0.000000e+00> : vector<8xf32>
    %336 = vector.multi_reduction <add>, %335, %cst_153 [1] : vector<8x8xf32> to vector<8xf32>
    %337 = vector.shape_cast %336 : vector<8xf32> to vector<8x1xf32>
    %338 = tpu.reciprocal %337 {approx = true} : vector<8x1xf32> -> vector<8x1xf32>
    %339 = vector.broadcast %338 : vector<8x1xf32> to vector<8x8xf32>
    %340 = arith.mulf %335, %339 : vector<8x8xf32>
    %cst_154 = arith.constant dense<0.000000e+00> : vector<8x16xf32>
    %341 = tpu.matmul %340, %325, %cst_154 {dimension_numbers = #tpu.dot_dimension_numbers<[1], [0], [0], [1], [0, 0, 1, 1], [], []>} : vector<8x8xf32>, vector<8x16xf32>, vector<8x16xf32> -> vector<8x16xf32>
    %342 = vector.extract_strided_slice %299 {offsets = [0, 32], sizes = [8, 16], strides = [1, 1]} : vector<16x64xf32> to vector<8x16xf32>
    %343 = vector.extract_strided_slice %300 {offsets = [0, 32], sizes = [8, 16], strides = [1, 1]} : vector<16x64xf32> to vector<8x16xf32>
    %344 = vector.extract_strided_slice %301 {offsets = [0, 32], sizes = [8, 16], strides = [1, 1]} : vector<16x64xf32> to vector<8x16xf32>
    %cst_155 = arith.constant dense<0.000000e+00> : vector<8x8xf32>
    %345 = tpu.matmul %342, %343, %cst_155 {dimension_numbers = #tpu.dot_dimension_numbers<[1], [1], [0], [0], [0, 0, 1, 0], [], []>} : vector<8x16xf32>, vector<8x16xf32>, vector<8x8xf32> -> vector<8x8xf32>
    %cst_156 = arith.constant 2.500000e-01 : f32
    %346 = vector.broadcast %cst_156 : f32 to vector<8x8xf32>
    %347 = arith.mulf %345, %346 : vector<8x8xf32>
    %348 = vector.broadcast %303 : vector<1x8xf32> to vector<8x8xf32>
    %349 = arith.addf %347, %348 : vector<8x8xf32>
    %cst_157 = arith.constant dense<0xFF800000> : vector<8xf32>
    %350 = vector.multi_reduction <maximumf>, %349, %cst_157 [1] : vector<8x8xf32> to vector<8xf32>
    %351 = vector.shape_cast %350 : vector<8xf32> to vector<8x1xf32>
    %352 = vector.broadcast %351 : vector<8x1xf32> to vector<8x8xf32>
    %353 = arith.subf %349, %352 : vector<8x8xf32>
    %354 = math.exp %353 : vector<8x8xf32>
    %cst_158 = arith.constant dense<0.000000e+00> : vector<8xf32>
    %355 = vector.multi_reduction <add>, %354, %cst_158 [1] : vector<8x8xf32> to vector<8xf32>
    %356 = vector.shape_cast %355 : vector<8xf32> to vector<8x1xf32>
    %357 = tpu.reciprocal %356 {approx = true} : vector<8x1xf32> -> vector<8x1xf32>
    %358 = vector.broadcast %357 : vector<8x1xf32> to vector<8x8xf32>
    %359 = arith.mulf %354, %358 : vector<8x8xf32>
    %cst_159 = arith.constant dense<0.000000e+00> : vector<8x16xf32>
    %360 = tpu.matmul %359, %344, %cst_159 {dimension_numbers = #tpu.dot_dimension_numbers<[1], [0], [0], [1], [0, 0, 1, 1], [], []>} : vector<8x8xf32>, vector<8x16xf32>, vector<8x16xf32> -> vector<8x16xf32>
    %361 = vector.extract_strided_slice %299 {offsets = [0, 48], sizes = [8, 16], strides = [1, 1]} : vector<16x64xf32> to vector<8x16xf32>
    %362 = vector.extract_strided_slice %300 {offsets = [0, 48], sizes = [8, 16], strides = [1, 1]} : vector<16x64xf32> to vector<8x16xf32>
    %363 = vector.extract_strided_slice %301 {offsets = [0, 48], sizes = [8, 16], strides = [1, 1]} : vector<16x64xf32> to vector<8x16xf32>
    %cst_160 = arith.constant dense<0.000000e+00> : vector<8x8xf32>
    %364 = tpu.matmul %361, %362, %cst_160 {dimension_numbers = #tpu.dot_dimension_numbers<[1], [1], [0], [0], [0, 0, 1, 0], [], []>} : vector<8x16xf32>, vector<8x16xf32>, vector<8x8xf32> -> vector<8x8xf32>
    %cst_161 = arith.constant 2.500000e-01 : f32
    %365 = vector.broadcast %cst_161 : f32 to vector<8x8xf32>
    %366 = arith.mulf %364, %365 : vector<8x8xf32>
    %367 = vector.broadcast %303 : vector<1x8xf32> to vector<8x8xf32>
    %368 = arith.addf %366, %367 : vector<8x8xf32>
    %cst_162 = arith.constant dense<0xFF800000> : vector<8xf32>
    %369 = vector.multi_reduction <maximumf>, %368, %cst_162 [1] : vector<8x8xf32> to vector<8xf32>
    %370 = vector.shape_cast %369 : vector<8xf32> to vector<8x1xf32>
    %371 = vector.broadcast %370 : vector<8x1xf32> to vector<8x8xf32>
    %372 = arith.subf %368, %371 : vector<8x8xf32>
    %373 = math.exp %372 : vector<8x8xf32>
    %cst_163 = arith.constant dense<0.000000e+00> : vector<8xf32>
    %374 = vector.multi_reduction <add>, %373, %cst_163 [1] : vector<8x8xf32> to vector<8xf32>
    %375 = vector.shape_cast %374 : vector<8xf32> to vector<8x1xf32>
    %376 = tpu.reciprocal %375 {approx = true} : vector<8x1xf32> -> vector<8x1xf32>
    %377 = vector.broadcast %376 : vector<8x1xf32> to vector<8x8xf32>
    %378 = arith.mulf %373, %377 : vector<8x8xf32>
    %cst_164 = arith.constant dense<0.000000e+00> : vector<8x16xf32>
    %379 = tpu.matmul %378, %363, %cst_164 {dimension_numbers = #tpu.dot_dimension_numbers<[1], [0], [0], [1], [0, 0, 1, 1], [], []>} : vector<8x8xf32>, vector<8x16xf32>, vector<8x16xf32> -> vector<8x16xf32>
    %380 = tpu.concatenate %322, %341, %360, %379 in 1 : vector<8x16xf32>, vector<8x16xf32>, vector<8x16xf32>, vector<8x16xf32> -> vector<8x64xf32>
    %c0_165 = arith.constant 0 : index
    %c1_166 = arith.constant 1 : index
    %c0_167 = arith.constant 0 : index
    %c0_168 = arith.constant 0 : index
    %381 = vector.load %arg2[%c0_165, %c1_166, %c0_167, %c0_168] : memref<1x2x1x8xf32, #tpu.memory_space<vmem>>, vector<1x1x1x8xf32>
    %382 = vector.shape_cast %381 : vector<1x1x1x8xf32> to vector<1x8xf32>
    %383 = vector.extract_strided_slice %299 {offsets = [8, 0], sizes = [8, 16], strides = [1, 1]} : vector<16x64xf32> to vector<8x16xf32>
    %384 = vector.extract_strided_slice %300 {offsets = [8, 0], sizes = [8, 16], strides = [1, 1]} : vector<16x64xf32> to vector<8x16xf32>
    %385 = vector.extract_strided_slice %301 {offsets = [8, 0], sizes = [8, 16], strides = [1, 1]} : vector<16x64xf32> to vector<8x16xf32>
    %cst_169 = arith.constant dense<0.000000e+00> : vector<8x8xf32>
    %386 = tpu.matmul %383, %384, %cst_169 {dimension_numbers = #tpu.dot_dimension_numbers<[1], [1], [0], [0], [0, 0, 1, 0], [], []>} : vector<8x16xf32>, vector<8x16xf32>, vector<8x8xf32> -> vector<8x8xf32>
    %cst_170 = arith.constant 2.500000e-01 : f32
    %387 = vector.broadcast %cst_170 : f32 to vector<8x8xf32>
    %388 = arith.mulf %386, %387 : vector<8x8xf32>
    %389 = vector.broadcast %382 : vector<1x8xf32> to vector<8x8xf32>
    %390 = arith.addf %388, %389 : vector<8x8xf32>
    %cst_171 = arith.constant dense<0xFF800000> : vector<8xf32>
    %391 = vector.multi_reduction <maximumf>, %390, %cst_171 [1] : vector<8x8xf32> to vector<8xf32>
    %392 = vector.shape_cast %391 : vector<8xf32> to vector<8x1xf32>
    %393 = vector.broadcast %392 : vector<8x1xf32> to vector<8x8xf32>
    %394 = arith.subf %390, %393 : vector<8x8xf32>
    %395 = math.exp %394 : vector<8x8xf32>
    %cst_172 = arith.constant dense<0.000000e+00> : vector<8xf32>
    %396 = vector.multi_reduction <add>, %395, %cst_172 [1] : vector<8x8xf32> to vector<8xf32>
    %397 = vector.shape_cast %396 : vector<8xf32> to vector<8x1xf32>
    %398 = tpu.reciprocal %397 {approx = true} : vector<8x1xf32> -> vector<8x1xf32>
    %399 = vector.broadcast %398 : vector<8x1xf32> to vector<8x8xf32>
    %400 = arith.mulf %395, %399 : vector<8x8xf32>
    %cst_173 = arith.constant dense<0.000000e+00> : vector<8x16xf32>
    %401 = tpu.matmul %400, %385, %cst_173 {dimension_numbers = #tpu.dot_dimension_numbers<[1], [0], [0], [1], [0, 0, 1, 1], [], []>} : vector<8x8xf32>, vector<8x16xf32>, vector<8x16xf32> -> vector<8x16xf32>
    %402 = vector.extract_strided_slice %299 {offsets = [8, 16], sizes = [8, 16], strides = [1, 1]} : vector<16x64xf32> to vector<8x16xf32>
    %403 = vector.extract_strided_slice %300 {offsets = [8, 16], sizes = [8, 16], strides = [1, 1]} : vector<16x64xf32> to vector<8x16xf32>
    %404 = vector.extract_strided_slice %301 {offsets = [8, 16], sizes = [8, 16], strides = [1, 1]} : vector<16x64xf32> to vector<8x16xf32>
    %cst_174 = arith.constant dense<0.000000e+00> : vector<8x8xf32>
    %405 = tpu.matmul %402, %403, %cst_174 {dimension_numbers = #tpu.dot_dimension_numbers<[1], [1], [0], [0], [0, 0, 1, 0], [], []>} : vector<8x16xf32>, vector<8x16xf32>, vector<8x8xf32> -> vector<8x8xf32>
    %cst_175 = arith.constant 2.500000e-01 : f32
    %406 = vector.broadcast %cst_175 : f32 to vector<8x8xf32>
    %407 = arith.mulf %405, %406 : vector<8x8xf32>
    %408 = vector.broadcast %382 : vector<1x8xf32> to vector<8x8xf32>
    %409 = arith.addf %407, %408 : vector<8x8xf32>
    %cst_176 = arith.constant dense<0xFF800000> : vector<8xf32>
    %410 = vector.multi_reduction <maximumf>, %409, %cst_176 [1] : vector<8x8xf32> to vector<8xf32>
    %411 = vector.shape_cast %410 : vector<8xf32> to vector<8x1xf32>
    %412 = vector.broadcast %411 : vector<8x1xf32> to vector<8x8xf32>
    %413 = arith.subf %409, %412 : vector<8x8xf32>
    %414 = math.exp %413 : vector<8x8xf32>
    %cst_177 = arith.constant dense<0.000000e+00> : vector<8xf32>
    %415 = vector.multi_reduction <add>, %414, %cst_177 [1] : vector<8x8xf32> to vector<8xf32>
    %416 = vector.shape_cast %415 : vector<8xf32> to vector<8x1xf32>
    %417 = tpu.reciprocal %416 {approx = true} : vector<8x1xf32> -> vector<8x1xf32>
    %418 = vector.broadcast %417 : vector<8x1xf32> to vector<8x8xf32>
    %419 = arith.mulf %414, %418 : vector<8x8xf32>
    %cst_178 = arith.constant dense<0.000000e+00> : vector<8x16xf32>
    %420 = tpu.matmul %419, %404, %cst_178 {dimension_numbers = #tpu.dot_dimension_numbers<[1], [0], [0], [1], [0, 0, 1, 1], [], []>} : vector<8x8xf32>, vector<8x16xf32>, vector<8x16xf32> -> vector<8x16xf32>
    %421 = vector.extract_strided_slice %299 {offsets = [8, 32], sizes = [8, 16], strides = [1, 1]} : vector<16x64xf32> to vector<8x16xf32>
    %422 = vector.extract_strided_slice %300 {offsets = [8, 32], sizes = [8, 16], strides = [1, 1]} : vector<16x64xf32> to vector<8x16xf32>
    %423 = vector.extract_strided_slice %301 {offsets = [8, 32], sizes = [8, 16], strides = [1, 1]} : vector<16x64xf32> to vector<8x16xf32>
    %cst_179 = arith.constant dense<0.000000e+00> : vector<8x8xf32>
    %424 = tpu.matmul %421, %422, %cst_179 {dimension_numbers = #tpu.dot_dimension_numbers<[1], [1], [0], [0], [0, 0, 1, 0], [], []>} : vector<8x16xf32>, vector<8x16xf32>, vector<8x8xf32> -> vector<8x8xf32>
    %cst_180 = arith.constant 2.500000e-01 : f32
    %425 = vector.broadcast %cst_180 : f32 to vector<8x8xf32>
    %426 = arith.mulf %424, %425 : vector<8x8xf32>
    %427 = vector.broadcast %382 : vector<1x8xf32> to vector<8x8xf32>
    %428 = arith.addf %426, %427 : vector<8x8xf32>
    %cst_181 = arith.constant dense<0xFF800000> : vector<8xf32>
    %429 = vector.multi_reduction <maximumf>, %428, %cst_181 [1] : vector<8x8xf32> to vector<8xf32>
    %430 = vector.shape_cast %429 : vector<8xf32> to vector<8x1xf32>
    %431 = vector.broadcast %430 : vector<8x1xf32> to vector<8x8xf32>
    %432 = arith.subf %428, %431 : vector<8x8xf32>
    %433 = math.exp %432 : vector<8x8xf32>
    %cst_182 = arith.constant dense<0.000000e+00> : vector<8xf32>
    %434 = vector.multi_reduction <add>, %433, %cst_182 [1] : vector<8x8xf32> to vector<8xf32>
    %435 = vector.shape_cast %434 : vector<8xf32> to vector<8x1xf32>
    %436 = tpu.reciprocal %435 {approx = true} : vector<8x1xf32> -> vector<8x1xf32>
    %437 = vector.broadcast %436 : vector<8x1xf32> to vector<8x8xf32>
    %438 = arith.mulf %433, %437 : vector<8x8xf32>
    %cst_183 = arith.constant dense<0.000000e+00> : vector<8x16xf32>
    %439 = tpu.matmul %438, %423, %cst_183 {dimension_numbers = #tpu.dot_dimension_numbers<[1], [0], [0], [1], [0, 0, 1, 1], [], []>} : vector<8x8xf32>, vector<8x16xf32>, vector<8x16xf32> -> vector<8x16xf32>
    %440 = vector.extract_strided_slice %299 {offsets = [8, 48], sizes = [8, 16], strides = [1, 1]} : vector<16x64xf32> to vector<8x16xf32>
    %441 = vector.extract_strided_slice %300 {offsets = [8, 48], sizes = [8, 16], strides = [1, 1]} : vector<16x64xf32> to vector<8x16xf32>
    %442 = vector.extract_strided_slice %301 {offsets = [8, 48], sizes = [8, 16], strides = [1, 1]} : vector<16x64xf32> to vector<8x16xf32>
    %cst_184 = arith.constant dense<0.000000e+00> : vector<8x8xf32>
    %443 = tpu.matmul %440, %441, %cst_184 {dimension_numbers = #tpu.dot_dimension_numbers<[1], [1], [0], [0], [0, 0, 1, 0], [], []>} : vector<8x16xf32>, vector<8x16xf32>, vector<8x8xf32> -> vector<8x8xf32>
    %cst_185 = arith.constant 2.500000e-01 : f32
    %444 = vector.broadcast %cst_185 : f32 to vector<8x8xf32>
    %445 = arith.mulf %443, %444 : vector<8x8xf32>
    %446 = vector.broadcast %382 : vector<1x8xf32> to vector<8x8xf32>
    %447 = arith.addf %445, %446 : vector<8x8xf32>
    %cst_186 = arith.constant dense<0xFF800000> : vector<8xf32>
    %448 = vector.multi_reduction <maximumf>, %447, %cst_186 [1] : vector<8x8xf32> to vector<8xf32>
    %449 = vector.shape_cast %448 : vector<8xf32> to vector<8x1xf32>
    %450 = vector.broadcast %449 : vector<8x1xf32> to vector<8x8xf32>
    %451 = arith.subf %447, %450 : vector<8x8xf32>
    %452 = math.exp %451 : vector<8x8xf32>
    %cst_187 = arith.constant dense<0.000000e+00> : vector<8xf32>
    %453 = vector.multi_reduction <add>, %452, %cst_187 [1] : vector<8x8xf32> to vector<8xf32>
    %454 = vector.shape_cast %453 : vector<8xf32> to vector<8x1xf32>
    %455 = tpu.reciprocal %454 {approx = true} : vector<8x1xf32> -> vector<8x1xf32>
    %456 = vector.broadcast %455 : vector<8x1xf32> to vector<8x8xf32>
    %457 = arith.mulf %452, %456 : vector<8x8xf32>
    %cst_188 = arith.constant dense<0.000000e+00> : vector<8x16xf32>
    %458 = tpu.matmul %457, %442, %cst_188 {dimension_numbers = #tpu.dot_dimension_numbers<[1], [0], [0], [1], [0, 0, 1, 1], [], []>} : vector<8x8xf32>, vector<8x16xf32>, vector<8x16xf32> -> vector<8x16xf32>
    %459 = tpu.concatenate %401, %420, %439, %458 in 1 : vector<8x16xf32>, vector<8x16xf32>, vector<8x16xf32>, vector<8x16xf32> -> vector<8x64xf32>
    %460 = tpu.concatenate %380, %459 in 0 : vector<8x64xf32>, vector<8x64xf32> -> vector<16x64xf32>
    %c0_189 = arith.constant 0 : index
    %c1_190 = arith.constant 1 : index
    %c0_191 = arith.constant 0 : index
    %c0_192 = arith.constant 0 : index
    %461 = vector.load %arg9[%c0_189, %c1_190, %c0_191, %c0_192] : memref<1x2x64x64xf32, #tpu.memory_space<vmem>>, vector<1x1x64x64xf32>
    %462 = vector.shape_cast %461 : vector<1x1x64x64xf32> to vector<64x64xf32>
    %cst_193 = arith.constant dense<0.000000e+00> : vector<16x64xf32>
    %463 = tpu.matmul %460, %462, %cst_193 {dimension_numbers = #tpu.dot_dimension_numbers<[1], [0], [0], [1], [0, 0, 1, 1], [], []>} : vector<16x64xf32>, vector<64x64xf32>, vector<16x64xf32> -> vector<16x64xf32>
    %c0_194 = arith.constant 0 : index
    %c1_195 = arith.constant 1 : index
    %c0_196 = arith.constant 0 : index
    %c0_197 = arith.constant 0 : index
    %464 = vector.load %arg10[%c0_194, %c1_195, %c0_196, %c0_197] : memref<1x2x1x64xf32, #tpu.memory_space<vmem>>, vector<1x1x1x64xf32>
    %465 = vector.shape_cast %464 : vector<1x1x1x64xf32> to vector<1x64xf32>
    %466 = vector.broadcast %465 : vector<1x64xf32> to vector<16x64xf32>
    %467 = arith.addf %463, %466 : vector<16x64xf32>
    %468 = arith.addf %467, %291 : vector<16x64xf32>
    %c0_198 = arith.constant 0 : index
    %c1_199 = arith.constant 1 : index
    %c0_200 = arith.constant 0 : index
    %c0_201 = arith.constant 0 : index
    %469 = vector.load %arg11[%c0_198, %c1_199, %c0_200, %c0_201] : memref<1x2x1x64xf32, #tpu.memory_space<vmem>>, vector<1x1x1x64xf32>
    %470 = vector.shape_cast %469 : vector<1x1x1x64xf32> to vector<1x64xf32>
    %c0_202 = arith.constant 0 : index
    %c1_203 = arith.constant 1 : index
    %c0_204 = arith.constant 0 : index
    %c0_205 = arith.constant 0 : index
    %471 = vector.load %arg12[%c0_202, %c1_203, %c0_204, %c0_205] : memref<1x2x1x64xf32, #tpu.memory_space<vmem>>, vector<1x1x1x64xf32>
    %472 = vector.shape_cast %471 : vector<1x1x1x64xf32> to vector<1x64xf32>
    %cst_206 = arith.constant dense<0.000000e+00> : vector<16xf32>
    %473 = vector.multi_reduction <add>, %468, %cst_206 [1] : vector<16x64xf32> to vector<16xf32>
    %474 = vector.shape_cast %473 : vector<16xf32> to vector<16x1xf32>
    %cst_207 = arith.constant 6.400000e+01 : f32
    %475 = vector.broadcast %cst_207 : f32 to vector<16x1xf32>
    %476 = arith.divf %474, %475 : vector<16x1xf32>
    %477 = vector.broadcast %476 : vector<16x1xf32> to vector<16x64xf32>
    %478 = arith.subf %468, %477 : vector<16x64xf32>
    %479 = arith.mulf %478, %478 : vector<16x64xf32>
    %cst_208 = arith.constant dense<0.000000e+00> : vector<16xf32>
    %480 = vector.multi_reduction <add>, %479, %cst_208 [1] : vector<16x64xf32> to vector<16xf32>
    %481 = vector.shape_cast %480 : vector<16xf32> to vector<16x1xf32>
    %cst_209 = arith.constant 6.400000e+01 : f32
    %482 = vector.broadcast %cst_209 : f32 to vector<16x1xf32>
    %483 = arith.divf %481, %482 : vector<16x1xf32>
    %484 = vector.broadcast %476 : vector<16x1xf32> to vector<16x64xf32>
    %485 = arith.subf %468, %484 : vector<16x64xf32>
    %cst_210 = arith.constant 9.99999996E-13 : f32
    %486 = vector.broadcast %cst_210 : f32 to vector<16x1xf32>
    %487 = arith.addf %483, %486 : vector<16x1xf32>
    %488 = math.rsqrt %487 : vector<16x1xf32>
    %489 = vector.broadcast %488 : vector<16x1xf32> to vector<16x64xf32>
    %490 = arith.mulf %485, %489 : vector<16x64xf32>
    %491 = vector.broadcast %470 : vector<1x64xf32> to vector<16x64xf32>
    %492 = arith.mulf %490, %491 : vector<16x64xf32>
    %493 = vector.broadcast %472 : vector<1x64xf32> to vector<16x64xf32>
    %494 = arith.addf %492, %493 : vector<16x64xf32>
    %c0_211 = arith.constant 0 : index
    %c1_212 = arith.constant 1 : index
    %c0_213 = arith.constant 0 : index
    %c0_214 = arith.constant 0 : index
    %495 = vector.load %arg13[%c0_211, %c1_212, %c0_213, %c0_214] : memref<1x2x64x128xf32, #tpu.memory_space<vmem>>, vector<1x1x64x128xf32>
    %496 = vector.shape_cast %495 : vector<1x1x64x128xf32> to vector<64x128xf32>
    %cst_215 = arith.constant dense<0.000000e+00> : vector<16x128xf32>
    %497 = tpu.matmul %494, %496, %cst_215 {dimension_numbers = #tpu.dot_dimension_numbers<[1], [0], [0], [1], [0, 0, 1, 1], [], []>} : vector<16x64xf32>, vector<64x128xf32>, vector<16x128xf32> -> vector<16x128xf32>
    %c0_216 = arith.constant 0 : index
    %c1_217 = arith.constant 1 : index
    %c0_218 = arith.constant 0 : index
    %c0_219 = arith.constant 0 : index
    %498 = vector.load %arg14[%c0_216, %c1_217, %c0_218, %c0_219] : memref<1x2x1x128xf32, #tpu.memory_space<vmem>>, vector<1x1x1x128xf32>
    %499 = vector.shape_cast %498 : vector<1x1x1x128xf32> to vector<1x128xf32>
    %500 = vector.broadcast %499 : vector<1x128xf32> to vector<16x128xf32>
    %501 = arith.addf %497, %500 : vector<16x128xf32>
    %502 = arith.mulf %501, %501 : vector<16x128xf32>
    %503 = arith.mulf %501, %502 : vector<16x128xf32>
    %cst_220 = arith.constant 4.471500e-02 : f32
    %504 = vector.broadcast %cst_220 : f32 to vector<16x128xf32>
    %505 = arith.mulf %504, %503 : vector<16x128xf32>
    %506 = arith.addf %501, %505 : vector<16x128xf32>
    %cst_221 = arith.constant 0.797884583 : f32
    %507 = vector.broadcast %cst_221 : f32 to vector<16x128xf32>
    %508 = arith.mulf %507, %506 : vector<16x128xf32>
    %509 = math.tanh %508 : vector<16x128xf32>
    %cst_222 = arith.constant 1.000000e+00 : f32
    %510 = vector.broadcast %cst_222 : f32 to vector<16x128xf32>
    %511 = arith.addf %510, %509 : vector<16x128xf32>
    %cst_223 = arith.constant 5.000000e-01 : f32
    %512 = vector.broadcast %cst_223 : f32 to vector<16x128xf32>
    %513 = arith.mulf %512, %511 : vector<16x128xf32>
    %514 = arith.mulf %501, %513 : vector<16x128xf32>
    %c0_224 = arith.constant 0 : index
    %c1_225 = arith.constant 1 : index
    %c0_226 = arith.constant 0 : index
    %c0_227 = arith.constant 0 : index
    %515 = vector.load %arg15[%c0_224, %c1_225, %c0_226, %c0_227] : memref<1x2x128x64xf32, #tpu.memory_space<vmem>>, vector<1x1x128x64xf32>
    %516 = vector.shape_cast %515 : vector<1x1x128x64xf32> to vector<128x64xf32>
    %cst_228 = arith.constant dense<0.000000e+00> : vector<16x64xf32>
    %517 = tpu.matmul %514, %516, %cst_228 {dimension_numbers = #tpu.dot_dimension_numbers<[1], [0], [0], [1], [0, 0, 1, 1], [], []>} : vector<16x128xf32>, vector<128x64xf32>, vector<16x64xf32> -> vector<16x64xf32>
    %c0_229 = arith.constant 0 : index
    %c1_230 = arith.constant 1 : index
    %c0_231 = arith.constant 0 : index
    %c0_232 = arith.constant 0 : index
    %518 = vector.load %arg16[%c0_229, %c1_230, %c0_231, %c0_232] : memref<1x2x1x64xf32, #tpu.memory_space<vmem>>, vector<1x1x1x64xf32>
    %519 = vector.shape_cast %518 : vector<1x1x1x64xf32> to vector<1x64xf32>
    %520 = vector.broadcast %519 : vector<1x64xf32> to vector<16x64xf32>
    %521 = arith.addf %517, %520 : vector<16x64xf32>
    %522 = arith.addf %521, %494 : vector<16x64xf32>
    %c0_233 = arith.constant 0 : index
    %c1_234 = arith.constant 1 : index
    %c0_235 = arith.constant 0 : index
    %c0_236 = arith.constant 0 : index
    %523 = vector.load %arg17[%c0_233, %c1_234, %c0_235, %c0_236] : memref<1x2x1x64xf32, #tpu.memory_space<vmem>>, vector<1x1x1x64xf32>
    %524 = vector.shape_cast %523 : vector<1x1x1x64xf32> to vector<1x64xf32>
    %c0_237 = arith.constant 0 : index
    %c1_238 = arith.constant 1 : index
    %c0_239 = arith.constant 0 : index
    %c0_240 = arith.constant 0 : index
    %525 = vector.load %arg18[%c0_237, %c1_238, %c0_239, %c0_240] : memref<1x2x1x64xf32, #tpu.memory_space<vmem>>, vector<1x1x1x64xf32>
    %526 = vector.shape_cast %525 : vector<1x1x1x64xf32> to vector<1x64xf32>
    %cst_241 = arith.constant dense<0.000000e+00> : vector<16xf32>
    %527 = vector.multi_reduction <add>, %522, %cst_241 [1] : vector<16x64xf32> to vector<16xf32>
    %528 = vector.shape_cast %527 : vector<16xf32> to vector<16x1xf32>
    %cst_242 = arith.constant 6.400000e+01 : f32
    %529 = vector.broadcast %cst_242 : f32 to vector<16x1xf32>
    %530 = arith.divf %528, %529 : vector<16x1xf32>
    %531 = vector.broadcast %530 : vector<16x1xf32> to vector<16x64xf32>
    %532 = arith.subf %522, %531 : vector<16x64xf32>
    %533 = arith.mulf %532, %532 : vector<16x64xf32>
    %cst_243 = arith.constant dense<0.000000e+00> : vector<16xf32>
    %534 = vector.multi_reduction <add>, %533, %cst_243 [1] : vector<16x64xf32> to vector<16xf32>
    %535 = vector.shape_cast %534 : vector<16xf32> to vector<16x1xf32>
    %cst_244 = arith.constant 6.400000e+01 : f32
    %536 = vector.broadcast %cst_244 : f32 to vector<16x1xf32>
    %537 = arith.divf %535, %536 : vector<16x1xf32>
    %538 = vector.broadcast %530 : vector<16x1xf32> to vector<16x64xf32>
    %539 = arith.subf %522, %538 : vector<16x64xf32>
    %cst_245 = arith.constant 9.99999996E-13 : f32
    %540 = vector.broadcast %cst_245 : f32 to vector<16x1xf32>
    %541 = arith.addf %537, %540 : vector<16x1xf32>
    %542 = math.rsqrt %541 : vector<16x1xf32>
    %543 = vector.broadcast %542 : vector<16x1xf32> to vector<16x64xf32>
    %544 = arith.mulf %539, %543 : vector<16x64xf32>
    %545 = vector.broadcast %524 : vector<1x64xf32> to vector<16x64xf32>
    %546 = arith.mulf %544, %545 : vector<16x64xf32>
    %547 = vector.broadcast %526 : vector<1x64xf32> to vector<16x64xf32>
    %548 = arith.addf %546, %547 : vector<16x64xf32>
    %549 = vector.extract_strided_slice %548 {offsets = [0, 0], sizes = [1, 64], strides = [1, 1]} : vector<16x64xf32> to vector<1x64xf32>
    %550 = vector.extract_strided_slice %548 {offsets = [8, 0], sizes = [1, 64], strides = [1, 1]} : vector<16x64xf32> to vector<1x64xf32>
    %551 = tpu.concatenate %549, %550 in 0 : vector<1x64xf32>, vector<1x64xf32> -> vector<2x64xf32>
    %c0_246 = arith.constant 0 : index
    %c0_247 = arith.constant 0 : index
    %c0_248 = arith.constant 0 : index
    %552 = vector.load %arg19[%c0_246, %c0_247, %c0_248] : memref<1x2x64xf32, #tpu.memory_space<vmem>>, vector<1x2x64xf32>
    %553 = vector.shape_cast %552 : vector<1x2x64xf32> to vector<2x64xf32>
    %554 = vector.shape_cast %551 : vector<2x64xf32> to vector<1x2x64xf32>
    tpu.vector_store %arg19[%c0_246, %c0_247, %c0_248], %554 {strides = array<i32>} : memref<1x2x64xf32, #tpu.memory_space<vmem>>, vector<1x2x64xf32>,
    return
  }
  func.func @transform_0(%arg0: i32) -> (i32, i32, i32) {
    %c0_i32 = arith.constant 0 : i32
    %c0_i32_0 = arith.constant 0 : i32
    %c0_i32_1 = arith.constant 0 : i32
    return %arg0, %c0_i32, %c0_i32_0 : i32, i32, i32
  }
  func.func @transform_1(%arg0: i32) -> (i32, i32, i32, i32) {
    %c0_i32 = arith.constant 0 : i32
    %c0_i32_0 = arith.constant 0 : i32
    %c0_i32_1 = arith.constant 0 : i32
    %c0_i32_2 = arith.constant 0 : i32
    return %arg0, %c0_i32, %c0_i32_0, %c0_i32_1 : i32, i32, i32, i32
  }
  func.func @transform_2(%arg0: i32) -> (i32, i32, i32) {
    %c0_i32 = arith.constant 0 : i32
    %c0_i32_0 = arith.constant 0 : i32
    %c0_i32_1 = arith.constant 0 : i32
    return %arg0, %c0_i32, %c0_i32_0 : i32, i32, i32
  }
  func.func @transform_3(%arg0: i32) -> (i32, i32, i32) {
    %c0_i32 = arith.constant 0 : i32
    %c0_i32_0 = arith.constant 0 : i32
    %c0_i32_1 = arith.constant 0 : i32
    return %arg0, %c0_i32, %c0_i32_0 : i32, i32, i32
  }
  func.func @transform_4(%arg0: i32) -> (i32, i32, i32) {
    %c0_i32 = arith.constant 0 : i32
    %c0_i32_0 = arith.constant 0 : i32
    %c0_i32_1 = arith.constant 0 : i32
    return %arg0, %c0_i32, %c0_i32_0 : i32, i32, i32
  }
  func.func @transform_5(%arg0: i32) -> (i32, i32, i32) {
    %c0_i32 = arith.constant 0 : i32
    %c0_i32_0 = arith.constant 0 : i32
    %c0_i32_1 = arith.constant 0 : i32
    return %arg0, %c0_i32, %c0_i32_0 : i32, i32, i32
  }
  func.func @transform_6(%arg0: i32) -> (i32, i32, i32, i32) {
    %c0_i32 = arith.constant 0 : i32
    %c0_i32_0 = arith.constant 0 : i32
    %c0_i32_1 = arith.constant 0 : i32
    %c0_i32_2 = arith.constant 0 : i32
    return %arg0, %c0_i32, %c0_i32_0, %c0_i32_1 : i32, i32, i32, i32
  }
  func.func @transform_7(%arg0: i32) -> (i32, i32, i32, i32) {
    %c0_i32 = arith.constant 0 : i32
    %c0_i32_0 = arith.constant 0 : i32
    %c0_i32_1 = arith.constant 0 : i32
    %c0_i32_2 = arith.constant 0 : i32
    return %arg0, %c0_i32, %c0_i32_0, %c0_i32_1 : i32, i32, i32, i32
  }
  func.func @transform_8(%arg0: i32) -> (i32, i32, i32, i32) {
    %c0_i32 = arith.constant 0 : i32
    %c0_i32_0 = arith.constant 0 : i32
    %c0_i32_1 = arith.constant 0 : i32
    %c0_i32_2 = arith.constant 0 : i32
    return %arg0, %c0_i32, %c0_i32_0, %c0_i32_1 : i32, i32, i32, i32
  }
  func.func @transform_9(%arg0: i32) -> (i32, i32, i32, i32) {
    %c0_i32 = arith.constant 0 : i32
    %c0_i32_0 = arith.constant 0 : i32
    %c0_i32_1 = arith.constant 0 : i32
    %c0_i32_2 = arith.constant 0 : i32
    return %arg0, %c0_i32, %c0_i32_0, %c0_i32_1 : i32, i32, i32, i32
  }
  func.func @transform_10(%arg0: i32) -> (i32, i32, i32, i32) {
    %c0_i32 = arith.constant 0 : i32
    %c0_i32_0 = arith.constant 0 : i32
    %c0_i32_1 = arith.constant 0 : i32
    %c0_i32_2 = arith.constant 0 : i32
    return %arg0, %c0_i32, %c0_i32_0, %c0_i32_1 : i32, i32, i32, i32
  }
  func.func @transform_11(%arg0: i32) -> (i32, i32, i32, i32) {
    %c0_i32 = arith.constant 0 : i32
    %c0_i32_0 = arith.constant 0 : i32
    %c0_i32_1 = arith.constant 0 : i32
    %c0_i32_2 = arith.constant 0 : i32
    return %arg0, %c0_i32, %c0_i32_0, %c0_i32_1 : i32, i32, i32, i32
  }
  func.func @transform_12(%arg0: i32) -> (i32, i32, i32, i32) {
    %c0_i32 = arith.constant 0 : i32
    %c0_i32_0 = arith.constant 0 : i32
    %c0_i32_1 = arith.constant 0 : i32
    %c0_i32_2 = arith.constant 0 : i32
    return %arg0, %c0_i32, %c0_i32_0, %c0_i32_1 : i32, i32, i32, i32
  }
  func.func @transform_13(%arg0: i32) -> (i32, i32, i32, i32) {
    %c0_i32 = arith.constant 0 : i32
    %c0_i32_0 = arith.constant 0 : i32
    %c0_i32_1 = arith.constant 0 : i32
    %c0_i32_2 = arith.constant 0 : i32
    return %arg0, %c0_i32, %c0_i32_0, %c0_i32_1 : i32, i32, i32, i32
  }
  func.func @transform_14(%arg0: i32) -> (i32, i32, i32, i32) {
    %c0_i32 = arith.constant 0 : i32
    %c0_i32_0 = arith.constant 0 : i32
    %c0_i32_1 = arith.constant 0 : i32
    %c0_i32_2 = arith.constant 0 : i32
    return %arg0, %c0_i32, %c0_i32_0, %c0_i32_1 : i32, i32, i32, i32
  }
  func.func @transform_15(%arg0: i32) -> (i32, i32, i32, i32) {
    %c0_i32 = arith.constant 0 : i32
    %c0_i32_0 = arith.constant 0 : i32
    %c0_i32_1 = arith.constant 0 : i32
    %c0_i32_2 = arith.constant 0 : i32
    return %arg0, %c0_i32, %c0_i32_0, %c0_i32_1 : i32, i32, i32, i32
  }
  func.func @transform_16(%arg0: i32) -> (i32, i32, i32, i32) {
    %c0_i32 = arith.constant 0 : i32
    %c0_i32_0 = arith.constant 0 : i32
    %c0_i32_1 = arith.constant 0 : i32
    %c0_i32_2 = arith.constant 0 : i32
    return %arg0, %c0_i32, %c0_i32_0, %c0_i32_1 : i32, i32, i32, i32
  }
  func.func @transform_17(%arg0: i32) -> (i32, i32, i32, i32) {
    %c0_i32 = arith.constant 0 : i32
    %c0_i32_0 = arith.constant 0 : i32
    %c0_i32_1 = arith.constant 0 : i32
    %c0_i32_2 = arith.constant 0 : i32
    return %arg0, %c0_i32, %c0_i32_0, %c0_i32_1 : i32, i32, i32, i32
  }
  func.func @transform_18(%arg0: i32) -> (i32, i32, i32) {
    %c0_i32 = arith.constant 0 : i32
    %c0_i32_0 = arith.constant 0 : i32
    %c0_i32_1 = arith.constant 0 : i32
    return %arg0, %c0_i32, %c0_i32_0 : i32, i32, i32
  }
}

</mosaic_0001>

<bundles_post_ra>
// kernel: distilbert_simple_forward.3
= control target key start
LH: loop header
LB: loop body
LE: loop exit
PB: predicated region body
PF: predicated region fallthrough
CT: control target
= control target key end

     0   :  { %v473_v0 = vmov 0   ;;  %v474_v2 = vmov 0.0|0.0   ;;  %vm475_vm0 = vmmov 0   ;;  %v476_v8 = vmov 0.0   ;;  %s652_s2 = inlined_call_operand.vmem [shape: f32[2,1], index: 2, kind: input, shape index: {}]   ;;  %s653_s3 = inlined_call_operand.vmem [shape: f32[128,128], index: 3, kind: input, shape index: {}]   ;;  %s654_s5 = inlined_call_operand.vmem [shape: f32[128,1], index: 5, kind: input, shape index: {}]   ;;  %s655_s1 = inlined_call_operand.vmem [shape: f32[2,64], index: 1, kind: input, shape index: {}]   ;;  %s656_s0 = inlined_call_operand.vmem [shape: f32[2,64], index: 0, kind: input, shape index: {}]   ;;  %s657_s6 = inlined_call_operand.<no memory space> [shape: f32[1,1], index: 6, kind: input, shape index: {}]   ;;  %s658_s4 = inlined_call_operand.vmem [shape: f32[1,128], index: 4, kind: input, shape index: {}]   ;;  %s659_s7 = inlined_call_operand.vmem [shape: f32[2,1], index: 7, kind: output, shape index: {}]  }
   0x1   :  { %472 = vset.pattern.permute.xlu0 %v473_v0  ;;  %v30_v1 = vld [vmem:[%s652_s2] sm:$0x3]  ;;  %420 = vmatprep.subr.bf16.mxu1 %v474_v2  ;;  %v46_v4 = vld [vmem:[%s653_s3 + $0x48] sm:$0xff]  ;;  %v47_v6 = vld [vmem:[%s653_s3 + $0x50] sm:$0xff]  ;;  %vm53_vm1 = vcmask 523264   ;;  %v12_v56 = vstv %s657_s6  ;;  %vm302_vm2 = vcmask 1024  }
   0x2   :  { %v45_v3 = vld [vmem:[%s653_s3 + $0x40] sm:$0xff]  ;;  %33 = vperm.xlu0 %472, %v30_v1   ;;  %v48_v7 = vld [vmem:[%s653_s3 + $0x58] sm:$0xff]  ;;  %444 = vmatprep.subr.bf16.mxu0 %v474_v2  ;;  %v50_v11 = vld [vmem:[%s653_s3 + $0x68] sm:$0xff]  ;;  %13 = vst [vmem:[#allocation2] sm:$0x1] %v12_v56 }
   0x3   :  { %v421_v5 = vpack.c.bf16 %v46_v4, %v45_v3  ;;  %363 = vmatprep.mubr.msk.f32.mxu1 %vm475_vm0, %v476_v8  ;;  %417 = vmatprep.mubr.msk.f32.mxu0 %vm475_vm0, %v476_v8  ;;  %v424_v9 = vpack.c.bf16 %v48_v7, %v47_v6  ;;  %v49_v10 = vld [vmem:[%s653_s3 + $0x60] sm:$0xff]  ;;  %v51_v13 = vld [vmem:[%s653_s3 + $0x70] sm:$0xff]  ;;  %v52_v14 = vld [vmem:[%s653_s3 + $0x78] sm:$0xff] }
   0x4   :  { %v427_v12 = vpack.c.bf16 %v50_v11, %v49_v10  ;;  %v430_v15 = vpack.c.bf16 %v52_v14, %v51_v13  ;;  %v209_v16 = vld [vmem:[%s654_s5] sm:$0xff]  ;;  %v210_v17 = vld [vmem:[%s654_s5 + $0x8] sm:$0xff]  ;;  %v211_v18 = vld [vmem:[%s654_s5 + $0x10] sm:$0xff] }
   0x5   :  { %422 = vmatpush3.bf16.msra.mxu1 %v421_v5  ;;  %v445_v19 = vpack.c.bf16 %v210_v17, %v209_v16  ;;  %v212_v20 = vld [vmem:[%s654_s5 + $0x18] sm:$0xff]  ;;  %v213_v22 = vld [vmem:[%s654_s5 + $0x20] sm:$0xff]  ;;  %v214_v23 = vld [vmem:[%s654_s5 + $0x28] sm:$0xff] }
   0x6   :  { %423 = vmatprep.subr.bf16.mxu1 %v474_v2  ;;  %v448_v21 = vpack.c.bf16 %v212_v20, %v211_v18  ;;  %v451_v24 = vpack.c.bf16 %v214_v23, %v213_v22  ;;  %v37_v25 = vld [vmem:[%s653_s3] sm:$0xff]  ;;  %v38_v26 = vld [vmem:[%s653_s3 + $0x8] sm:$0xff]  ;;  %v39_v31 = vld [vmem:[%s653_s3 + $0x10] sm:$0xff] }
   0x7   :  { %446 = vmatpush3.bf16.msra.mxu0 %v445_v19  ;;  %v29_v27 = vld [vmem:[%s655_s1] sm:$0x3]  ;;  %v433_v29 = vpack.c.bf16 %v38_v26, %v37_v25  ;;  %v40_v32 = vld [vmem:[%s653_s3 + $0x18] sm:$0xff]  ;;  %v42_v35 = vld [vmem:[%s653_s3 + $0x28] sm:$0xff] }
   0x8   :  { %447 = vmatprep.subr.bf16.mxu0 %v474_v2  ;;  %v436_v33 = vpack.c.bf16 %v40_v32, %v39_v31  ;;  %v41_v34 = vld [vmem:[%s653_s3 + $0x20] sm:$0xff]  ;;  %v43_v37 = vld [vmem:[%s653_s3 + $0x30] sm:$0xff]  ;;  %v44_v38 = vld [vmem:[%s653_s3 + $0x38] sm:$0xff] }
   0x9   :  { %425 = vmatpush3.bf16.msra.mxu1 %v424_v9  ;;  %v439_v36 = vpack.c.bf16 %v42_v35, %v41_v34  ;;  %v442_v39 = vpack.c.bf16 %v44_v38, %v43_v37  ;;  %v28_v40 = vld [vmem:[%s656_s0] sm:$0x3]  ;;  %v215_v41 = vld [vmem:[%s654_s5 + $0x30] sm:$0xff]  ;;  %v216_v42 = vld [vmem:[%s654_s5 + $0x38] sm:$0xff] }
   0xa   :  { %426 = vmatprep.subr.bf16.mxu1 %v474_v2  ;;  %v217_v43 = vld [vmem:[%s654_s5 + $0x40] sm:$0xff]  ;;  %v454_v44 = vpack.c.bf16 %v216_v42, %v215_v41  ;;  %v218_v45 = vld [vmem:[%s654_s5 + $0x48] sm:$0xff]  ;;  %v219_v47 = vld [vmem:[%s654_s5 + $0x50] sm:$0xff] }
   0xb   :  { %449 = vmatpush3.bf16.msra.mxu0 %v448_v21  ;;  %v457_v46 = vpack.c.bf16 %v218_v45, %v217_v43  ;;  %v220_v48 = vld [vmem:[%s654_s5 + $0x58] sm:$0xff]  ;;  %v221_v50 = vld [vmem:[%s654_s5 + $0x60] sm:$0xff]  ;;  %v222_v51 = vld [vmem:[%s654_s5 + $0x68] sm:$0xff] }
   0xc   :  { %450 = vmatprep.subr.bf16.mxu0 %v474_v2  ;;  %v460_v49 = vpack.c.bf16 %v220_v48, %v219_v47  ;;  %v463_v52 = vpack.c.bf16 %v222_v51, %v221_v50  ;;  %v223_v53 = vld [vmem:[%s654_s5 + $0x70] sm:$0xff]  ;;  %v224_v54 = vld [vmem:[%s654_s5 + $0x78] sm:$0xff]  ;;  %v310_v60 = vld [vmem:[%s658_s4] ss:$0 sm:$0xff] }
   0xd   :  { %428 = vmatpush3.bf16.msra.mxu1 %v427_v12  ;;  %v466_v55 = vpack.c.bf16 %v224_v54, %v223_v53  ;;  %v311_v1 = vld [vmem:[#allocation2] ss:$0 sm:$0xff] }
   0xe   :  { %429 = vmatprep.subr.bf16.mxu1 %v474_v2 }
   0xf   :  { %452 = vmatpush3.bf16.msra.mxu0 %v451_v24 }
  0x10   :  { %453 = vmatprep.subr.bf16.mxu0 %v474_v2 }
  0x11   :  { %431 = vmatpush3.bf16.msra.mxu1 %v430_v15 }
  0x12   :  { %432 = vmatprep.subr.bf16.mxu1 %v474_v2 }
  0x13   :  { %455 = vmatpush3.bf16.msra.mxu0 %v454_v44 }
  0x14   :  { %456 = vmatprep.subr.bf16.mxu0 %v474_v2 }
  0x17   :  { %458 = vmatpush3.bf16.msra.mxu0 %v457_v46 }
  0x18   :  { %459 = vmatprep.subr.bf16.mxu0 %v474_v2 }
  0x1b   :  { %461 = vmatpush3.bf16.msra.mxu0 %v460_v49 }
  0x1c   :  { %462 = vmatprep.subr.bf16.mxu0 %v474_v2 }
  0x1f   :  { %464 = vmatpush3.bf16.msra.mxu0 %v463_v52 }
  0x20   :  { %465 = vmatprep.subr.bf16.mxu0 %v474_v2 }
  0x23   :  { %467 = vmatpush3.bf16.msra.mxu0 %v466_v55 }
  0x81   :  { %v34_v28 = vpop.permute.xlu0 %33 }
  0x82   :  { %v36_v30 = vmul.f32 %v34_v28, %v29_v27 }
  0x84   :  { %364 = vmatmul.mubr.msk.f32.vlgmr.msra.gmra.mrb[0].mxu1 %vm53_vm1, %v36_v30 }
  0x85   :  { %434 = vmatpush3.bf16.msra.mxu1 %v433_v29  ;;  %382 = vmatprep.mubr.msk.f32.mxu1 %vm475_vm0, %v476_v8 }
  0x86   :  { %435 = vmatprep.subr.bf16.mxu1 %v474_v2 }
  0x89   :  { %437 = vmatpush3.bf16.msra.mxu1 %v436_v33 }
  0x8a   :  { %438 = vmatprep.subr.bf16.mxu1 %v474_v2 }
  0x8d   :  { %440 = vmatpush3.bf16.msra.mxu1 %v439_v36 }
  0x8e   :  { %441 = vmatprep.subr.bf16.mxu1 %v474_v2 }
  0x91   :  { %443 = vmatpush3.bf16.msra.mxu1 %v442_v39 }
  0x94   :  { %383 = vmatmul.mubr.msk.f32.vlgmr.msra.gmra.mrb[2].mxu1 %vm53_vm1, %v28_v40 }
 0x157   :  { %v123_v57 = vpop.f32.mrb[0].mxu1 }
 0x158   :  { %v365_v58 = vpop.f32.mrb[1].mxu1 }
 0x167   :  { %v196_v59 = vpop.f32.mrb[2].mxu1 }
 0x168   :  { %v197_v61 = vadd.f32 %v196_v59, %v123_v57  ;;  %v384_v62 = vpop.f32.mrb[3].mxu1 }
 0x16a   :  { %v207_v63 = vadd.f32 %v310_v60, %v197_v61 }
 0x16c   :  { %v208_v0 = vmax.f32 %v207_v63, 0.0 }
 0x16e   :  { %418 = vmatmul.mubr.f32.vlgmr.msra.gmra.mrb[0].mxu0 %v208_v0 }
 0x241   :  { %v298_v2 = vpop.f32.mrb[0].mxu0 }
 0x242   :  { %v299_v3 = vadd.f32 %v311_v1, %v298_v2  ;;  %v419_v4 = vpop.f32.mrb[1].mxu0 }
 0x244   :  { %303 = vst.msk [vmem:[%s659_s7] sm:$0x3] %vm302_vm2, %v299_v3 }

// kernel: distilbert_simple_forward.2
= control target key start
LH: loop header
LB: loop body
LE: loop exit
PB: predicated region body
PF: predicated region fallthrough
CT: control target
= control target key end

     0   :  { %s6065_s27 = smov 0   ;;  %s6707_s0 = inlined_call_operand.vmem [shape: f32[2,16,32], index: 0, kind: input, shape index: {}]   ;;  %s6708_s1 = inlined_call_operand.vmem [shape: f32[2,2,1,8], index: 1, kind: input, shape index: {}]   ;;  %s6709_s2 = inlined_call_operand.vmem [shape: f32[2,1,32], index: 2, kind: input, shape index: {}]   ;;  %s6710_s3 = inlined_call_operand.vmem [shape: f32[2,1,32], index: 3, kind: input, shape index: {}]   ;;  %s6711_s4 = inlined_call_operand.vmem [shape: f32[2,32,64], index: 4, kind: input, shape index: {}]   ;;  %s6712_s5 = inlined_call_operand.vmem [shape: f32[2,1,64], index: 5, kind: input, shape index: {}]   ;;  %s6713_s6 = inlined_call_operand.vmem [shape: f32[2,2,64,192], index: 6, kind: input, shape index: {}]   ;;  %s6714_s7 = inlined_call_operand.vmem [shape: f32[2,2,1,192], index: 7, kind: input, shape index: {}]   ;;  %s6715_s8 = inlined_call_operand.vmem [shape: f32[2,2,64,64], index: 8, kind: input, shape index: {}]   ;;  %s6716_s9 = inlined_call_operand.vmem [shape: f32[2,2,1,64], index: 9, kind: input, shape index: {}]   ;;  %s6717_s10 = inlined_call_operand.vmem [shape: f32[2,2,1,64], index: 10, kind: input, shape index: {}]   ;;  %s6718_s11 = inlined_call_operand.vmem [shape: f32[2,2,1,64], index: 11, kind: input, shape index: {}]   ;;  %s6719_s12 = inlined_call_operand.vmem [shape: f32[2,2,64,128], index: 12, kind: input, shape index: {}]   ;;  %s6720_s13 = inlined_call_operand.vmem [shape: f32[2,2,1,128], index: 13, kind: input, shape index: {}]   ;;  %s6721_s14 = inlined_call_operand.vmem [shape: f32[2,2,128,64], index: 14, kind: input, shape index: {}]   ;;  %s6722_s15 = inlined_call_operand.vmem [shape: f32[2,2,1,64], index: 15, kind: input, shape index: {}]   ;;  %s6723_s16 = inlined_call_operand.vmem [shape: f32[2,2,1,64], index: 16, kind: input, shape index: {}]   ;;  %s6724_s17 = inlined_call_operand.vmem [shape: f32[2,2,1,64], index: 17, kind: input, shape index: {}]   ;;  %s6725_s18 = inlined_call_operand.vmem [shape: f32[2,2,64], index: 18, kind: output, shape index: {}]  }
   0x1   :  { %6741 = sst [smem:[#allocation2_spill]] %s6707_s0 }
   0x2   :  { %6742 = sst [smem:[#allocation3_spill]] %s6708_s1 }
   0x3   :  { %6743 = sst [smem:[#allocation4_spill]] %s6709_s2 }
   0x4   :  { %6744 = sst [smem:[#allocation5_spill]] %s6710_s3 }
   0x5   :  { %6745 = sst [smem:[#allocation6_spill]] %s6711_s4 }
   0x6   :  { %6746 = sst [smem:[#allocation7_spill]] %s6712_s5 }
   0x7   :  { %6747 = sst [smem:[#allocation8_spill]] %s6713_s6 }
   0x8   :  { %6748 = sst [smem:[#allocation9_spill]] %s6714_s7 }
   0x9 LB: > { %s5038_s28 = sadd.s32 4294967295, %s5959_s27   ;;  %p5042_p0 = scmp.ge.s32.totalorder %s5959_s27, 1  ;;  %s5959_s27 = sphi %s6065_s27, %s28_s27  }
   0xa   : > { %p667_p1 = scmp.lt.s32.totalorder %s5959_s27, 3 }
   0xc   : > { %p668_p2 = pnand %p5042_p0, %p667_p1 }
   0xd   : > { %p790_p3 = scmp.lt.s32.totalorder (!%p668_p2), %s5038_s28, 1  ;;  %vm873_vm0 = vcmask (!%p668_p2), 261120   ;;  %s6749_s19 = sld [smem:[#allocation2_spill]] (!%p668_p2)  ;;  %v5961_v60 = vmov (!%p668_p2), 0.0   ;;  %vm1037_vm1 = vcmask (!%p668_p2), 523264   ;;  %vm5962_vm2 = vmmov (!%p668_p2), 0  }
   0xe   : > { %671 = sbr.rel (%p668_p2) target bundleno = 6792 (0x1a88), region = 92  ;;  %s6750_s4 = sld [smem:[#allocation6_spill]] (!%p668_p2)  ;;  %1108 = vmatprep.mubr.f32.mxu1 (!%p668_p2), %v5961_v60  ;;  %vm1125_vm3 = vcmask (!%p668_p2), 130048   ;;  %vm1208_vm4 = vcmask (!%p668_p2), 64512   ;;  %vm1809_vm5 = vcmask (!%p668_p2), 392192   ;;  %vm4786_vm6 = vcmask (!%p668_p2), 1040384  }
   0xf   : > { %s6751_s6 = sld [smem:[#allocation8_spill]] (!%p668_p2)  ;;  %s6752_s0 = sld [smem:[#allocation4_spill]] (!%p668_p2)  ;;  %vm4788_vm7 = vcmask (!%p668_p2), 517120  }
  0x10   : > { %s6753_s3 = sld [smem:[#allocation5_spill]] (!%p668_p2)  ;;  %s6754_s5 = sld [smem:[#allocation7_spill]] (!%p668_p2) }
  0x11   : > { %s6755_s7 = sld [smem:[#allocation9_spill]] (!%p668_p2)  ;;  %s6737_s22 = smov (!%p668_p2), 48  }
  0x15   : > { %s6766_s28 = smov (!%p790_p3, %s5038_s28), 1 }
  0x16   : > { %s5205_s29 = sshll.u32 %s6766_s28, 4  ;;  %s5206_s20 = sshll.u32 %s6766_s28, 5 }
  0x17   : > { %s794_s1 = scalar_lea.vmem %s6749_s19, %s5205_s29  ;;  %s809_s2 = scalar_lea.vmem %s6750_s4, %s5206_s20 }
  0x18   : > { %v869_v0 = vld [vmem:[%s794_s1] sm:$0xff]  ;;  %v870_v1 = vld [vmem:[%s794_s1 + $0x8] sm:$0xff]  ;;  %v919_v16 = vld [vmem:[%s809_s2 + $0x10] sm:$0xff]  ;;  %s6726_s23 = sshll.u32 %s6766_s28, 8  ;;  %s801_s19 = scalar_lea.vmem %s6752_s0, %s6766_s28 }
  0x19   : > { %v874_v2 = vsel %vm873_vm0, %v869_v0, 0.0  ;;  %v877_v3 = vsel %vm873_vm0, %v870_v1, 0.0  ;;  %v917_v14 = vld [vmem:[%s809_s2] sm:$0xff]  ;;  %v918_v15 = vld [vmem:[%s809_s2 + $0x8] sm:$0xff]  ;;  %v920_v18 = vld [vmem:[%s809_s2 + $0x18] sm:$0xff]  ;;  %s6093_s26 = scalar_lea.vmem %s6751_s6, %s6726_s23  ;;  %s804_s21 = scalar_lea.vmem %s6753_s3, %s6766_s28 }
  0x1a   : > { %875 = vadd.xlane.f32.xlu0 %v874_v2  ;;  %v5674_v17 = vpack.c.bf16 %v918_v15, %v917_v14  ;;  %v5678_v19 = vpack.c.bf16 %v920_v18, %v919_v16  ;;  %v1010_v20 = vld [vmem:[%s6093_s26 + $0x8] sm:$0xff]  ;;  %v1012_v21 = vld [vmem:[%s6093_s26 + $0x18] sm:$0xff]  ;;  %v1009_v22 = vld [vmem:[%s6093_s26] sm:$0xff]  ;;  %s812_s24 = scalar_lea.vmem %s6754_s5, %s6766_s28  ;;  %v1027_v2 = vlaneseq  ;;  %s5050_s25 = sshll.u32 %s6766_s28, 2 }
  0x1b   : > { %v5682_v23 = vpack.c.bf16 %v1012_v21, %v1010_v20  ;;  %v1011_v24 = vld [vmem:[%s6093_s26 + $0x10] sm:$0xff]  ;;  %v1014_v25 = vld [vmem:[%s6093_s26 + $0x28] sm:$0xff]  ;;  %v1016_v26 = vld [vmem:[%s6093_s26 + $0x38] sm:$0xff]  ;;  %s6143_s0 = scalar_lea.vmem %s6755_s7, %s5050_s25  ;;  %s6731_s1 = smov 112  }
  0x1c   : > { %5675 = vmatprep.subr.bf16.mxu0 %v5674_v17  ;;  %v5684_v27 = vpack.c.bf16 %v1011_v24, %v1009_v22  ;;  %v5686_v28 = vpack.c.bf16 %v1016_v26, %v1014_v25  ;;  %v1013_v29 = vld [vmem:[%s6093_s26 + $0x20] sm:$0xff]  ;;  %v1015_v30 = vld [vmem:[%s6093_s26 + $0x30] sm:$0xff]  ;;  %v1018_v31 = vld [vmem:[%s6093_s26 + $0x48] sm:$0xff]  ;;  %s6729_s20 = smov 96   ;;  %s6735_s2 = smov 32  }
  0x1d   : > { %5677 = vmatpush3.bf16.msra.mxu0 %v5674_v17  ;;  %5683 = vmatprep.subr.bf16.mxu1 %v5682_v23  ;;  %v1020_v32 = vld [vmem:[%s6093_s26 + $0x58] sm:$0xff]  ;;  %v5688_v33 = vpack.c.bf16 %v1015_v30, %v1013_v29  ;;  %v1017_v35 = vld [vmem:[%s6093_s26 + $0x40] sm:$0xff]  ;;  %v1019_v36 = vld [vmem:[%s6093_s26 + $0x50] sm:$0xff]  ;;  %s6180_s25 = sshll.u32 %s6766_s28, 1  ;;  %s6756_s23 = sld [smem:[#allocation3_spill]] }
  0x1e   : > { %878 = vadd.xlane.f32.xlu0 %v877_v3  ;;  %5679 = vmatprep.subr.bf16.mxu0 %v5678_v19  ;;  %v5690_v34 = vpack.c.bf16 %v1020_v32, %v1018_v31  ;;  %v5692_v37 = vpack.c.bf16 %v1019_v36, %v1017_v35  ;;  %v5065_v45 = vld [vmem:[%s801_s19] ss:$0 sm:$0xff]  ;;  %v1022_v54 = vld [vmem:[%s6093_s26 + $0x68] sm:$0xff]  ;;  %v1024_v55 = vld [vmem:[%s6093_s26 + $0x78] sm:$0xff]  ;;  %v6138_v3 = vshrl.u32 %v1027_v2, 7  ;;  %s6739_s19 = smov 64   ;;  %s6383_s30 = scalar_lea.vmem %s6717_s10, %s6180_s25 }
  0x1f   : > { %5685 = vmatpush1.bf16.msra.mxu1 %v5684_v27  ;;  %v5066_v47 = vld [vmem:[%s804_s21] ss:$0 sm:$0xff]  ;;  %v5694_v56 = vpack.c.bf16 %v1024_v55, %v1022_v54  ;;  %v1023_v58 = vld [vmem:[%s6093_s26 + $0x70] sm:$0xff]  ;;  %s6727_s21 = smov 80   ;;  %s5208_s29 = sshll.u32 %s6766_s28, 7 }
  0x20   : > { %5687 = vmatprep.subr.bf16.mxu1 %v5686_v28  ;;  %v1021_v57 = vld [vmem:[%s6093_s26 + $0x60] sm:$0xff]  ;;  %s6389_s3 = scalar_lea.vmem %s6718_s11, %s6180_s25  ;;  %s6468_s4 = scalar_lea.vmem %s6723_s16, %s6180_s25 }
  0x21   : > { %5681 = vmatpush3.bf16.msra.mxu0 %v5678_v19  ;;  %v5696_v59 = vpack.c.bf16 %v1023_v58, %v1021_v57  ;;  %v5067_v61 = vld [vmem:[%s812_s24] ss:$0 sm:$0xff]  ;;  %s6733_s24 = smov 16   ;;  %s6474_s6 = scalar_lea.vmem %s6724_s17, %s6180_s25 }
  0x22   : > { %5368 = vmatprep.subr.mxu0 %v5961_v60  ;;  %s6759_s5 = smov 64   ;;  %s6764_s7 = smov 16  }
  0x23   : > { %5689 = vmatpush1.bf16.msra.mxu1 %v5688_v33 }
  0x24   : > { %5691 = vmatprep.subr.bf16.mxu1 %v5690_v34 }
  0x27   : > { %5693 = vmatpush1.bf16.msra.mxu1 %v5692_v37 }
  0x28   : > { %5695 = vmatprep.subr.bf16.mxu1 %v5694_v56 }
  0x2b   : > { %5697 = vmatpush1.bf16.msra.mxu1 %v5696_v59 }
  0x2c   : > { %5388 = vmatprep.subr.mxu1 %v5961_v60 }
  0xa7   : > { %v876_v4 = vpop.xlane.xlu0 %875 }
  0xa8   : > { %v881_v5 = vmul.f32 0.03125, %v876_v4  ;;  %v1029_v4 = vsub.s32 0, %v6138_v3 }
  0xaa   : > { %v883_v6 = vsub.f32 %v869_v0, %v881_v5  ;;  %v1025_v5 = vld [vmem:[%s6143_s0] sm:$0x3] }
  0xab   : > { %v879_v7 = vpop.xlane.xlu0 %878 }
  0xac   : > { %v882_v8 = vmul.f32 0.03125, %v879_v7  ;;  %v885_v9 = vmul.f32 %v883_v6, %v883_v6 }
  0xae   : > { %v884_v10 = vsub.f32 %v870_v1, %v882_v8  ;;  %v887_v11 = vsel %vm873_vm0, %v885_v9, 0.0  ;;  %v1033_v8 = vsub.s32 1, %v6138_v3 }
  0xaf   : > { %888 = vadd.xlane.f32.xlu1 %v887_v11 }
  0xb0   : > { %v886_v12 = vmul.f32 %v884_v10, %v884_v10  ;;  %v1034_v11 = vrot.slane %v1025_v5, %v1033_v8 }
  0xb2   : > { %v890_v13 = vsel %vm873_vm0, %v886_v12, 0.0 }
  0xb3   : > { %891 = vadd.xlane.f32.xlu1 %v890_v13 }
 0x13c   : > { %v889_v38 = vpop.xlane.xlu1 %888 }
 0x13d   : > { %v893_v39 = vmul.f32 0.03125, %v889_v38 }
 0x13f   : > { %v895_v40 = vadd.f32 1e-12, %v893_v39 }
 0x140   : > { %v892_v41 = vpop.xlane.xlu1 %891 }
 0x141   : > { %5859 = vrsqrt.f32 %v895_v40  ;;  %v894_v42 = vmul.f32 0.03125, %v892_v41 }
 0x143   : > { %v896_v43 = vadd.f32 1e-12, %v894_v42 }
 0x145   : > { %5861 = vrsqrt.f32 %v896_v43 }
 0x14b   : > { %v5860_v44 = vpop.eup %5859 }
 0x14c   : > { %v899_v46 = vmul.f32 %v5860_v44, %v883_v6  ;;  %v1030_v6 = vrot.slane %v1025_v5, %v1029_v4 }
 0x14e   : > { %v907_v48 = vmul.f32 %v5065_v45, %v899_v46 }
 0x14f   : > { %v5862_v49 = vpop.eup %5861 }
 0x150   : > { %v900_v50 = vmul.f32 %v5862_v49, %v884_v10  ;;  %v915_v51 = vadd.f32 %v5066_v47, %v907_v48 }
 0x152   : > { %v908_v52 = vmul.f32 %v5065_v45, %v900_v50  ;;  %5365 = vmatprep.mubr.msk.f32.mxu0 %vm873_vm0, %v915_v51 }
 0x154   : > { %v916_v53 = vadd.f32 %v5066_v47, %v908_v52 }
 0x156   : > { %5366 = vmatmul.mubr.msk.f32.vlgmr.msra.gmra.mrb[0].mxu0 %vm873_vm0, %v916_v53 }
 0x157   : > { %5370 = vmatprep.mubr.msk.f32.mxu0 %vm5962_vm2, %v5961_v60 }
 0x229   : > { %v5367_v62 = vpop.f32.mrb[0].mxu0 }
 0x22a   : > { %v1000_v63 = vpop.f32.mrb[1].mxu0  ;;  %v6133_v1 = vadd.f32 %v5367_v62, %v5067_v61 }
 0x22b   : > { %v6128_v0 = vadd.f32 %v5067_v61, %v1000_v63 }
 0x22d   : > { %5070 = vmatmul.mubr.msk.f32.vlgmr.msra.gmra.mrb[0].mxu1 %vm1037_vm1, %v6128_v0 }
 0x22e   : > { %1114 = vmatprep.mubr.f32.mxu1 %v5961_v60 }
 0x231   : > { %5071 = vmatmul.mubr.msk.f32.gmra.mrb[2].mxu1 %vm1037_vm1, %v6133_v1 }
 0x232   : > { %5390 = vmatprep.mubr.msk.f32.mxu1 %vm5962_vm2, %v5961_v60 }
 0x300   : > { %v1110_v7 = vpop.f32.mrb[0].mxu1 }
 0x301   : > { %v1111_v9 = vadd.f32 %v1110_v7, %v1030_v6  ;;  %v1112_v10 = vpop.f32.mrb[1].mxu1 }
 0x302   : > { %v6172_v17 = vadd.f32 %v1112_v10, %v1034_v11 }
 0x303   : > { %1123 = vrot.lane.b32.xlu0 %v1111_v9, %s6739_s19 }
 0x304   : > { %v1116_v12 = vpop.f32.mrb[2].mxu1 }
 0x305   : > { %v1118_v13 = vpop.f32.mrb[3].mxu1  ;;  %v6162_v15 = vadd.f32 %v1116_v12, %v1030_v6 }
 0x306   : > { %v6157_v14 = vadd.f32 %v1118_v13, %v1034_v11 }
 0x307   : > { %1293 = vrot.lane.b32.xlu0 %v1111_v9, %s6731_s1 }
 0x30b   : > { %1461 = vrot.lane.b32.xlu0 %v1111_v9, %s6729_s20 }
 0x30f   : > { %1628 = vrot.lane.b32.xlu0 %v1111_v9, %s6727_s21  ;;  %s6186_s21 = scalar_lea.vmem %s6756_s23, %s6180_s25  ;;  %s6757_s23 = smov 80  }
 0x310   : > { %v6189_v19 = vld [vmem:[%s6186_s21] ss:$0 sm:$0xff]  ;;  %v5088_v10 = vld [vmem:[%s6186_s21 + $0x1] ss:$0 sm:$0xff] }
 0x313   : > { %1984 = vrot.lane.b32.xlu0 %v6162_v15, %s6737_s22 }
 0x317   : > { %2152 = vrot.lane.b32.xlu0 %v6162_v15, %s6735_s2 }
 0x31b   : > { %2319 = vrot.lane.b32.xlu0 %v6162_v15, %s6733_s24 }
 0x375   : > { %v1124_v16 = vpop.permute.xlu0 %1123 }
 0x376   : > { %5369 = vmatpush3.xpose.msk.msra.mxu0 %vm1125_vm3, %v1124_v16 }
 0x377   : > { %5373 = vmatprep.subr.mxu0 %v5961_v60 }
 0x379   : > { %5371 = vmatmul.mubr.msk.f32.vlgmr.msra.gmra.mrb[2].mxu0 %vm1125_vm3, %v1111_v9  ;;  %v1294_v28 = vpop.permute.xlu0 %1293 }
 0x37a   : > { %5374 = vmatpush3.msra.mxu0 %v6172_v17  ;;  %5375 = vmatprep.mubr.msk.f32.mxu0 %vm5962_vm2, %v5961_v60 }
 0x37b   : > { %5378 = vmatprep.subr.mxu0 %v5961_v60 }
 0x37d   : > { %v1462_v30 = vpop.permute.xlu0 %1461 }
 0x381   : > { %v1629_v34 = vpop.permute.xlu0 %1628 }
 0x385   : > { %v1985_v36 = vpop.permute.xlu0 %1984 }
 0x389   : > { %v2153_v41 = vpop.permute.xlu0 %2152 }
 0x38d   : > { %v2320_v43 = vpop.permute.xlu0 %2319 }
 0x44c   : > { %v1196_v18 = vpop.f32.mrb[2].mxu0 }
 0x44d   : > { %v1200_v20 = vmul.f32 0.25, %v1196_v18  ;;  %v5372_v21 = vpop.f32.mrb[3].mxu0 }
 0x44f   : > { %v1207_v22 = vadd.f32 %v6189_v19, %v1200_v20 }
 0x451   : > { %v1209_v23 = vsel %vm1208_vm4, %v1207_v22, -inf }
 0x452   : > { %1210 = vmax.xlane.f32.xlu1 %v1209_v23 }
 0x463   : > { %1295 = vrot.lane.b32.xlu1 %v1111_v9, %s6737_s22 }
 0x467   : > { %1463 = vrot.lane.b32.xlu1 %v1111_v9, %s6735_s2 }
 0x4df   : > { %v1211_v24 = vpop.xlane.xlu1 %1210 }
 0x4e0   : > { %v1212_v25 = vsub.f32 %v1207_v22, %v1211_v24 }
 0x4e2   : > { %v1213_v26 = vmul.f32 1.442695, %v1212_v25 }
 0x4e3   : > { %v1296_v27 = vpop.permute.xlu1 %1295 }
 0x4e4   : > { %5863 = vpow2.f32 %v1213_v26 }
 0x4e7   : > { %v1464_v29 = vpop.permute.xlu1 %1463 }
 0x4e8   : > { %5389 = vmatpush3.xpose.msk.msra.mxu1 %vm1125_vm3, %v1464_v29 }
 0x4e9   : > { %5398 = vmatprep.subr.mxu1 %v5961_v60 }
 0x4eb   : > { %5391 = vmatmul.mubr.msk.f32.vlgmr.msra.gmra.mrb[4].mxu1 %vm1125_vm3, %v1462_v30 }
 0x4ec   : > { %5400 = vmatprep.mubr.msk.f32.mxu1 %vm5962_vm2, %v5961_v60 }
 0x4ee   : > { %v5864_v31 = vpop.eup %5863 }
 0x4ef   : > { %v1215_v32 = vsel %vm1208_vm4, %v5864_v31, 0.0 }
 0x4f0   : > { %1216 = vadd.xlane.f32.xlu1 %v1215_v32 }
 0x501   : > { %1630 = vrot.lane.b32.xlu1 %v1111_v9, %s6733_s24 }
 0x505   : > { %1814 = vrot.lane.b32.xlu1 %v6162_v15, %s6739_s19  ;;  %s6758_s19 = sshll.u32 %s6766_s28, 8  ;;  %s6761_s28 = smov 96  }
 0x509   : > { %1982 = vrot.lane.b32.xlu1 %v6162_v15, %s6731_s1 }
 0x50d   : > { %2150 = vrot.lane.b32.xlu1 %v6162_v15, %s6729_s20 }
 0x511   : > { %2317 = vrot.lane.b32.xlu1 %v6162_v15, %s6757_s23 }
 0x57d   : > { %v1217_v33 = vpop.xlane.xlu1 %1216 }
 0x57e   : > { %5865 = vrcp.f32 %v1217_v33 }
 0x581   : > { %v1631_v35 = vpop.permute.xlu1 %1630 }
 0x582   : > { %5399 = vmatpush3.xpose.msk.msra.mxu1 %vm1125_vm3, %v1631_v35 }
 0x583   : > { %5408 = vmatprep.subr.mxu1 %v5961_v60 }
 0x585   : > { %v1815_v37 = vpop.permute.xlu1 %1814  ;;  %5401 = vmatmul.mubr.msk.f32.vlgmr.msra.gmra.mrb[6].mxu1 %vm1125_vm3, %v1629_v34 }
 0x586   : > { %5409 = vmatpush3.xpose.msk.msra.mxu1 %vm1125_vm3, %v1815_v37  ;;  %5410 = vmatprep.mubr.msk.f32.mxu1 %vm5962_vm2, %v5961_v60 }
 0x587   : > { %5418 = vmatprep.subr.mxu1 %v5961_v60 }
 0x588   : > { %v5866_v38 = vpop.eup %5865 }
 0x589   : > { %v1219_v39 = vmul.f32 %v5866_v38, %v5864_v31  ;;  %v1983_v40 = vpop.permute.xlu1 %1982  ;;  %5411 = vmatmul.mubr.msk.f32.vlgmr.msra.gmra.mrb[8].mxu1 %vm1125_vm3, %v6162_v15 }
 0x58a   : > { %5419 = vmatpush3.xpose.msk.msra.mxu1 %vm1125_vm3, %v1985_v36  ;;  %5420 = vmatprep.mubr.msk.f32.mxu1 %vm5962_vm2, %v5961_v60 }
 0x58b   : > { %5376 = vmatmul.mubr.msk.f32.vlgmr.msra.gmra.mrb[4].mxu0 %vm1208_vm4, %v1219_v39  ;;  %5428 = vmatprep.subr.mxu1 %v5961_v60 }
 0x58c   : > { %5379 = vmatpush3.xpose.msk.msra.mxu0 %vm1125_vm3, %v1296_v27  ;;  %5380 = vmatprep.mubr.msk.f32.mxu0 %vm5962_vm2, %v5961_v60 }
 0x58d   : > { %5421 = vmatmul.mubr.msk.f32.vlgmr.msra.gmra.mrb[10].mxu1 %vm1125_vm3, %v1983_v40  ;;  %5383 = vmatprep.subr.mxu0 %v5961_v60  ;;  %v2151_v42 = vpop.permute.xlu1 %2150 }
 0x58e   : > { %5429 = vmatpush3.xpose.msk.msra.mxu1 %vm1125_vm3, %v2153_v41  ;;  %5430 = vmatprep.mubr.msk.f32.mxu1 %vm5962_vm2, %v5961_v60 }
 0x58f   : > { %5381 = vmatmul.mubr.msk.f32.vlgmr.msra.gmra.mrb[6].mxu0 %vm1125_vm3, %v1294_v28  ;;  %5438 = vmatprep.subr.mxu1 %v5961_v60 }
 0x590   : > { %5385 = vmatprep.mubr.msk.f32.mxu0 %vm5962_vm2, %v5961_v60 }
 0x591   : > { %5431 = vmatmul.mubr.msk.f32.vlgmr.msra.gmra.mrb[12].mxu1 %vm1125_vm3, %v2151_v42  ;;  %v2318_v44 = vpop.permute.xlu1 %2317 }
 0x592   : > { %5439 = vmatpush3.xpose.msk.msra.mxu1 %vm1125_vm3, %v2320_v43  ;;  %5440 = vmatprep.mubr.msk.f32.mxu1 %vm5962_vm2, %v5961_v60 }
 0x595   : > { %5441 = vmatmul.mubr.msk.f32.vlgmr.msra.gmra.mrb[14].mxu1 %vm1125_vm3, %v2318_v44 }
 0x5be   : > { %v1535_v45 = vpop.f32.mrb[4].mxu1 }
 0x5bf   : > { %v1539_v46 = vmul.f32 0.25, %v1535_v45  ;;  %v5392_v47 = vpop.f32.mrb[5].mxu1 }
 0x5c1   : > { %v1540_v48 = vadd.f32 %v6189_v19, %v1539_v46 }
 0x5c3   : > { %v1541_v49 = vsel %vm1208_vm4, %v1540_v48, -inf }
 0x5c4   : > { %1542 = vmax.xlane.f32.xlu1 %v1541_v49 }
 0x651   : > { %v1543_v59 = vpop.xlane.xlu1 %1542 }
 0x652   : > { %v1544_v9 = vsub.f32 %v1540_v48, %v1543_v59 }
 0x654   : > { %v1545_v21 = vmul.f32 1.442695, %v1544_v9 }
 0x656   : > { %5867 = vpow2.f32 %v1545_v21 }
 0x658   : > { %v1702_v50 = vpop.f32.mrb[6].mxu1 }
 0x659   : > { %v5402_v51 = vpop.f32.mrb[7].mxu1  ;;  %v1706_v61 = vmul.f32 0.25, %v1702_v50 }
 0x65b   : > { %v1707_v15 = vadd.f32 %v6189_v19, %v1706_v61 }
 0x65c   : > { %v1886_v52 = vpop.f32.mrb[8].mxu1 }
 0x65d   : > { %v5412_v53 = vpop.f32.mrb[9].mxu1  ;;  %v1890_v11 = vmul.f32 0.25, %v1886_v52  ;;  %v1708_v23 = vsel %vm1208_vm4, %v1707_v15, -inf }
 0x65e   : > { %v6243_v54 = vpop.f32.mrb[4].mxu0 }
 0x65f   : > { %v5377_v55 = vpop.f32.mrb[5].mxu0  ;;  %v1897_v24 = vadd.f32 %v5088_v10, %v1890_v11 }
 0x660   : > { %v2056_v56 = vpop.f32.mrb[10].mxu1  ;;  %v6257_v30 = vpop.eup %5867 }
 0x661   : > { %v5422_v57 = vpop.f32.mrb[11].mxu1  ;;  %v2060_v22 = vmul.f32 0.25, %v2056_v56  ;;  %v1898_v26 = vsel %vm1208_vm4, %v1897_v24, -inf  ;;  %v1547_v31 = vsel %vm1208_vm4, %v6257_v30, 0.0 }
 0x662   : > { %v1367_v58 = vpop.f32.mrb[6].mxu0 }
 0x663   : > { %v1371_v62 = vmul.f32 0.25, %v1367_v58  ;;  %v5382_v63 = vpop.f32.mrb[7].mxu0  ;;  %v2061_v27 = vadd.f32 %v5088_v10, %v2060_v22 }
 0x664   : > { %v2224_v2 = vpop.f32.mrb[12].mxu1 }
 0x665   : > { %v2228_v5 = vmul.f32 0.25, %v2224_v2  ;;  %v5432_v6 = vpop.f32.mrb[13].mxu1  ;;  %v6246_v7 = vadd.f32 %v6189_v19, %v1371_v62  ;;  %v2062_v19 = vsel %vm1208_vm4, %v2061_v27, -inf }
 0x667   : > { %v1373_v12 = vsel %vm1208_vm4, %v6246_v7, -inf  ;;  %v2229_v13 = vadd.f32 %v5088_v10, %v2228_v5 }
 0x668   : > { %1374 = vmax.xlane.f32.xlu0 %v1373_v12  ;;  %v2391_v16 = vpop.f32.mrb[14].mxu1 }
 0x669   : > { %v5442_v18 = vpop.f32.mrb[15].mxu1  ;;  %v2230_v20 = vsel %vm1208_vm4, %v2229_v13, -inf  ;;  %v2395_v25 = vmul.f32 0.25, %v2391_v16 }
 0x66a   : > { %2231 = vmax.xlane.f32.xlu1 %v2230_v20 }
 0x66b   : > { %v2396_v28 = vadd.f32 %v5088_v10, %v2395_v25 }
 0x66c   : > { %1709 = vmax.xlane.f32.xlu0 %v1708_v23 }
 0x66d   : > { %v2397_v29 = vsel %vm1208_vm4, %v2396_v28, -inf }
 0x670   : > { %1899 = vmax.xlane.f32.xlu0 %v1898_v26 }
 0x674   : > { %2063 = vmax.xlane.f32.xlu0 %v2062_v19 }
 0x678   : > { %2398 = vmax.xlane.f32.xlu0 %v2397_v29 }
 0x67c   : > { %1548 = vadd.xlane.f32.xlu0 %v1547_v31 }
 0x6f5   : > { %v1375_v32 = vpop.xlane.xlu0 %1374 }
 0x6f6   : > { %v1376_v59 = vsub.f32 %v6246_v7, %v1375_v32 }
 0x6f7   : > { %v2232_v33 = vpop.xlane.xlu1 %2231 }
 0x6f8   : > { %v2233_v36 = vsub.f32 %v2229_v13, %v2232_v33  ;;  %v1377_v61 = vmul.f32 1.442695, %v1376_v59 }
 0x6f9   : > { %v1710_v34 = vpop.xlane.xlu0 %1709 }
 0x6fa   : > { %v1711_v35 = vsub.f32 %v1707_v15, %v1710_v34  ;;  %v2234_v40 = vmul.f32 1.442695, %v2233_v36 }
 0x6fc   : > { %v1712_v37 = vmul.f32 1.442695, %v1711_v35 }
 0x6fd   : > { %v1900_v38 = vpop.xlane.xlu0 %1899 }
 0x6fe   : > { %5869 = vpow2.f32 %v1712_v37  ;;  %v1901_v39 = vsub.f32 %v1897_v24, %v1900_v38 }
 0x700   : > { %v1902_v41 = vmul.f32 1.442695, %v1901_v39 }
 0x701   : > { %v2064_v42 = vpop.xlane.xlu0 %2063 }
 0x702   : > { %5871 = vpow2.f32 %v1902_v41  ;;  %v2065_v43 = vsub.f32 %v2061_v27, %v2064_v42 }
 0x703   : > { %5873 = vpow2.f32 %v2234_v40 }
 0x704   : > { %v2066_v44 = vmul.f32 1.442695, %v2065_v43 }
 0x705   : > { %v2399_v45 = vpop.xlane.xlu0 %2398 }
 0x706   : > { %5875 = vpow2.f32 %v2066_v44  ;;  %v2400_v46 = vsub.f32 %v2396_v28, %v2399_v45 }
 0x708   : > { %v5870_v47 = vpop.eup %5869  ;;  %v2401_v48 = vmul.f32 1.442695, %v2400_v46 }
 0x709   : > { %v1714_v49 = vsel %vm1208_vm4, %v5870_v47, 0.0  ;;  %v1549_v2 = vpop.xlane.xlu0 %1548 }
 0x70a   : > { %5877 = vpow2.f32 %v2401_v48  ;;  %1715 = vadd.xlane.f32.xlu1 %v1714_v49 }
 0x70b   : > { %5879 = vpow2.f32 %v1377_v61 }
 0x70c   : > { %v5872_v50 = vpop.eup %5871 }
 0x70d   : > { %v1904_v51 = vsel %vm1208_vm4, %v5872_v50, 0.0  ;;  %v6263_v52 = vpop.eup %5873 }
 0x70e   : > { %1905 = vadd.xlane.f32.xlu0 %v1904_v51  ;;  %v2236_v55 = vsel %vm1208_vm4, %v6263_v52, 0.0 }
 0x710   : > { %v6265_v53 = vpop.eup %5875 }
 0x711   : > { %v2068_v56 = vsel %vm1208_vm4, %v6265_v53, 0.0 }
 0x712   : > { %2237 = vadd.xlane.f32.xlu0 %v2236_v55  ;;  %2069 = vadd.xlane.f32.xlu1 %v2068_v56 }
 0x714   : > { %v6271_v57 = vpop.eup %5877 }
 0x715   : > { %v2403_v58 = vsel %vm1208_vm4, %v6271_v57, 0.0  ;;  %v5880_v62 = vpop.eup %5879 }
 0x716   : > { %2404 = vadd.xlane.f32.xlu1 %v2403_v58  ;;  %v1379_v63 = vsel %vm1208_vm4, %v5880_v62, 0.0 }
 0x727   : > { %1552 = vrot.lane.b32.xlu1 %v6172_v17, %s6729_s20 }
 0x728   : > { %1385 = vrot.lane.b32.xlu0 %v6172_v17, %s6731_s1 }
 0x72c   : > { %2241 = vrot.lane.b32.xlu0 %v6157_v14, %s6729_s20  ;;  %s6406_s20 = scalar_lea.vmem %s6721_s14, %s6758_s19  ;;  %s6438_s19 = scalar_lea.vmem %s6722_s15, %s6180_s25 }
 0x74b   : > { %1380 = vadd.xlane.f32.xlu1 %v1379_v63 }
 0x75c   : > { %1719 = vrot.lane.b32.xlu1 %v6172_v17, %s6757_s23 }
 0x760   : > { %2074 = vrot.lane.b32.xlu1 %v6157_v14, %s6731_s1  ;;  %s6326_s1 = scalar_lea.vmem %s6715_s8, %s5208_s29 }
 0x761   : > { %v2499_v32 = vld [vmem:[%s6326_s1] sm:$0xff]  ;;  %v2500_v33 = vld [vmem:[%s6326_s1 + $0x8] sm:$0xff]  ;;  %v2501_v35 = vld [vmem:[%s6326_s1 + $0x10] sm:$0xff] }
 0x762   : > { %v5698_v34 = vpack.c.bf16 %v2500_v33, %v2499_v32  ;;  %v2502_v36 = vld [vmem:[%s6326_s1 + $0x18] sm:$0xff]  ;;  %v2503_v40 = vld [vmem:[%s6326_s1 + $0x20] sm:$0xff]  ;;  %v2504_v41 = vld [vmem:[%s6326_s1 + $0x28] sm:$0xff] }
 0x763   : > { %v5702_v37 = vpack.c.bf16 %v2502_v36, %v2501_v35  ;;  %v5706_v43 = vpack.c.bf16 %v2504_v41, %v2503_v40  ;;  %v2505_v45 = vld [vmem:[%s6326_s1 + $0x30] sm:$0xff]  ;;  %v2506_v46 = vld [vmem:[%s6326_s1 + $0x38] sm:$0xff] }
 0x764   : > { %2408 = vrot.lane.b32.xlu1 %v6157_v14, %s6757_s23  ;;  %5699 = vmatprep.subr.bf16.mxu1 %v5698_v34  ;;  %v5710_v48 = vpack.c.bf16 %v2506_v46, %v2505_v45 }
 0x765   : > { %5701 = vmatpush3.bf16.msra.mxu1 %v5698_v34 }
 0x766   : > { %5703 = vmatprep.subr.bf16.mxu1 %v5702_v37 }
 0x769   : > { %5705 = vmatpush3.bf16.msra.mxu1 %v5702_v37 }
 0x76a   : > { %5707 = vmatprep.subr.bf16.mxu1 %v5706_v43 }
 0x76d   : > { %5709 = vmatpush3.bf16.msra.mxu1 %v5706_v43 }
 0x76e   : > { %5711 = vmatprep.subr.bf16.mxu1 %v5710_v48 }
 0x771   : > { %5713 = vmatpush3.bf16.msra.mxu1 %v5710_v48  ;;  %v5102_v48 = vld [vmem:[%s6383_s30] ss:$0 sm:$0xff] }
 0x797   : > { %v1716_v7 = vpop.xlane.xlu1 %1715 }
 0x79b   : > { %v1906_v5 = vpop.xlane.xlu0 %1905 }
 0x79f   : > { %v2238_v6 = vpop.xlane.xlu0 %2237  ;;  %v2070_v10 = vpop.xlane.xlu1 %2069 }
 0x7a3   : > { %v1386_v9 = vpop.permute.xlu0 %1385  ;;  %v2405_v11 = vpop.xlane.xlu1 %2404 }
 0x7a4   : > { %5384 = vmatpush3.msra.mxu0 %v1386_v9 }
 0x7a5   : > { %5393 = vmatprep.subr.mxu0 %v5961_v60 }
 0x7a7   : > { %v1553_v12 = vpop.permute.xlu1 %1552  ;;  %v2242_v19 = vpop.permute.xlu0 %2241 }
 0x7d8   : > { %v1381_v13 = vpop.xlane.xlu1 %1380 }
 0x7d9   : > { %5881 = vrcp.f32 %v1381_v13 }
 0x7da   : > { %5883 = vrcp.f32 %v1549_v2 }
 0x7db   : > { %5885 = vrcp.f32 %v1716_v7 }
 0x7dc   : > { %5887 = vrcp.f32 %v1906_v5  ;;  %v1720_v21 = vpop.permute.xlu1 %1719 }
 0x7dd   : > { %5889 = vrcp.f32 %v2070_v10 }
 0x7de   : > { %5891 = vrcp.f32 %v2238_v6 }
 0x7df   : > { %5893 = vrcp.f32 %v2405_v11 }
 0x7e0   : > { %v2075_v26 = vpop.permute.xlu1 %2074 }
 0x7e3   : > { %v5882_v17 = vpop.eup %5881 }
 0x7e4   : > { %v1383_v15 = vmul.f32 %v5882_v17, %v5880_v62  ;;  %v5884_v16 = vpop.eup %5883 }
 0x7e5   : > { %v1551_v18 = vmul.f32 %v5884_v16, %v6257_v30  ;;  %v5886_v20 = vpop.eup %5885  ;;  %v2409_v30 = vpop.permute.xlu1 %2408 }
 0x7e6   : > { %5386 = vmatmul.mubr.msk.f32.vlgmr.msra.gmra.mrb[8].mxu0 %vm1208_vm4, %v1383_v15  ;;  %v1718_v22 = vmul.f32 %v5886_v20, %v5870_v47  ;;  %v5888_v23 = vpop.eup %5887 }
 0x7e7   : > { %5394 = vmatpush3.msra.mxu0 %v1553_v12  ;;  %5395 = vmatprep.mubr.msk.f32.mxu0 %vm5962_vm2, %v5961_v60  ;;  %v1908_v24 = vmul.f32 %v5888_v23, %v5872_v50  ;;  %v5890_v25 = vpop.eup %5889 }
 0x7e8   : > { %5403 = vmatprep.subr.mxu0 %v5961_v60  ;;  %v2072_v27 = vmul.f32 %v5890_v25, %v6265_v53 }
 0x7ea   : > { %5396 = vmatmul.mubr.msk.f32.vlgmr.msra.gmra.mrb[10].mxu0 %vm1208_vm4, %v1551_v18 }
 0x7eb   : > { %5404 = vmatpush3.msra.mxu0 %v1720_v21  ;;  %5405 = vmatprep.mubr.msk.f32.mxu0 %vm5962_vm2, %v5961_v60 }
 0x7ec   : > { %5413 = vmatprep.subr.mxu0 %v5961_v60 }
 0x7ee   : > { %5406 = vmatmul.mubr.msk.f32.vlgmr.msra.gmra.mrb[12].mxu0 %vm1208_vm4, %v1718_v22 }
 0x7ef   : > { %5414 = vmatpush3.msra.mxu0 %v6157_v14  ;;  %5415 = vmatprep.mubr.msk.f32.mxu0 %vm5962_vm2, %v5961_v60  ;;  %v5892_v14 = vpop.eup %5891 }
 0x7f0   : > { %5423 = vmatprep.subr.mxu0 %v5961_v60  ;;  %v2240_v28 = vmul.f32 %v5892_v14, %v6263_v52  ;;  %v5894_v29 = vpop.eup %5893 }
 0x7f1   : > { %v2407_v31 = vmul.f32 %v5894_v29, %v6271_v57 }
 0x7f2   : > { %5416 = vmatmul.mubr.msk.f32.vlgmr.msra.gmra.mrb[14].mxu0 %vm1208_vm4, %v1908_v24 }
 0x7f3   : > { %5424 = vmatpush3.msra.mxu0 %v2075_v26  ;;  %5425 = vmatprep.mubr.msk.f32.mxu0 %vm5962_vm2, %v5961_v60 }
 0x7f4   : > { %5433 = vmatprep.subr.mxu0 %v5961_v60 }
 0x7f6   : > { %5426 = vmatmul.mubr.msk.f32.vlgmr.msra.gmra.mrb[16].mxu0 %vm1208_vm4, %v2072_v27 }
 0x7f7   : > { %5434 = vmatpush3.msra.mxu0 %v2242_v19  ;;  %5435 = vmatprep.mubr.msk.f32.mxu0 %vm5962_vm2, %v5961_v60 }
 0x7f8   : > { %5443 = vmatprep.subr.mxu0 %v5961_v60 }
 0x7fa   : > { %5436 = vmatmul.mubr.msk.f32.vlgmr.msra.gmra.mrb[18].mxu0 %vm1208_vm4, %v2240_v28 }
 0x7fb   : > { %5444 = vmatpush3.msra.mxu0 %v2409_v30  ;;  %5445 = vmatprep.mubr.msk.f32.mxu0 %vm5962_vm2, %v5961_v60 }
 0x7fe   : > { %5446 = vmatmul.mubr.msk.f32.vlgmr.msra.gmra.mrb[20].mxu0 %vm1208_vm4, %v2407_v31 }
 0x7ff   : > { %3000 = vmatprep.mubr.f32.mxu0 %v5961_v60 }
 0x8b9   : > { %v1457_v38 = vpop.f32.mrb[8].mxu0 }
 0x8ba   : > { %1796 = vrot.lane.b32.xlu0 %v1457_v38, %s6733_s24  ;;  %v5387_v39 = vpop.f32.mrb[9].mxu0 }
 0x8bd   : > { %v1624_v42 = vpop.f32.mrb[10].mxu0 }
 0x8be   : > { %1800 = vrot.lane.b32.xlu1 %v1624_v42, %s6735_s2  ;;  %v5397_v44 = vpop.f32.mrb[11].mxu0 }
 0x8c1   : > { %v1791_v47 = vpop.f32.mrb[12].mxu0 }
 0x8c2   : > { %1804 = vrot.lane.b32.xlu1 %v1791_v47, %s6737_s22  ;;  %v5407_v49 = vpop.f32.mrb[13].mxu0 }
 0x8c5   : > { %v1978_v50 = vpop.f32.mrb[14].mxu0 }
 0x8c6   : > { %v5417_v51 = vpop.f32.mrb[15].mxu0 }
 0x8c9   : > { %v2146_v52 = vpop.f32.mrb[16].mxu0 }
 0x8ca   : > { %2485 = vrot.lane.b32.xlu0 %v2146_v52, %s6733_s24  ;;  %v5427_v53 = vpop.f32.mrb[17].mxu0  ;;  %s6355_s24 = scalar_lea.vmem %s6716_s9, %s6180_s25 }
 0x8cd   : > { %v2313_v55 = vpop.f32.mrb[18].mxu0 }
 0x8ce   : > { %2489 = vrot.lane.b32.xlu0 %v2313_v55, %s6735_s2  ;;  %v5437_v56 = vpop.f32.mrb[19].mxu0  ;;  %s6369_s2 = scalar_lea.vmem %s6719_s12, %s5208_s29  ;;  %s6760_s29 = smov 112  }
 0x8cf   : > { %v2643_v30 = vld [vmem:[%s6369_s2 + $0x8] sm:$0xff]  ;;  %v2644_v32 = vld [vmem:[%s6369_s2 + $0x10] sm:$0xff]  ;;  %v2645_v33 = vld [vmem:[%s6369_s2 + $0x18] sm:$0xff] }
 0x8d0   : > { %v5718_v34 = vpack.c.bf16 %v2645_v33, %v2644_v32  ;;  %v2646_v35 = vld [vmem:[%s6369_s2 + $0x20] sm:$0xff]  ;;  %v2647_v36 = vld [vmem:[%s6369_s2 + $0x28] sm:$0xff]  ;;  %v2648_v38 = vld [vmem:[%s6369_s2 + $0x30] sm:$0xff] }
 0x8d1   : > { %v2480_v57 = vpop.f32.mrb[20].mxu0  ;;  %v5722_v37 = vpack.c.bf16 %v2647_v36, %v2646_v35  ;;  %v2649_v39 = vld [vmem:[%s6369_s2 + $0x38] sm:$0xff] }
 0x8d2   : > { %2493 = vrot.lane.b32.xlu1 %v2480_v57, %s6737_s22  ;;  %v5447_v58 = vpop.f32.mrb[21].mxu0  ;;  %v5726_v40 = vpack.c.bf16 %v2649_v39, %v2648_v38  ;;  %s6429_s22 = scalar_lea.vmem %s6720_s13, %s6180_s25 }
 0x8d3   : > { %v2756_v58 = vld [vmem:[%s6406_s20] sm:$0xff] }
 0x92c   : > { %v1797_v59 = vpop.permute.xlu0 %1796 }
 0x92d   : > { %v1807_v62 = vsel %vm1125_vm3, %v6243_v54, %v1797_v59  ;;  %v5099_v54 = vld [vmem:[%s6355_s24] ss:$0 sm:$0xff]  ;;  %v2757_v59 = vld [vmem:[%s6406_s20 + $0x8] sm:$0xff] }
 0x930   : > { %v1801_v61 = vpop.permute.xlu1 %1800 }
 0x931   : > { %v1808_v63 = vsel %vm873_vm0, %v1807_v62, %v1801_v61  ;;  %v5730_v61 = vpack.c.bf16 %v2757_v59, %v2756_v58  ;;  %v2758_v62 = vld [vmem:[%s6406_s20 + $0x10] sm:$0xff] }
 0x934   : > { %v1805_v2 = vpop.permute.xlu1 %1804 }
 0x935   : > { %v1810_v5 = vsel %vm1809_vm5, %v1808_v63, %v1805_v2  ;;  %v2759_v63 = vld [vmem:[%s6406_s20 + $0x18] sm:$0xff] }
 0x936   : > { %5464 = vmatprep.mubr.msk.f32.mxu1 %vm1037_vm1, %v1810_v5  ;;  %v5734_v2 = vpack.c.bf16 %v2759_v63, %v2758_v62  ;;  %v2760_v5 = vld [vmem:[%s6406_s20 + $0x20] sm:$0xff] }
 0x93c   : > { %v2486_v6 = vpop.permute.xlu0 %2485 }
 0x93d   : > { %v2496_v7 = vsel %vm1125_vm3, %v1978_v50, %v2486_v6  ;;  %v5103_v50 = vld [vmem:[%s6389_s3] ss:$0 sm:$0xff]  ;;  %v2761_v6 = vld [vmem:[%s6406_s20 + $0x28] sm:$0xff] }
 0x940   : > { %v2490_v9 = vpop.permute.xlu0 %2489 }
 0x941   : > { %v2497_v10 = vsel %vm873_vm0, %v2496_v7, %v2490_v9  ;;  %v5738_v9 = vpack.c.bf16 %v2761_v6, %v2760_v5  ;;  %v2762_v7 = vld [vmem:[%s6406_s20 + $0x30] sm:$0xff]  ;;  %v5111_v5 = vld [vmem:[%s6093_s26 + $0x88] sm:$0xff]  ;;  %v5113_v6 = vld [vmem:[%s6093_s26 + $0x98] sm:$0xff] }
 0x944   : > { %v2494_v11 = vpop.permute.xlu1 %2493 }
 0x945   : > { %v2498_v12 = vsel %vm1809_vm5, %v2497_v10, %v2494_v11  ;;  %v2763_v10 = vld [vmem:[%s6406_s20 + $0x38] sm:$0xff] }
 0x946   : > { %5465 = vmatmul.mubr.msk.f32.vlgmr.msra.gmra.mrb[16].mxu1 %vm1037_vm1, %v2498_v12  ;;  %v5742_v11 = vpack.c.bf16 %v2763_v10, %v2762_v7  ;;  %v2764_v12 = vld [vmem:[%s6406_s20 + $0x40] sm:$0xff]  ;;  %v5112_v10 = vld [vmem:[%s6093_s26 + $0x90] sm:$0xff] }
 0x947   : > { %v5110_v7 = vld [vmem:[%s6093_s26 + $0x80] sm:$0xff] }
 0xa19   : > { %v5466_v13 = vpop.f32.mrb[16].mxu1 }
 0xa1a   : > { %v2592_v17 = vadd.f32 %v5466_v13, %v5099_v54  ;;  %v2586_v15 = vpop.f32.mrb[17].mxu1  ;;  %v2766_v13 = vld [vmem:[%s6406_s20 + $0x50] sm:$0xff] }
 0xa1b   : > { %v2587_v16 = vadd.f32 %v5099_v54, %v2586_v15  ;;  %v2765_v54 = vld [vmem:[%s6406_s20 + $0x48] sm:$0xff]  ;;  %v2767_v15 = vld [vmem:[%s6406_s20 + $0x58] sm:$0xff] }
 0xa1c   : > { %v2596_v18 = vadd.f32 %v2592_v17, %v6133_v1  ;;  %v2642_v1 = vld [vmem:[%s6369_s2] sm:$0xff]  ;;  %v5746_v17 = vpack.c.bf16 %v2765_v54, %v2764_v12  ;;  %v5115_v12 = vld [vmem:[%s6093_s26 + $0xa8] sm:$0xff]  ;;  %v5117_v54 = vld [vmem:[%s6093_s26 + $0xb8] sm:$0xff] }
 0xa1d   : > { %v2595_v20 = vadd.f32 %v2587_v16, %v6128_v0  ;;  %v5714_v31 = vpack.c.bf16 %v2643_v30, %v2642_v1  ;;  %v5750_v16 = vpack.c.bf16 %v2767_v15, %v2766_v13  ;;  %v5766_v13 = vpack.c.bf16 %v5117_v54, %v5115_v12  ;;  %v5116_v15 = vld [vmem:[%s6093_s26 + $0xb0] sm:$0xff] }
 0xa1e   : > { %v2602_v21 = vsel %vm1037_vm1, %v2596_v18, 0.0 }
 0xa1f   : > { %2603 = vadd.xlane.f32.xlu1 %v2602_v21  ;;  %v2599_v22 = vsel %vm1037_vm1, %v2595_v20, 0.0  ;;  %5715 = vmatprep.subr.bf16.mxu1 %v5714_v31 }
 0xa20   : > { %2600 = vadd.xlane.f32.xlu0 %v2599_v22  ;;  %5717 = vmatpush3.bf16.msra.mxu1 %v5714_v31  ;;  %v2770_v22 = vld [vmem:[%s6406_s20 + $0x70] sm:$0xff] }
 0xa21   : > { %5719 = vmatprep.subr.bf16.mxu1 %v5718_v34 }
 0xa24   : > { %5721 = vmatpush3.bf16.msra.mxu1 %v5718_v34 }
 0xa25   : > { %5723 = vmatprep.subr.bf16.mxu1 %v5722_v37 }
 0xa28   : > { %5725 = vmatpush3.bf16.msra.mxu1 %v5722_v37 }
 0xa29   : > { %5727 = vmatprep.subr.bf16.mxu1 %v5726_v40 }
 0xa2c   : > { %5729 = vmatpush3.bf16.msra.mxu1 %v5726_v40 }
 0xa2d   : > { %5731 = vmatprep.subr.bf16.mxu1 %v5730_v61 }
 0xaac   : > { %v2604_v23 = vpop.xlane.xlu1 %2603 }
 0xaad   : > { %v2607_v24 = vmul.f32 0.015625, %v2604_v23  ;;  %v2601_v25 = vpop.xlane.xlu0 %2600  ;;  %v2771_v23 = vld [vmem:[%s6406_s20 + $0x78] sm:$0xff] }
 0xaae   : > { %v2606_v26 = vmul.f32 0.015625, %v2601_v25  ;;  %v5104_v25 = vld [vmem:[%s6429_s22] ss:$0 sm:$0xff] }
 0xaaf   : > { %v2609_v27 = vsub.f32 %v2596_v18, %v2607_v24  ;;  %v2768_v18 = vld [vmem:[%s6406_s20 + $0x60] sm:$0xff]  ;;  %v5758_v24 = vpack.c.bf16 %v2771_v23, %v2770_v22  ;;  %v5120_v23 = vld [vmem:[%s6093_s26 + $0xd0] sm:$0xff] }
 0xab0   : > { %v2608_v14 = vsub.f32 %v2595_v20, %v2606_v26  ;;  %v2769_v20 = vld [vmem:[%s6406_s20 + $0x68] sm:$0xff]  ;;  %v5118_v22 = vld [vmem:[%s6093_s26 + $0xc0] sm:$0xff] }
 0xab1   : > { %v2611_v29 = vmul.f32 %v2609_v27, %v2609_v27  ;;  %v5754_v21 = vpack.c.bf16 %v2769_v20, %v2768_v18  ;;  %v5119_v18 = vld [vmem:[%s6093_s26 + $0xc8] sm:$0xff]  ;;  %v5121_v20 = vld [vmem:[%s6093_s26 + $0xd8] sm:$0xff] }
 0xab2   : > { %v2610_v19 = vmul.f32 %v2608_v14, %v2608_v14 }
 0xab3   : > { %v2615_v0 = vsel %vm1037_vm1, %v2611_v29, 0.0 }
 0xab4   : > { %v2612_v28 = vsel %vm1037_vm1, %v2610_v19, 0.0 }
 0xab5   : > { %2613 = vadd.xlane.f32.xlu0 %v2612_v28 }
 0xab9   : > { %2616 = vadd.xlane.f32.xlu0 %v2615_v0 }
 0xb42   : > { %v2614_v41 = vpop.xlane.xlu0 %2613 }
 0xb43   : > { %v2618_v42 = vmul.f32 0.015625, %v2614_v41 }
 0xb45   : > { %v2620_v43 = vadd.f32 1e-12, %v2618_v42 }
 0xb46   : > { %v2617_v44 = vpop.xlane.xlu0 %2616 }
 0xb47   : > { %5895 = vrsqrt.f32 %v2620_v43  ;;  %v2619_v45 = vmul.f32 0.015625, %v2617_v44  ;;  %v5107_v44 = vld [vmem:[%s6438_s19] ss:$0 sm:$0xff] }
 0xb49   : > { %v2621_v46 = vadd.f32 1e-12, %v2619_v45 }
 0xb4b   : > { %5897 = vrsqrt.f32 %v2621_v46 }
 0xb51   : > { %v5896_v47 = vpop.eup %5895 }
 0xb52   : > { %v2624_v49 = vmul.f32 %v5896_v47, %v2608_v14 }
 0xb54   : > { %v2632_v51 = vmul.f32 %v5102_v48, %v2624_v49 }
 0xb55   : > { %v5898_v52 = vpop.eup %5897 }
 0xb56   : > { %v2625_v53 = vmul.f32 %v5898_v52, %v2609_v27  ;;  %v6393_v55 = vadd.f32 %v5103_v50, %v2632_v51 }
 0xb58   : > { %v2633_v56 = vmul.f32 %v5102_v48, %v2625_v53  ;;  %5483 = vmatprep.mubr.msk.f32.mxu1 %vm1037_vm1, %v6393_v55 }
 0xb5a   : > { %v6397_v57 = vadd.f32 %v5103_v50, %v2633_v56 }
 0xb5c   : > { %5484 = vmatmul.mubr.msk.f32.vlgmr.msra.gmra.mrb[18].mxu1 %vm1037_vm1, %v6397_v57 }
 0xb5d   : > { %5733 = vmatpush3.bf16.msra.mxu1 %v5730_v61 }
 0xb5e   : > { %5735 = vmatprep.subr.bf16.mxu1 %v5734_v2 }
 0xb61   : > { %5737 = vmatpush3.bf16.msra.mxu1 %v5734_v2 }
 0xb62   : > { %5739 = vmatprep.subr.bf16.mxu1 %v5738_v9 }
 0xb65   : > { %5741 = vmatpush3.bf16.msra.mxu1 %v5738_v9  ;;  %v5762_v9 = vpack.c.bf16 %v5113_v6, %v5111_v5 }
 0xb66   : > { %5743 = vmatprep.subr.bf16.mxu1 %v5742_v11 }
 0xb67   : > { %5763 = vmatprep.subr.bf16.mxu0 %v5762_v9 }
 0xb69   : > { %5745 = vmatpush3.bf16.msra.mxu1 %v5742_v11  ;;  %v5764_v11 = vpack.c.bf16 %v5112_v10, %v5110_v7 }
 0xb6a   : > { %5747 = vmatprep.subr.bf16.mxu1 %v5746_v17 }
 0xb6b   : > { %5765 = vmatpush1.bf16.msra.mxu0 %v5764_v11 }
 0xb6c   : > { %5767 = vmatprep.subr.bf16.mxu0 %v5766_v13 }
 0xb6d   : > { %5749 = vmatpush3.bf16.msra.mxu1 %v5746_v17  ;;  %v5114_v17 = vld [vmem:[%s6093_s26 + $0xa0] sm:$0xff] }
 0xb6e   : > { %5751 = vmatprep.subr.bf16.mxu1 %v5750_v16 }
 0xb71   : > { %5753 = vmatpush3.bf16.msra.mxu1 %v5750_v16  ;;  %v5768_v16 = vpack.c.bf16 %v5116_v15, %v5114_v17 }
 0xb72   : > { %5755 = vmatprep.subr.bf16.mxu1 %v5754_v21 }
 0xb73   : > { %5769 = vmatpush1.bf16.msra.mxu0 %v5768_v16 }
 0xb75   : > { %5757 = vmatpush3.bf16.msra.mxu1 %v5754_v21  ;;  %v5770_v21 = vpack.c.bf16 %v5121_v20, %v5119_v18 }
 0xb76   : > { %5759 = vmatprep.subr.bf16.mxu1 %v5758_v24 }
 0xb77   : > { %5771 = vmatprep.subr.bf16.mxu0 %v5770_v21 }
 0xb79   : > { %5761 = vmatpush3.bf16.msra.mxu1 %v5758_v24  ;;  %v5772_v24 = vpack.c.bf16 %v5120_v23, %v5118_v22 }
 0xb7a   : > { %5536 = vmatprep.subr.mxu1 %v5961_v60 }
 0xb7b   : > { %5773 = vmatpush1.bf16.msra.mxu0 %v5772_v24 }
 0xc2f   : > { %v5485_v26 = vpop.f32.mrb[18].mxu1 }
 0xc30   : > { %v2735_v27 = vadd.f32 %v5485_v26, %v5104_v25  ;;  %v2729_v14 = vpop.f32.mrb[19].mxu1  ;;  %v5125_v26 = vld [vmem:[%s6093_s26 + $0xf8] sm:$0xff] }
 0xc31   : > { %v2730_v19 = vadd.f32 %v5104_v25, %v2729_v14  ;;  %v5123_v25 = vld [vmem:[%s6093_s26 + $0xe8] sm:$0xff] }
 0xc32   : > { %v2739_v28 = vmul.f32 %v2735_v27, %v2735_v27  ;;  %v5774_v14 = vpack.c.bf16 %v5125_v26, %v5123_v25 }
 0xc33   : > { %v2738_v29 = vmul.f32 %v2730_v19, %v2730_v19 }
 0xc34   : > { %v2741_v0 = vmul.f32 %v2739_v28, %v2735_v27  ;;  %5775 = vmatprep.subr.bf16.mxu0 %v5774_v14 }
 0xc35   : > { %v2740_v1 = vmul.f32 %v2738_v29, %v2730_v19 }
 0xc36   : > { %v2743_v30 = vmul.f32 0.044715, %v2741_v0 }
 0xc37   : > { %v2742_v31 = vmul.f32 0.044715, %v2740_v1 }
 0xc38   : > { %v2745_v32 = vadd.f32 %v2743_v30, %v2735_v27 }
 0xc39   : > { %v2744_v33 = vadd.f32 %v2742_v31, %v2730_v19 }
 0xc3a   : > { %v2747_v34 = vmul.f32 0.7978846, %v2745_v32 }
 0xc3b   : > { %v2746_v35 = vmul.f32 0.7978846, %v2744_v33 }
 0xc3c   : > { %5899 = vtanh.f32 %v2747_v34  ;;  %v5108_v34 = vld [vmem:[%s6468_s4] ss:$0 sm:$0xff] }
 0xc3d   : > { %5901 = vtanh.f32 %v2746_v35 }
 0xc46   : > { %v5900_v36 = vpop.eup %5899 }
 0xc47   : > { %v5902_v37 = vpop.eup %5901  ;;  %v2751_v38 = vadd.f32 1.0, %v5900_v36  ;;  %v5109_v36 = vld [vmem:[%s6474_s6] ss:$0 sm:$0xff] }
 0xc48   : > { %v2750_v39 = vadd.f32 1.0, %v5902_v37 }
 0xc49   : > { %v2753_v40 = vmul.f32 0.5, %v2751_v38 }
 0xc4a   : > { %v2752_v41 = vmul.f32 0.5, %v2750_v39 }
 0xc4b   : > { %v2755_v43 = vmul.f32 %v2753_v40, %v2735_v27  ;;  %v5122_v27 = vld [vmem:[%s6093_s26 + $0xe0] sm:$0xff] }
 0xc4c   : > { %v2754_v42 = vmul.f32 %v2752_v41, %v2730_v19  ;;  %v5124_v19 = vld [vmem:[%s6093_s26 + $0xf0] sm:$0xff]  ;;  %s6763_s26 = smov 32  }
 0xc4d   : > { %v5776_v28 = vpack.c.bf16 %v5124_v19, %v5122_v27 }
 0xc4e   : > { %5518 = vmatprep.mubr.f32.mxu1 %v2754_v42 }
 0xc4f   : > { %5519 = vmatmul.mubr.f32.vlgmr.msra.gmra.mrb[20].mxu1 %v2755_v43  ;;  %5777 = vmatpush1.bf16.msra.mxu0 %v5776_v28  ;;  %v5126_v43 = vld [vmem:[%s6143_s0 + $0x2] sm:$0x3]  ;;  %s6762_s0 = smov 48  }
 0xc50   : > { %5538 = vmatprep.mubr.msk.f32.mxu1 %vm5962_vm2, %v5961_v60  ;;  %5521 = vmatprep.subr.mxu0 %v5961_v60 }
 0xd22   : > { %v5520_v45 = vpop.f32.mrb[20].mxu1 }
 0xd23   : > { %v2845_v46 = vpop.f32.mrb[21].mxu1  ;;  %v2851_v47 = vadd.f32 %v5520_v45, %v5107_v44 }
 0xd24   : > { %v2846_v48 = vadd.f32 %v5107_v44, %v2845_v46  ;;  %v2923_v44 = vrot.slane %v5126_v43, %v1029_v4 }
 0xd25   : > { %v2855_v51 = vadd.f32 %v2851_v47, %v6397_v57 }
 0xd26   : > { %v2854_v49 = vadd.f32 %v2846_v48, %v6393_v55  ;;  %v2927_v48 = vrot.slane %v5126_v43, %v1033_v8 }
 0xd27   : > { %v2861_v52 = vsel %vm1037_vm1, %v2855_v51, 0.0 }
 0xd28   : > { %v2858_v50 = vsel %vm1037_vm1, %v2854_v49, 0.0 }
 0xd29   : > { %2859 = vadd.xlane.f32.xlu0 %v2858_v50 }
 0xd2d   : > { %2862 = vadd.xlane.f32.xlu0 %v2861_v52 }
 0xdb6   : > { %v2860_v53 = vpop.xlane.xlu0 %2859 }
 0xdb7   : > { %v2864_v56 = vmul.f32 0.015625, %v2860_v53 }
 0xdb9   : > { %v2866_v58 = vsub.f32 %v2854_v49, %v2864_v56 }
 0xdba   : > { %v2863_v59 = vpop.xlane.xlu0 %2862 }
 0xdbb   : > { %v2865_v61 = vmul.f32 0.015625, %v2863_v59  ;;  %v2868_v62 = vmul.f32 %v2866_v58, %v2866_v58 }
 0xdbd   : > { %v2867_v55 = vsub.f32 %v2855_v51, %v2865_v61  ;;  %v2870_v63 = vsel %vm1037_vm1, %v2868_v62, 0.0 }
 0xdbe   : > { %2871 = vadd.xlane.f32.xlu1 %v2870_v63 }
 0xdbf   : > { %v2869_v57 = vmul.f32 %v2867_v55, %v2867_v55 }
 0xdc1   : > { %v2873_v2 = vsel %vm1037_vm1, %v2869_v57, 0.0 }
 0xdc2   : > { %2874 = vadd.xlane.f32.xlu1 %v2873_v2 }
 0xe4b   : > { %v2872_v29 = vpop.xlane.xlu1 %2871 }
 0xe4c   : > { %v2876_v0 = vmul.f32 0.015625, %v2872_v29 }
 0xe4e   : > { %v2878_v1 = vadd.f32 1e-12, %v2876_v0 }
 0xe4f   : > { %v2875_v30 = vpop.xlane.xlu1 %2874 }
 0xe50   : > { %5903 = vrsqrt.f32 %v2878_v1  ;;  %v2877_v31 = vmul.f32 0.015625, %v2875_v30 }
 0xe52   : > { %v2879_v32 = vadd.f32 1e-12, %v2877_v31 }
 0xe54   : > { %5905 = vrsqrt.f32 %v2879_v32 }
 0xe5a   : > { %v5904_v33 = vpop.eup %5903 }
 0xe5b   : > { %v2882_v35 = vmul.f32 %v5904_v33, %v2866_v58  ;;  %v6513_v58 = vld [vmem:[%s6186_s21] ss:$0 sm:$0xff] }
 0xe5d   : > { %v2890_v37 = vmul.f32 %v5108_v34, %v2882_v35 }
 0xe5e   : > { %v5906_v38 = vpop.eup %5905 }
 0xe5f   : > { %v6478_v39 = vadd.f32 %v5109_v36, %v2890_v37  ;;  %v2883_v40 = vmul.f32 %v5906_v38, %v2867_v55 }
 0xe61   : > { %5127 = vmatmul.mubr.msk.f32.vlgmr.msra.gmra.mrb[22].mxu0 %vm1037_vm1, %v6478_v39  ;;  %v2891_v41 = vmul.f32 %v5108_v34, %v2883_v40  ;;  %v5952_v40 = vld [vmem:[%s6186_s21 + $0x1] ss:$0 sm:$0xff] }
 0xe62   : > { %3006 = vmatprep.mubr.f32.mxu0 %v5961_v60 }
 0xe63   : > { %v6483_v42 = vadd.f32 %v5109_v36, %v2891_v41 }
 0xe65   : > { %5128 = vmatmul.mubr.msk.f32.gmra.mrb[24].mxu0 %vm1037_vm1, %v6483_v42 }
 0xe66   : > { %5523 = vmatprep.mubr.msk.f32.mxu0 %vm5962_vm2, %v5961_v60 }
 0xf34   : > { %v3002_v45 = vpop.f32.mrb[22].mxu0 }
 0xf35   : > { %v3003_v46 = vadd.f32 %v3002_v45, %v2923_v44  ;;  %v3004_v47 = vpop.f32.mrb[23].mxu0 }
 0xf36   : > { %v6505_v8 = vadd.f32 %v3004_v47, %v2927_v48 }
 0xf37   : > { %3014 = vrot.lane.b32.xlu0 %v3003_v46, %s6759_s5 }
 0xf38   : > { %v3008_v49 = vpop.f32.mrb[24].mxu0 }
 0xf39   : > { %v3010_v50 = vpop.f32.mrb[25].mxu0  ;;  %v3009_v4 = vadd.f32 %v3008_v49, %v2923_v44 }
 0xf3a   : > { %v6495_v51 = vadd.f32 %v3010_v50, %v2927_v48 }
 0xf3b   : > { %3176 = vrot.lane.b32.xlu0 %v3003_v46, %s6760_s29 }
 0xf3f   : > { %3344 = vrot.lane.b32.xlu0 %v3003_v46, %s6761_s28 }
 0xf43   : > { %3511 = vrot.lane.b32.xlu0 %v3003_v46, %s6757_s23 }
 0xf47   : > { %3858 = vrot.lane.b32.xlu0 %v3009_v4, %s6762_s0 }
 0xf4b   : > { %4026 = vrot.lane.b32.xlu0 %v3009_v4, %s6763_s26 }
 0xf4f   : > { %4193 = vrot.lane.b32.xlu0 %v3009_v4, %s6764_s7 }
 0xfa9   : > { %v3015_v3 = vpop.permute.xlu0 %3014 }
 0xfaa   : > { %5522 = vmatpush3.xpose.msk.msra.mxu0 %vm1125_vm3, %v3015_v3 }
 0xfab   : > { %5526 = vmatprep.subr.mxu0 %v5961_v60 }
 0xfad   : > { %5524 = vmatmul.mubr.msk.f32.vlgmr.msra.gmra.mrb[26].mxu0 %vm1125_vm3, %v3003_v46  ;;  %v3177_v7 = vpop.permute.xlu0 %3176 }
 0xfae   : > { %5527 = vmatpush3.msra.mxu0 %v6505_v8  ;;  %5528 = vmatprep.mubr.msk.f32.mxu0 %vm5962_vm2, %v5961_v60 }
 0xfaf   : > { %5531 = vmatprep.subr.mxu0 %v5961_v60 }
 0xfb1   : > { %v3345_v12 = vpop.permute.xlu0 %3344 }
 0xfb5   : > { %v3512_v13 = vpop.permute.xlu0 %3511 }
 0xfb9   : > { %v3859_v15 = vpop.permute.xlu0 %3858 }
 0xfbd   : > { %v4027_v18 = vpop.permute.xlu0 %4026 }
 0xfc1   : > { %v4194_v21 = vpop.permute.xlu0 %4193 }
0x1080   : > { %v3086_v52 = vpop.f32.mrb[26].mxu0 }
0x1081   : > { %v3090_v53 = vmul.f32 0.25, %v3086_v52  ;;  %v5525_v56 = vpop.f32.mrb[27].mxu0 }
0x1083   : > { %v3091_v59 = vadd.f32 %v6513_v58, %v3090_v53 }
0x1085   : > { %v3092_v61 = vsel %vm1208_vm4, %v3091_v59, -inf }
0x1086   : > { %3093 = vmax.xlane.f32.xlu1 %v3092_v61 }
0x1097   : > { %3178 = vrot.lane.b32.xlu1 %v3003_v46, %s6762_s0 }
0x109b   : > { %3346 = vrot.lane.b32.xlu1 %v3003_v46, %s6763_s26 }
0x1113   : > { %v3094_v62 = vpop.xlane.xlu1 %3093 }
0x1114   : > { %v3095_v55 = vsub.f32 %v3091_v59, %v3094_v62 }
0x1116   : > { %v3096_v63 = vmul.f32 1.442695, %v3095_v55 }
0x1117   : > { %v3179_v5 = vpop.permute.xlu1 %3178 }
0x1118   : > { %5907 = vpow2.f32 %v3096_v63 }
0x111b   : > { %v3347_v6 = vpop.permute.xlu1 %3346 }
0x1122   : > { %v5908_v57 = vpop.eup %5907 }
0x1123   : > { %v3098_v2 = vsel %vm1208_vm4, %v5908_v57, 0.0 }
0x1124   : > { %3099 = vadd.xlane.f32.xlu1 %v3098_v2 }
0x1135   : > { %3513 = vrot.lane.b32.xlu1 %v3003_v46, %s6764_s7 }
0x1139   : > { %3694 = vrot.lane.b32.xlu1 %v3009_v4, %s6759_s5 }
0x113d   : > { %3856 = vrot.lane.b32.xlu1 %v3009_v4, %s6760_s29 }
0x1141   : > { %4024 = vrot.lane.b32.xlu1 %v3009_v4, %s6761_s28 }
0x1145   : > { %4191 = vrot.lane.b32.xlu1 %v3009_v4, %s6757_s23 }
0x11b1   : > { %v3100_v9 = vpop.xlane.xlu1 %3099 }
0x11b2   : > { %5909 = vrcp.f32 %v3100_v9 }
0x11b5   : > { %v3514_v54 = vpop.permute.xlu1 %3513 }
0x11b9   : > { %v3695_v17 = vpop.permute.xlu1 %3694 }
0x11bc   : > { %v5910_v10 = vpop.eup %5909 }
0x11bd   : > { %v3102_v11 = vmul.f32 %v5910_v10, %v5908_v57  ;;  %v3857_v16 = vpop.permute.xlu1 %3856 }
0x11bf   : > { %5529 = vmatmul.mubr.msk.f32.vlgmr.msra.gmra.mrb[28].mxu0 %vm1208_vm4, %v3102_v11 }
0x11c0   : > { %5532 = vmatpush3.xpose.msk.msra.mxu0 %vm1125_vm3, %v3179_v5  ;;  %5533 = vmatprep.mubr.msk.f32.mxu0 %vm5962_vm2, %v5961_v60 }
0x11c1   : > { %5541 = vmatprep.subr.mxu0 %v5961_v60  ;;  %v4025_v20 = vpop.permute.xlu1 %4024 }
0x11c3   : > { %5534 = vmatmul.mubr.msk.f32.vlgmr.msra.gmra.mrb[30].mxu0 %vm1125_vm3, %v3177_v7 }
0x11c4   : > { %5542 = vmatpush3.xpose.msk.msra.mxu0 %vm1125_vm3, %v3347_v6  ;;  %5543 = vmatprep.mubr.msk.f32.mxu0 %vm5962_vm2, %v5961_v60 }
0x11c5   : > { %5551 = vmatprep.subr.mxu0 %v5961_v60  ;;  %v4192_v22 = vpop.permute.xlu1 %4191 }
0x11c7   : > { %5544 = vmatmul.mubr.msk.f32.vlgmr.msra.gmra.mrb[32].mxu0 %vm1125_vm3, %v3345_v12 }
0x11c8   : > { %5552 = vmatpush3.xpose.msk.msra.mxu0 %vm1125_vm3, %v3514_v54  ;;  %5553 = vmatprep.mubr.msk.f32.mxu0 %vm5962_vm2, %v5961_v60 }
0x11c9   : > { %5561 = vmatprep.subr.mxu0 %v5961_v60 }
0x11cb   : > { %5554 = vmatmul.mubr.msk.f32.vlgmr.msra.gmra.mrb[34].mxu0 %vm1125_vm3, %v3512_v13 }
0x11cc   : > { %5562 = vmatpush3.xpose.msk.msra.mxu0 %vm1125_vm3, %v3695_v17  ;;  %5563 = vmatprep.mubr.msk.f32.mxu0 %vm5962_vm2, %v5961_v60 }
0x11cd   : > { %5571 = vmatprep.subr.mxu0 %v5961_v60 }
0x11cf   : > { %5564 = vmatmul.mubr.msk.f32.vlgmr.msra.gmra.mrb[36].mxu0 %vm1125_vm3, %v3009_v4 }
0x11d0   : > { %5572 = vmatpush3.xpose.msk.msra.mxu0 %vm1125_vm3, %v3859_v15  ;;  %5573 = vmatprep.mubr.msk.f32.mxu0 %vm5962_vm2, %v5961_v60 }
0x11d1   : > { %5581 = vmatprep.subr.mxu0 %v5961_v60 }
0x11d3   : > { %5574 = vmatmul.mubr.msk.f32.vlgmr.msra.gmra.mrb[38].mxu0 %vm1125_vm3, %v3857_v16 }
0x11d4   : > { %5582 = vmatpush3.xpose.msk.msra.mxu0 %vm1125_vm3, %v4027_v18  ;;  %5583 = vmatprep.mubr.msk.f32.mxu0 %vm5962_vm2, %v5961_v60 }
0x11d5   : > { %5591 = vmatprep.subr.mxu0 %v5961_v60 }
0x11d7   : > { %5584 = vmatmul.mubr.msk.f32.vlgmr.msra.gmra.mrb[40].mxu0 %vm1125_vm3, %v4025_v20 }
0x11d8   : > { %5592 = vmatpush3.xpose.msk.msra.mxu0 %vm1125_vm3, %v4194_v21  ;;  %5593 = vmatprep.mubr.msk.f32.mxu0 %vm5962_vm2, %v5961_v60 }
0x11db   : > { %5594 = vmatmul.mubr.msk.f32.vlgmr.msra.gmra.mrb[42].mxu0 %vm1125_vm3, %v4192_v22 }
0x1292   : > { %v6560_v23 = vpop.f32.mrb[28].mxu0 }
0x1293   : > { %v5530_v24 = vpop.f32.mrb[29].mxu0 }
0x1296   : > { %v3250_v25 = vpop.f32.mrb[30].mxu0 }
0x1297   : > { %v3254_v26 = vmul.f32 0.25, %v3250_v25  ;;  %v5535_v27 = vpop.f32.mrb[31].mxu0 }
0x1299   : > { %v3255_v14 = vadd.f32 %v6513_v58, %v3254_v26 }
0x129a   : > { %v3418_v19 = vpop.f32.mrb[32].mxu0 }
0x129b   : > { %v3422_v28 = vmul.f32 0.25, %v3418_v19  ;;  %v5545_v29 = vpop.f32.mrb[33].mxu0  ;;  %v3256_v0 = vsel %vm1208_vm4, %v3255_v14, -inf }
0x129c   : > { %3257 = vmax.xlane.f32.xlu0 %v3256_v0 }
0x129d   : > { %v3423_v1 = vadd.f32 %v6513_v58, %v3422_v28 }
0x129e   : > { %v3585_v30 = vpop.f32.mrb[34].mxu0 }
0x129f   : > { %v3589_v31 = vmul.f32 0.25, %v3585_v30  ;;  %v5555_v32 = vpop.f32.mrb[35].mxu0  ;;  %v3424_v33 = vsel %vm1208_vm4, %v3423_v1, -inf }
0x12a0   : > { %3425 = vmax.xlane.f32.xlu1 %v3424_v33 }
0x12a1   : > { %v3590_v34 = vadd.f32 %v6513_v58, %v3589_v31 }
0x12a2   : > { %v3766_v35 = vpop.f32.mrb[36].mxu0 }
0x12a3   : > { %v3770_v36 = vmul.f32 0.25, %v3766_v35  ;;  %v5565_v37 = vpop.f32.mrb[37].mxu0  ;;  %v3591_v38 = vsel %vm1208_vm4, %v3590_v34, -inf }
0x12a4   : > { %3592 = vmax.xlane.f32.xlu0 %v3591_v38 }
0x12a5   : > { %v3771_v41 = vadd.f32 %v5952_v40, %v3770_v36 }
0x12a6   : > { %v3930_v43 = vpop.f32.mrb[38].mxu0 }
0x12a7   : > { %v3934_v44 = vmul.f32 0.25, %v3930_v43  ;;  %v5575_v45 = vpop.f32.mrb[39].mxu0  ;;  %v3772_v46 = vsel %vm1208_vm4, %v3771_v41, -inf }
0x12a8   : > { %3773 = vmax.xlane.f32.xlu0 %v3772_v46 }
0x12a9   : > { %v3935_v47 = vadd.f32 %v5952_v40, %v3934_v44 }
0x12aa   : > { %v4098_v48 = vpop.f32.mrb[40].mxu0 }
0x12ab   : > { %v4102_v49 = vmul.f32 0.25, %v4098_v48  ;;  %v5585_v50 = vpop.f32.mrb[41].mxu0  ;;  %v3936_v4 = vsel %vm1208_vm4, %v3935_v47, -inf }
0x12ac   : > { %3937 = vmax.xlane.f32.xlu0 %v3936_v4 }
0x12ad   : > { %v4103_v3 = vadd.f32 %v5952_v40, %v4102_v49 }
0x12ae   : > { %v4265_v52 = vpop.f32.mrb[42].mxu0 }
0x12af   : > { %v4269_v53 = vmul.f32 0.25, %v4265_v52  ;;  %v5595_v56 = vpop.f32.mrb[43].mxu0  ;;  %v4104_v58 = vsel %vm1208_vm4, %v4103_v3, -inf }
0x12b0   : > { %4105 = vmax.xlane.f32.xlu1 %v4104_v58 }
0x12b1   : > { %v4270_v59 = vadd.f32 %v5952_v40, %v4269_v53 }
0x12b3   : > { %v4271_v61 = vsel %vm1208_vm4, %v4270_v59, -inf }
0x12b4   : > { %4272 = vmax.xlane.f32.xlu0 %v4271_v61 }
0x1329   : > { %v3258_v62 = vpop.xlane.xlu0 %3257 }
0x132a   : > { %v3259_v55 = vsub.f32 %v3255_v14, %v3258_v62 }
0x132c   : > { %v3260_v63 = vmul.f32 1.442695, %v3259_v55 }
0x132d   : > { %v3426_v57 = vpop.xlane.xlu1 %3425 }
0x132e   : > { %5911 = vpow2.f32 %v3260_v63  ;;  %v3427_v2 = vsub.f32 %v3423_v1, %v3426_v57 }
0x1330   : > { %v3428_v5 = vmul.f32 1.442695, %v3427_v2 }
0x1331   : > { %v3593_v11 = vpop.xlane.xlu0 %3592 }
0x1332   : > { %5913 = vpow2.f32 %v3428_v5  ;;  %v3594_v17 = vsub.f32 %v3590_v34, %v3593_v11 }
0x1334   : > { %v3595_v20 = vmul.f32 1.442695, %v3594_v17  ;;  %v5159_v17 = vld [vmem:[%s6326_s1 + $0x70] sm:$0xff] }
0x1335   : > { %v3774_v12 = vpop.xlane.xlu0 %3773 }
0x1336   : > { %v3775_v54 = vsub.f32 %v3771_v41, %v3774_v12  ;;  %v5157_v12 = vld [vmem:[%s6326_s1 + $0x60] sm:$0xff] }
0x1338   : > { %v5912_v6 = vpop.eup %5911  ;;  %v3776_v15 = vmul.f32 1.442695, %v3775_v54  ;;  %v5158_v54 = vld [vmem:[%s6326_s1 + $0x68] sm:$0xff] }
0x1339   : > { %v3262_v9 = vsel %vm1208_vm4, %v5912_v6, 0.0  ;;  %v3938_v18 = vpop.xlane.xlu0 %3937 }
0x133a   : > { %3263 = vadd.xlane.f32.xlu1 %v3262_v9  ;;  %5915 = vpow2.f32 %v3776_v15  ;;  %v3939_v21 = vsub.f32 %v3935_v47, %v3938_v18  ;;  %v5154_v9 = vld [vmem:[%s6326_s1 + $0x48] sm:$0xff]  ;;  %v5160_v15 = vld [vmem:[%s6326_s1 + $0x78] sm:$0xff] }
0x133b   : > { %5917 = vpow2.f32 %v3595_v20  ;;  %v5790_v18 = vpack.c.bf16 %v5160_v15, %v5159_v17  ;;  %v5168_v15 = vld [vmem:[%s6389_s3 + $0x1] ss:$0 sm:$0xff] }
0x133c   : > { %v5914_v7 = vpop.eup %5913  ;;  %v3940_v25 = vmul.f32 1.442695, %v3939_v21 }
0x133d   : > { %v3430_v10 = vsel %vm1208_vm4, %v5914_v7, 0.0  ;;  %v4106_v13 = vpop.xlane.xlu1 %4105 }
0x133e   : > { %3431 = vadd.xlane.f32.xlu0 %v3430_v10  ;;  %v4107_v16 = vsub.f32 %v4103_v3, %v4106_v13  ;;  %v5156_v10 = vld [vmem:[%s6326_s1 + $0x58] sm:$0xff]  ;;  %v5786_v13 = vpack.c.bf16 %v5158_v54, %v5157_v12 }
0x1340   : > { %v4108_v22 = vmul.f32 1.442695, %v4107_v16 }
0x1341   : > { %v4273_v24 = vpop.xlane.xlu0 %4272 }
0x1342   : > { %5919 = vpow2.f32 %v4108_v22  ;;  %v4274_v26 = vsub.f32 %v4270_v59, %v4273_v24 }
0x1343   : > { %5921 = vpow2.f32 %v3940_v25 }
0x1344   : > { %v4275_v27 = vmul.f32 1.442695, %v4274_v26  ;;  %v5916_v14 = vpop.eup %5915 }
0x1345   : > { %v3778_v19 = vsel %vm1208_vm4, %v5916_v14, 0.0 }
0x1346   : > { %5923 = vpow2.f32 %v4275_v27 }
0x134b   : > { %3435 = vrot.lane.b32.xlu1 %v6505_v8, %s6761_s28 }
0x134f   : > { %3602 = vrot.lane.b32.xlu1 %v6505_v8, %s6757_s23 }
0x1353   : > { %3948 = vrot.lane.b32.xlu1 %v6495_v51, %s6760_s29 }
0x1354   : > { %3268 = vrot.lane.b32.xlu0 %v6505_v8, %s6760_s29  ;;  %v5918_v8 = vpop.eup %5917 }
0x1355   : > { %v6584_v28 = vpop.eup %5919  ;;  %v3597_v29 = vsel %vm1208_vm4, %v5918_v8, 0.0 }
0x1356   : > { %v4110_v0 = vsel %vm1208_vm4, %v6584_v28, 0.0  ;;  %v5922_v1 = vpop.eup %5921 }
0x1357   : > { %v3942_v30 = vsel %vm1208_vm4, %v5922_v1, 0.0  ;;  %v6590_v31 = vpop.eup %5923 }
0x1358   : > { %v4277_v32 = vsel %vm1208_vm4, %v6590_v31, 0.0 }
0x1373   : > { %3779 = vadd.xlane.f32.xlu0 %v3778_v19 }
0x1377   : > { %3598 = vadd.xlane.f32.xlu1 %v3597_v29  ;;  %4111 = vadd.xlane.f32.xlu0 %v4110_v0 }
0x137b   : > { %3943 = vadd.xlane.f32.xlu1 %v3942_v30 }
0x137f   : > { %4278 = vadd.xlane.f32.xlu1 %v4277_v32 }
0x138d   : > { %4115 = vrot.lane.b32.xlu0 %v6495_v51, %s6761_s28 }
0x1390   : > { %4282 = vrot.lane.b32.xlu1 %v6495_v51, %s6757_s23 }
0x13c7   : > { %v3264_v33 = vpop.xlane.xlu1 %3263 }
0x13c8   : > { %5925 = vrcp.f32 %v3264_v33 }
0x13cb   : > { %v3432_v34 = vpop.xlane.xlu0 %3431  ;;  %v3436_v38 = vpop.permute.xlu1 %3435 }
0x13cc   : > { %5927 = vrcp.f32 %v3432_v34 }
0x13cf   : > { %v3269_v35 = vpop.permute.xlu0 %3268  ;;  %v3603_v43 = vpop.permute.xlu1 %3602 }
0x13d0   : > { %5537 = vmatpush3.msra.mxu1 %v3269_v35 }
0x13d1   : > { %5546 = vmatprep.subr.mxu1 %v5961_v60 }
0x13d2   : > { %v5926_v36 = vpop.eup %5925 }
0x13d3   : > { %v3266_v37 = vmul.f32 %v5926_v36, %v5912_v6  ;;  %v3949_v44 = vpop.permute.xlu1 %3948  ;;  %v5153_v6 = vld [vmem:[%s6326_s1 + $0x40] sm:$0xff] }
0x13d5   : > { %5539 = vmatmul.mubr.msk.f32.vlgmr.msra.gmra.mrb[22].mxu1 %vm1208_vm4, %v3266_v37  ;;  %v5162_v37 = vld [vmem:[%s6355_s24 + $0x1] ss:$0 sm:$0xff] }
0x13d6   : > { %v5928_v40 = vpop.eup %5927  ;;  %5547 = vmatpush3.msra.mxu1 %v3436_v38  ;;  %5548 = vmatprep.mubr.msk.f32.mxu1 %vm5962_vm2, %v5961_v60 }
0x13d7   : > { %v3434_v41 = vmul.f32 %v5928_v40, %v5914_v7  ;;  %5556 = vmatprep.subr.mxu1 %v5961_v60  ;;  %v5778_v7 = vpack.c.bf16 %v5154_v9, %v5153_v6 }
0x13d9   : > { %5549 = vmatmul.mubr.msk.f32.vlgmr.msra.gmra.mrb[24].mxu1 %vm1208_vm4, %v3434_v41  ;;  %5779 = vmatprep.subr.bf16.mxu0 %v5778_v7 }
0x13da   : > { %5557 = vmatpush3.msra.mxu1 %v3603_v43  ;;  %5558 = vmatprep.mubr.msk.f32.mxu1 %vm5962_vm2, %v5961_v60 }
0x13db   : > { %5566 = vmatprep.subr.mxu1 %v5961_v60  ;;  %5781 = vmatpush3.bf16.msra.mxu0 %v5778_v7 }
0x1400   : > { %v3780_v45 = vpop.xlane.xlu0 %3779 }
0x1404   : > { %v3599_v46 = vpop.xlane.xlu1 %3598  ;;  %v4112_v48 = vpop.xlane.xlu0 %4111 }
0x1405   : > { %5929 = vrcp.f32 %v3599_v46 }
0x1406   : > { %5931 = vrcp.f32 %v3780_v45 }
0x1408   : > { %v3944_v47 = vpop.xlane.xlu1 %3943  ;;  %v4116_v59 = vpop.permute.xlu0 %4115 }
0x1409   : > { %5933 = vrcp.f32 %v3944_v47 }
0x140a   : > { %5935 = vrcp.f32 %v4112_v48 }
0x140c   : > { %v4279_v4 = vpop.xlane.xlu1 %4278 }
0x140d   : > { %5937 = vrcp.f32 %v4279_v4 }
0x140f   : > { %v5930_v49 = vpop.eup %5929 }
0x1410   : > { %v3601_v50 = vmul.f32 %v5930_v49, %v5918_v8  ;;  %v5932_v3 = vpop.eup %5931  ;;  %v4283_v62 = vpop.permute.xlu1 %4282 }
0x1411   : > { %v3782_v52 = vmul.f32 %v5932_v3, %v5916_v14 }
0x1412   : > { %5559 = vmatmul.mubr.msk.f32.vlgmr.msra.gmra.mrb[26].mxu1 %vm1208_vm4, %v3601_v50 }
0x1413   : > { %5567 = vmatpush3.msra.mxu1 %v6495_v51  ;;  %5568 = vmatprep.mubr.msk.f32.mxu1 %vm5962_vm2, %v5961_v60  ;;  %v5934_v53 = vpop.eup %5933 }
0x1414   : > { %5576 = vmatprep.subr.mxu1 %v5961_v60  ;;  %v3946_v56 = vmul.f32 %v5934_v53, %v5922_v1  ;;  %v5936_v58 = vpop.eup %5935 }
0x1415   : > { %v4114_v51 = vmul.f32 %v5936_v58, %v6584_v28  ;;  %v5170_v58 = vld [vmem:[%s6369_s2 + $0x48] sm:$0xff] }
0x1416   : > { %5569 = vmatmul.mubr.msk.f32.vlgmr.msra.gmra.mrb[28].mxu1 %vm1208_vm4, %v3782_v52 }
0x1417   : > { %5577 = vmatpush3.msra.mxu1 %v3949_v44  ;;  %5578 = vmatprep.mubr.msk.f32.mxu1 %vm5962_vm2, %v5961_v60  ;;  %v5938_v61 = vpop.eup %5937 }
0x1418   : > { %5586 = vmatprep.subr.mxu1 %v5961_v60  ;;  %v4281_v55 = vmul.f32 %v5938_v61, %v6590_v31  ;;  %v5172_v61 = vld [vmem:[%s6369_s2 + $0x58] sm:$0xff] }
0x141a   : > { %5579 = vmatmul.mubr.msk.f32.vlgmr.msra.gmra.mrb[30].mxu1 %vm1208_vm4, %v3946_v56  ;;  %v5169_v56 = vld [vmem:[%s6369_s2 + $0x40] sm:$0xff] }
0x141b   : > { %5587 = vmatpush3.msra.mxu1 %v4116_v59  ;;  %5588 = vmatprep.mubr.msk.f32.mxu1 %vm5962_vm2, %v5961_v60  ;;  %v5794_v59 = vpack.c.bf16 %v5170_v58, %v5169_v56 }
0x141c   : > { %5596 = vmatprep.subr.mxu1 %v5961_v60 }
0x141e   : > { %5589 = vmatmul.mubr.msk.f32.vlgmr.msra.gmra.mrb[32].mxu1 %vm1208_vm4, %v4114_v51  ;;  %v5171_v51 = vld [vmem:[%s6369_s2 + $0x50] sm:$0xff] }
0x141f   : > { %5597 = vmatpush3.msra.mxu1 %v4283_v62  ;;  %5598 = vmatprep.mubr.msk.f32.mxu1 %vm5962_vm2, %v5961_v60  ;;  %v5155_v60 = vld [vmem:[%s6326_s1 + $0x50] sm:$0xff]  ;;  %v5798_v62 = vpack.c.bf16 %v5172_v61, %v5171_v51  ;;  %s868_s1 = scalar_lea.vmem %s6725_s18, %s6180_s25 }
0x1420   : > { %v5782_v11 = vpack.c.bf16 %v5156_v10, %v5155_v60  ;;  %5795 = vmatprep.subr.bf16.mxu1 %v5794_v59 }
0x1422   : > { %5599 = vmatmul.mubr.msk.f32.vlgmr.msra.gmra.mrb[34].mxu1 %vm1208_vm4, %v4281_v55  ;;  %5783 = vmatprep.subr.bf16.mxu0 %v5782_v11  ;;  %v5173_v55 = vld [vmem:[%s6369_s2 + $0x60] sm:$0xff] }
0x1423   : > { %5785 = vmatpush3.bf16.msra.mxu0 %v5782_v11  ;;  %5797 = vmatpush3.bf16.msra.mxu1 %v5794_v59 }
0x1424   : > { %5787 = vmatprep.subr.bf16.mxu0 %v5786_v13  ;;  %5799 = vmatprep.subr.bf16.mxu1 %v5798_v62 }
0x1427   : > { %5789 = vmatpush3.bf16.msra.mxu0 %v5786_v13  ;;  %5801 = vmatpush3.bf16.msra.mxu1 %v5798_v62  ;;  %v5167_v13 = vld [vmem:[%s6383_s30 + $0x1] ss:$0 sm:$0xff] }
0x1428   : > { %5791 = vmatprep.subr.bf16.mxu0 %v5790_v18 }
0x142b   : > { %5793 = vmatpush3.bf16.msra.mxu0 %v5790_v18 }
0x14a8   : > { %v3340_v63 = vpop.f32.mrb[22].mxu1 }
0x14a9   : > { %3679 = vrot.lane.b32.xlu0 %v3340_v63, %s6764_s7  ;;  %v5540_v57 = vpop.f32.mrb[23].mxu1  ;;  %v5174_v63 = vld [vmem:[%s6369_s2 + $0x68] sm:$0xff] }
0x14aa   : > { %v5802_v57 = vpack.c.bf16 %v5174_v63, %v5173_v55 }
0x14ac   : > { %v3507_v2 = vpop.f32.mrb[24].mxu1  ;;  %5803 = vmatprep.subr.bf16.mxu1 %v5802_v57 }
0x14ad   : > { %3683 = vrot.lane.b32.xlu1 %v3507_v2, %s6763_s26  ;;  %v5550_v5 = vpop.f32.mrb[25].mxu1  ;;  %5805 = vmatpush3.bf16.msra.mxu1 %v5802_v57  ;;  %v5175_v2 = vld [vmem:[%s6369_s2 + $0x70] sm:$0xff] }
0x14ae   : > { %v5176_v5 = vld [vmem:[%s6369_s2 + $0x78] sm:$0xff] }
0x14af   : > { %v5806_v6 = vpack.c.bf16 %v5176_v5, %v5175_v2 }
0x14b1   : > { %5807 = vmatprep.subr.bf16.mxu1 %v5806_v6 }
0x14b2   : > { %5809 = vmatpush3.bf16.msra.mxu1 %v5806_v6  ;;  %v5198_v6 = vld [vmem:[%s6438_s19 + $0x1] ss:$0 sm:$0xff] }
0x14e5   : > { %v3674_v16 = vpop.f32.mrb[26].mxu1 }
0x14e6   : > { %3687 = vrot.lane.b32.xlu1 %v3674_v16, %s6762_s0  ;;  %v5560_v20 = vpop.f32.mrb[27].mxu1 }
0x14e9   : > { %v3852_v21 = vpop.f32.mrb[28].mxu1 }
0x14ea   : > { %v5570_v22 = vpop.f32.mrb[29].mxu1 }
0x14ed   : > { %v4020_v24 = vpop.f32.mrb[30].mxu1 }
0x14ee   : > { %4359 = vrot.lane.b32.xlu0 %v4020_v24, %s6764_s7  ;;  %v5580_v25 = vpop.f32.mrb[31].mxu1 }
0x14ef   : > { %v5181_v25 = vld [vmem:[%s6406_s20 + $0x80] sm:$0xff] }
0x14f1   : > { %v4187_v26 = vpop.f32.mrb[32].mxu1 }
0x14f2   : > { %4363 = vrot.lane.b32.xlu0 %v4187_v26, %s6763_s26  ;;  %v5590_v27 = vpop.f32.mrb[33].mxu1  ;;  %v5182_v26 = vld [vmem:[%s6406_s20 + $0x88] sm:$0xff] }
0x14f3   : > { %v5810_v27 = vpack.c.bf16 %v5182_v26, %v5181_v25 }
0x14f5   : > { %v4354_v14 = vpop.f32.mrb[34].mxu1  ;;  %5811 = vmatprep.subr.bf16.mxu0 %v5810_v27 }
0x14f6   : > { %4367 = vrot.lane.b32.xlu1 %v4354_v14, %s6762_s0  ;;  %v5600_v8 = vpop.f32.mrb[35].mxu1  ;;  %v5183_v14 = vld [vmem:[%s6406_s20 + $0x90] sm:$0xff] }
0x14f7   : > { %v5184_v8 = vld [vmem:[%s6406_s20 + $0x98] sm:$0xff] }
0x151b   : > { %v3680_v19 = vpop.permute.xlu0 %3679 }
0x151c   : > { %v3690_v29 = vsel %vm1125_vm3, %v6560_v23, %v3680_v19  ;;  %v5814_v19 = vpack.c.bf16 %v5184_v8, %v5183_v14 }
0x151f   : > { %v3684_v28 = vpop.permute.xlu1 %3683 }
0x1520   : > { %v3691_v0 = vsel %vm873_vm0, %v3690_v29, %v3684_v28  ;;  %v5185_v28 = vld [vmem:[%s6406_s20 + $0xa0] sm:$0xff]  ;;  %v5186_v29 = vld [vmem:[%s6406_s20 + $0xa8] sm:$0xff] }
0x1558   : > { %v3688_v1 = vpop.permute.xlu1 %3687 }
0x1559   : > { %v3692_v30 = vsel %vm1809_vm5, %v3691_v0, %v3688_v1  ;;  %v5818_v0 = vpack.c.bf16 %v5186_v29, %v5185_v28  ;;  %v5187_v1 = vld [vmem:[%s6406_s20 + $0xb0] sm:$0xff] }
0x155a   : > { %5617 = vmatprep.mubr.msk.f32.mxu0 %vm1037_vm1, %v3692_v30  ;;  %v5188_v30 = vld [vmem:[%s6406_s20 + $0xb8] sm:$0xff] }
0x1560   : > { %v4360_v31 = vpop.permute.xlu0 %4359 }
0x1561   : > { %v4370_v33 = vsel %vm1125_vm3, %v3852_v21, %v4360_v31  ;;  %v5822_v31 = vpack.c.bf16 %v5188_v30, %v5187_v1  ;;  %v5201_v1 = vld [vmem:[%s6468_s4 + $0x1] ss:$0 sm:$0xff] }
0x1564   : > { %v4364_v32 = vpop.permute.xlu0 %4363 }
0x1565   : > { %v4371_v34 = vsel %vm873_vm0, %v4370_v33, %v4364_v32  ;;  %v5189_v32 = vld [vmem:[%s6406_s20 + $0xc0] sm:$0xff]  ;;  %v5190_v33 = vld [vmem:[%s6406_s20 + $0xc8] sm:$0xff] }
0x1568   : > { %v4368_v35 = vpop.permute.xlu1 %4367 }
0x1569   : > { %v4372_v36 = vsel %vm1809_vm5, %v4371_v34, %v4368_v35  ;;  %v5191_v34 = vld [vmem:[%s6406_s20 + $0xd0] sm:$0xff]  ;;  %v5826_v35 = vpack.c.bf16 %v5190_v33, %v5189_v32  ;;  %v5202_v32 = vld [vmem:[%s6474_s6 + $0x1] ss:$0 sm:$0xff] }
0x156a   : > { %5618 = vmatmul.mubr.msk.f32.vlgmr.msra.gmra.mrb[44].mxu0 %vm1037_vm1, %v4372_v36  ;;  %v5192_v36 = vld [vmem:[%s6406_s20 + $0xd8] sm:$0xff] }
0x156b   : > { %5813 = vmatpush3.bf16.msra.mxu0 %v5810_v27 }
0x156c   : > { %5815 = vmatprep.subr.bf16.mxu0 %v5814_v19 }
0x156f   : > { %5817 = vmatpush3.bf16.msra.mxu0 %v5814_v19 }
0x1570   : > { %5819 = vmatprep.subr.bf16.mxu0 %v5818_v0 }
0x1573   : > { %5821 = vmatpush3.bf16.msra.mxu0 %v5818_v0 }
0x1574   : > { %5823 = vmatprep.subr.bf16.mxu0 %v5822_v31 }
0x1577   : > { %5825 = vmatpush3.bf16.msra.mxu0 %v5822_v31 }
0x1578   : > { %5827 = vmatprep.subr.bf16.mxu0 %v5826_v35 }
0x157b   : > { %5829 = vmatpush3.bf16.msra.mxu0 %v5826_v35 }
0x163d   : > { %v5619_v23 = vpop.f32.mrb[44].mxu0 }
0x163e   : > { %v4468_v38 = vadd.f32 %v5619_v23, %v5162_v37  ;;  %v4462_v40 = vpop.f32.mrb[45].mxu0  ;;  %v5193_v23 = vld [vmem:[%s6406_s20 + $0xe0] sm:$0xff] }
0x163f   : > { %v4463_v41 = vadd.f32 %v5162_v37, %v4462_v40  ;;  %v5830_v37 = vpack.c.bf16 %v5192_v36, %v5191_v34 }
0x1640   : > { %v4472_v43 = vadd.f32 %v4468_v38, %v6483_v42  ;;  %v5194_v38 = vld [vmem:[%s6406_s20 + $0xe8] sm:$0xff] }
0x1641   : > { %v4471_v44 = vadd.f32 %v4463_v41, %v6478_v39  ;;  %5831 = vmatprep.subr.bf16.mxu0 %v5830_v37  ;;  %v5834_v40 = vpack.c.bf16 %v5194_v38, %v5193_v23  ;;  %v5195_v41 = vld [vmem:[%s6406_s20 + $0xf0] sm:$0xff] }
0x1642   : > { %v4480_v45 = vsel %vm1037_vm1, %v4472_v43, 0.0  ;;  %5833 = vmatpush3.bf16.msra.mxu0 %v5830_v37 }
0x1643   : > { %4481 = vadd.xlane.f32.xlu1 %v4480_v45  ;;  %v4477_v46 = vsel %vm1037_vm1, %v4471_v44, 0.0  ;;  %5835 = vmatprep.subr.bf16.mxu0 %v5834_v40  ;;  %v5178_v45 = vld [vmem:[%s6429_s22 + $0x1] ss:$0 sm:$0xff] }
0x1644   : > { %4478 = vadd.xlane.f32.xlu0 %v4477_v46 }
0x1646   : > { %5837 = vmatpush3.bf16.msra.mxu0 %v5834_v40 }
0x16d0   : > { %v4482_v47 = vpop.xlane.xlu1 %4481 }
0x16d1   : > { %v4484_v48 = vmul.f32 0.015625, %v4482_v47  ;;  %v4479_v49 = vpop.xlane.xlu0 %4478 }
0x16d2   : > { %v4483_v50 = vmul.f32 0.015625, %v4479_v49 }
0x16d3   : > { %v4486_v4 = vsub.f32 %v4472_v43, %v4484_v48  ;;  %v5196_v43 = vld [vmem:[%s6406_s20 + $0xf8] sm:$0xff] }
0x16d4   : > { %v4485_v3 = vsub.f32 %v4471_v44, %v4483_v50  ;;  %v5838_v44 = vpack.c.bf16 %v5196_v43, %v5195_v41 }
0x16d5   : > { %v4488_v42 = vmul.f32 %v4486_v4, %v4486_v4 }
0x16d6   : > { %v4487_v52 = vmul.f32 %v4485_v3, %v4485_v3  ;;  %5839 = vmatprep.subr.bf16.mxu0 %v5838_v44 }
0x16d7   : > { %v4492_v53 = vsel %vm1037_vm1, %v4488_v42, 0.0  ;;  %5841 = vmatpush3.bf16.msra.mxu0 %v5838_v44 }
0x16d8   : > { %v4489_v39 = vsel %vm1037_vm1, %v4487_v52, 0.0 }
0x16d9   : > { %4490 = vadd.xlane.f32.xlu0 %v4489_v39 }
0x16dd   : > { %4493 = vadd.xlane.f32.xlu0 %v4492_v53 }
0x1766   : > { %v4491_v9 = vpop.xlane.xlu0 %4490 }
0x1767   : > { %v4495_v7 = vmul.f32 0.015625, %v4491_v9 }
0x1769   : > { %v4497_v60 = vadd.f32 1e-12, %v4495_v7 }
0x176a   : > { %v4494_v10 = vpop.xlane.xlu0 %4493 }
0x176b   : > { %5939 = vrsqrt.f32 %v4497_v60  ;;  %v4496_v11 = vmul.f32 0.015625, %v4494_v10 }
0x176d   : > { %v4498_v12 = vadd.f32 1e-12, %v4496_v11 }
0x176f   : > { %5941 = vrsqrt.f32 %v4498_v12 }
0x1775   : > { %v5940_v54 = vpop.eup %5939 }
0x1776   : > { %v4501_v17 = vmul.f32 %v5940_v54, %v4485_v3 }
0x1778   : > { %v4509_v16 = vmul.f32 %v5167_v13, %v4501_v17 }
0x1779   : > { %v5942_v18 = vpop.eup %5941 }
0x177a   : > { %v4502_v20 = vmul.f32 %v5942_v18, %v4486_v4  ;;  %v6666_v21 = vadd.f32 %v5168_v15, %v4509_v16 }
0x177c   : > { %v4510_v22 = vmul.f32 %v5167_v13, %v4502_v20  ;;  %5636 = vmatprep.mubr.msk.f32.mxu1 %vm1037_vm1, %v6666_v21 }
0x177e   : > { %v6670_v24 = vadd.f32 %v5168_v15, %v4510_v22 }
0x1780   : > { %5637 = vmatmul.mubr.msk.f32.vlgmr.msra.gmra.mrb[36].mxu1 %vm1037_vm1, %v6670_v24 }
0x1853   : > { %v5638_v46 = vpop.f32.mrb[36].mxu1 }
0x1854   : > { %v4614_v47 = vadd.f32 %v5638_v46, %v5178_v45  ;;  %v4608_v48 = vpop.f32.mrb[37].mxu1 }
0x1855   : > { %v4609_v49 = vadd.f32 %v5178_v45, %v4608_v48 }
0x1856   : > { %v4618_v50 = vmul.f32 %v4614_v47, %v4614_v47 }
0x1857   : > { %v4617_v4 = vmul.f32 %v4609_v49, %v4609_v49 }
0x1858   : > { %v4620_v3 = vmul.f32 %v4618_v50, %v4614_v47 }
0x1859   : > { %v4619_v52 = vmul.f32 %v4617_v4, %v4609_v49 }
0x185a   : > { %v4622_v39 = vmul.f32 0.044715, %v4620_v3 }
0x185b   : > { %v4621_v42 = vmul.f32 0.044715, %v4619_v52 }
0x185c   : > { %v4624_v53 = vadd.f32 %v4622_v39, %v4614_v47 }
0x185d   : > { %v4623_v56 = vadd.f32 %v4621_v42, %v4609_v49 }
0x185e   : > { %v4626_v58 = vmul.f32 0.7978846, %v4624_v53 }
0x185f   : > { %v4625_v59 = vmul.f32 0.7978846, %v4623_v56 }
0x1860   : > { %5943 = vtanh.f32 %v4626_v58 }
0x1861   : > { %5945 = vtanh.f32 %v4625_v59 }
0x186a   : > { %v5944_v51 = vpop.eup %5943 }
0x186b   : > { %v5946_v61 = vpop.eup %5945  ;;  %v4630_v62 = vadd.f32 1.0, %v5944_v51 }
0x186c   : > { %v4629_v55 = vadd.f32 1.0, %v5946_v61 }
0x186d   : > { %v4632_v63 = vmul.f32 0.5, %v4630_v62 }
0x186e   : > { %v4631_v57 = vmul.f32 0.5, %v4629_v55 }
0x186f   : > { %v4634_v5 = vmul.f32 %v4632_v63, %v4614_v47 }
0x1870   : > { %v4633_v2 = vmul.f32 %v4631_v57, %v4609_v49 }
0x1872   : > { %5671 = vmatprep.mubr.f32.mxu0 %v4633_v2 }
0x1873   : > { %5672 = vmatmul.mubr.f32.vlgmr.msra.gmra.mrb[46].mxu0 %v4634_v5 }
0x1946   : > { %v5673_v9 = vpop.f32.mrb[46].mxu0 }
0x1947   : > { %v4732_v7 = vadd.f32 %v5673_v9, %v5198_v6  ;;  %v4726_v60 = vpop.f32.mrb[47].mxu0 }
0x1948   : > { %v4727_v10 = vadd.f32 %v5198_v6, %v4726_v60 }
0x1949   : > { %v4736_v11 = vadd.f32 %v4732_v7, %v6670_v24 }
0x194a   : > { %v4735_v12 = vadd.f32 %v4727_v10, %v6666_v21 }
0x194b   : > { %v4744_v54 = vsel %vm1037_vm1, %v4736_v11, 0.0 }
0x194c   : > { %4745 = vadd.xlane.f32.xlu1 %v4744_v54  ;;  %v4741_v13 = vsel %vm1037_vm1, %v4735_v12, 0.0 }
0x194d   : > { %4742 = vadd.xlane.f32.xlu0 %v4741_v13 }
0x19d9   : > { %v4746_v17 = vpop.xlane.xlu1 %4745 }
0x19da   : > { %v4748_v15 = vmul.f32 0.015625, %v4746_v17  ;;  %v4743_v16 = vpop.xlane.xlu0 %4742 }
0x19db   : > { %v4747_v18 = vmul.f32 0.015625, %v4743_v16 }
0x19dc   : > { %v4750_v20 = vsub.f32 %v4736_v11, %v4748_v15 }
0x19dd   : > { %v4749_v22 = vsub.f32 %v4735_v12, %v4747_v18 }
0x19de   : > { %v4752_v25 = vmul.f32 %v4750_v20, %v4750_v20 }
0x19df   : > { %v4751_v26 = vmul.f32 %v4749_v22, %v4749_v22 }
0x19e0   : > { %v4756_v27 = vsel %vm1037_vm1, %v4752_v25, 0.0 }
0x19e1   : > { %4757 = vadd.xlane.f32.xlu1 %v4756_v27  ;;  %v4753_v21 = vsel %vm1037_vm1, %v4751_v26, 0.0 }
0x19e2   : > { %4754 = vadd.xlane.f32.xlu0 %v4753_v21 }
0x1a6e   : > { %v4758_v24 = vpop.xlane.xlu1 %4757 }
0x1a6f   : > { %v4760_v14 = vmul.f32 0.015625, %v4758_v24  ;;  %v4755_v8 = vpop.xlane.xlu0 %4754 }
0x1a70   : > { %v4759_v19 = vmul.f32 0.015625, %v4755_v8 }
0x1a71   : > { %v4762_v28 = vadd.f32 1e-12, %v4760_v14 }
0x1a72   : > { %v4761_v29 = vadd.f32 1e-12, %v4759_v19 }
0x1a73   : > { %5947 = vrsqrt.f32 %v4762_v28 }
0x1a74   : > { %5949 = vrsqrt.f32 %v4761_v29 }
0x1a7d   : > { %v5948_v0 = vpop.eup %5947 }
0x1a7e   : > { %v5950_v30 = vpop.eup %5949  ;;  %v4766_v31 = vmul.f32 %v5948_v0, %v4750_v20 }
0x1a7f   : > { %v4765_v33 = vmul.f32 %v5950_v30, %v4749_v22 }
0x1a80   : > { %v4774_v34 = vmul.f32 %v5201_v1, %v4766_v31 }
0x1a81   : > { %v4773_v35 = vmul.f32 %v5201_v1, %v4765_v33 }
0x1a82   : > { %v4782_v36 = vadd.f32 %v5202_v32, %v4774_v34 }
0x1a83   : > { %v4781_v37 = vadd.f32 %v5202_v32, %v4773_v35 }
0x1a84   : > { %v4784_v23 = vrot.slane %v4782_v36, 7 }
0x1a86   : > { %v4787_v38 = vsel %vm4786_vm6, %v4781_v37, %v4784_v23 }
0x1a87   : > { %4789 = vst.msk [vmem:[%s868_s1] sm:$0x3] %vm4788_vm7, %v4787_v38 }
0x1a88 PF: > { %s28_s27 = sadd.s32 1, %s5959_s27  }
0x1a89   : > { %p25_p4 = scmp.ge.s32.totalorder %s28_s27, 4  }
0x1a8b   :  { %27 = sbr.rel (!%p25_p4) target bundleno = 9 (0x9), region = 186 }

</bundles_post_ra>
